<compile_context>
chip_gen: v7x
topology: tpu7x:2x2x1
jax: 0.10.0
libtpu: 0.0.40
codegen_flags: <defaults>
</compile_context>

<pallas_src>
import jax
import jax.numpy as jnp
from jax import lax
from jax.experimental import pallas as pl
from jax.experimental.pallas import tpu as pltpu

_LANE = 128


def _sublane_multiple(dtype):
    itemsize = jnp.dtype(dtype).itemsize
    return max(8 * (4 // max(itemsize, 1)), 8)  # f32 -> 8, bf16 -> 16, int8 -> 32


def _vmem_budget_and_limit():
    """(byte budget for double-buffered tiles, scoped VMEM limit) per generation."""
    try:
        cap = int(pltpu.get_tpu_info().vmem_capacity_bytes)
    except Exception:
        cap = 64 * 1024 * 1024  # conservative fallback: v7x per-TC physical VMEM
    limit = min((cap * 3) // 4, 64 * 1024 * 1024)      # 64 MiB v5e/v6e, 48 MiB v7x
    budget = max(limit - 12 * 1024 * 1024, 8 * 1024 * 1024)  # headroom for temps
    return budget, limit


def _plan_flatten(total, sub):
    """Pick a lane-dense (R, C) flattening; pad `total` if needed.

    Returns (padded_total, R, C) with C a multiple of 128 so loads and the
    (R, C*n) output slab are lane-dense/unmasked.  C is capped at 512 so the
    in-kernel interleave chunks stay small even under a worst-case lowering;
    since every block spans the full width of a contiguous flat array, DMA
    contiguity does not depend on C.
    """
    candidates = (512, 256, 128)
    # Prefer a C that leaves room for >= 2 row tiles (v7x megacore split).
    for c in candidates:
        if total % c == 0 and total // c >= 2 * sub:
            return total, total // c, c
    for c in candidates:
        if total % c == 0:
            return total, total // c, c
    # Not divisible by 128: pad up to a multiple of 8*128; slice the tail off
    # the output afterwards.  (No masked-store fallback path.)
    c = _LANE
    total_p = ((total + 8 * _LANE - 1) // (8 * _LANE)) * (8 * _LANE)
    return total_p, total_p // c, c


def _choose_tile_rows(R, C, n, dtype, sub, budget):
    """Row-tile so double-buffered inputs + output slab fit `budget` bytes."""
    itemsize = jnp.dtype(dtype).itemsize
    # 2x (pipeline double-buffer) * (n input tiles + one n*C-wide output tile).
    bytes_per_row = 4 * n * C * itemsize
    tr = budget // max(bytes_per_row, 1)
    tr = max((tr // sub) * sub, sub)
    if tr < R:
        return tr
    # Whole array would fit in one tile.  Still take >= 2 grid steps when
    # possible so the "parallel" axis can shard across v7x's 2 TensorCores.
    if R >= 2 * sub:
        half = -(-R // 2)
        return max(((half + sub - 1) // sub) * sub, sub)
    return R  # full extent: satisfies the (8,128) rule via the full-dim exception


def _make_stack_kernel(n, c, tr, rows_chunk):
    """Interleave n (TR, C) tiles into one lane-dense (TR, C*n) slab.

    The interleave runs in `rows_chunk`-row chunks so the (rows, C, n)
    intermediate stays a few vregs (bounded VMEM temp) and each chunk is
    written with a single wide (multiple-of-128-lane) store.
    """
    num_chunks = tr // rows_chunk
    tail = tr - num_chunks * rows_chunk

    def interleave(in_refs, out_ref, start, rows):
        chunk = jnp.stack([r[pl.ds(start, rows), :] for r in in_refs], axis=-1)
        out_ref[pl.ds(start, rows), :] = chunk.reshape(rows, c * n)

    def kernel(*refs):
        in_refs = refs[:n]
        out_ref = refs[n]

        if num_chunks <= 8:
            for j in range(num_chunks):  # static, fully unrolled
                interleave(in_refs, out_ref, j * rows_chunk, rows_chunk)
        else:
            def body(j, carry):
                start = pl.multiple_of(j * rows_chunk, rows_chunk)
                interleave(in_refs, out_ref, start, rows_chunk)
                return carry

            lax.fori_loop(0, num_chunks, body, 0, unroll=False)

        if tail:  # static remainder (only for tiny full-extent tiles)
            interleave(in_refs, out_ref, num_chunks * rows_chunk, tail)

    return kernel


def stack_last_dim(*args, min_pallas_bytes=256 * 1024):
    """Equivalent of torch.stack(args, dim=-1) as a Pallas TPU kernel."""
    n = len(args)
    assert n >= 1
    shape = args[0].shape
    dtype = args[0].dtype
    for a in args:
        assert a.shape == shape, "all stacked inputs must share a shape"
        assert a.dtype == dtype, "all stacked inputs must share a dtype"

    total = 1
    for d in shape:
        total *= int(d)
    itemsize = jnp.dtype(dtype).itemsize

    # Small-input fast path: fixed pallas_call / pipeline-prologue overhead
    # dominates tiny stacks; XLA's native stack/concat fusion wins there.
    if n * total * itemsize < min_pallas_bytes:
        return jnp.stack(args, axis=-1)

    sub = _sublane_multiple(dtype)
    budget, vmem_limit = _vmem_budget_and_limit()
    total_p, R, C = _plan_flatten(total, sub)

    flat = [a.reshape(-1) for a in args]
    if total_p != total:
        flat = [jnp.pad(f, (0, total_p - total)) for f in flat]
    flat = [f.reshape(R, C) for f in flat]

    TR = _choose_tile_rows(R, C, n, dtype, sub, budget)
    rows_chunk = min(2 * sub, TR)
    grid = (pl.cdiv(R, TR),)

    # TODO(synk): optional v7x micro-opt — pltpu.bitcast-pack 2xbf16 / 4xint8
    # into u32 before interleaving to halve/quarter shuffle + store op counts.
    out = pl.pallas_call(
        _make_stack_kernel(n, C, TR, rows_chunk),
        out_shape=jax.ShapeDtypeStruct((R, C * n), dtype),
        grid=grid,
        in_specs=[pl.BlockSpec((TR, C), lambda i: (i, 0)) for _ in range(n)],
        out_specs=pl.BlockSpec((TR, C * n), lambda i: (i, 0)),
        compiler_params=pltpu.CompilerParams(
            dimension_semantics=("parallel",),
            vmem_limit_bytes=int(vmem_limit),
        ),
        cost_estimate=pl.CostEstimate(
            flops=0,
            transcendentals=0,
            bytes_accessed=2 * n * total_p * itemsize,
        ),
    )(*flat)

    # Row-major (R, C*n) holds (flat position p, input i) at p*n + i, which is
    # exactly the row-major layout of shape + (n,).  Padded tail (if any) sits
    # at the end and is sliced off.
    out_flat = out.reshape(-1)
    if total_p != total:
        out_flat = out_flat[: total * n]
    return out_flat.reshape(*shape, n)


if __name__ == "__main__":
    key = jax.random.PRNGKey(0)
    k1, k2, k3, k4 = jax.random.split(key, 4)

    # 1) Small feature-map shapes (B, C, H, W); force the Pallas path so the
    #    kernel itself is exercised at this size.
    shape = (2, 4, 16, 16)
    a = jax.random.normal(k1, shape, dtype=jnp.float32)
    b = jax.random.normal(k2, shape, dtype=jnp.float32)
    c = jax.random.normal(k3, shape, dtype=jnp.float32)

    out = jax.block_until_ready(stack_last_dim(a, b, c, min_pallas_bytes=0))
    ref = jnp.stack([a, b, c], axis=-1)
    assert out.shape == (2, 4, 16, 16, 3), out.shape
    assert out.dtype == ref.dtype
    assert jnp.array_equal(out, ref), "mismatch vs reference stack (pallas path)"

    # 2) Small-input fast path (default threshold).
    out_fast = jax.block_until_ready(stack_last_dim(a, b, c))
    assert jnp.array_equal(out_fast, ref), "mismatch vs reference stack (fast path)"

    # 3) Pad-and-slice path: total elements not divisible by 128.
    ka, kb = jax.random.split(k4)
    shape2 = (2, 3, 9, 5)
    x = jax.random.normal(ka, shape2, dtype=jnp.float32)
    y = jax.random.normal(kb, shape2, dtype=jnp.float32)
    out2 = jax.block_until_ready(stack_last_dim(x, y, min_pallas_bytes=0))
    assert jnp.array_equal(out2, jnp.stack([x, y], axis=-1)), "mismatch (pad path)"

    # 4) bf16 (16-sublane packing) path.
    shape3 = (4, 4, 16, 32)
    xb = jax.random.normal(ka, shape3, dtype=jnp.bfloat16)
    yb = jax.random.normal(kb, shape3, dtype=jnp.bfloat16)
    out3 = jax.block_until_ready(stack_last_dim(xb, yb, min_pallas_bytes=0))
    assert jnp.array_equal(out3, jnp.stack([xb, yb], axis=-1)), "mismatch (bf16 path)"

    # 5) Multi-step grid + in-kernel fori_loop chunked interleave.
    shape4 = (8, 8, 64, 64)
    xl = jax.random.normal(ka, shape4, dtype=jnp.float32)
    yl = jax.random.normal(kb, shape4, dtype=jnp.float32)
    out4 = jax.block_until_ready(stack_last_dim(xl, yl))
    assert jnp.array_equal(out4, jnp.stack([xl, yl], axis=-1)), "mismatch (looped path)"

    print("KERNEL_OK")
</pallas_src>

<mosaic_0001>
module attributes {stable_mosaic.version = 11 : i64} {
  func.func @kernel(%arg0: i32, %arg1: memref<8x128xf32, #tpu.memory_space<vmem>>, %arg2: memref<8x128xf32, #tpu.memory_space<vmem>>, %arg3: memref<8x128xf32, #tpu.memory_space<vmem>>, %arg4: memref<8x384xf32, #tpu.memory_space<vmem>>) attributes {dimension_semantics = [#tpu.dimension_semantics<parallel>], iteration_bounds = array<i64: 2>, scalar_prefetch = 0 : i64, scratch_operands = 0 : i64, tpu.core_type = #tpu.core_type<tc>, window_params = [{transform_indices = @transform_0, window_bounds = array<i64: 8, 128>}, {transform_indices = @transform_1, window_bounds = array<i64: 8, 128>}, {transform_indices = @transform_2, window_bounds = array<i64: 8, 128>}, {transform_indices = @transform_3, window_bounds = array<i64: 8, 384>}]} {
    %c0 = arith.constant 0 : index
    %c0_0 = arith.constant 0 : index
    %0 = vector.load %arg1[%c0, %c0_0] : memref<8x128xf32, #tpu.memory_space<vmem>>, vector<8x128xf32>
    %c0_1 = arith.constant 0 : index
    %c0_2 = arith.constant 0 : index
    %1 = vector.load %arg2[%c0_1, %c0_2] : memref<8x128xf32, #tpu.memory_space<vmem>>, vector<8x128xf32>
    %c0_3 = arith.constant 0 : index
    %c0_4 = arith.constant 0 : index
    %2 = vector.load %arg3[%c0_3, %c0_4] : memref<8x128xf32, #tpu.memory_space<vmem>>, vector<8x128xf32>
    %3 = vector.shape_cast %0 : vector<8x128xf32> to vector<8x128x1xf32>
    %4 = vector.shape_cast %1 : vector<8x128xf32> to vector<8x128x1xf32>
    %5 = vector.shape_cast %2 : vector<8x128xf32> to vector<8x128x1xf32>
    %6 = tpu.concatenate %3, %4, %5 in 2 : vector<8x128x1xf32>, vector<8x128x1xf32>, vector<8x128x1xf32> -> vector<8x128x3xf32>
    %7 = vector.shape_cast %6 : vector<8x128x3xf32> to vector<8x384xf32>
    %c0_5 = arith.constant 0 : index
    %c0_6 = arith.constant 0 : index
    %8 = vector.load %arg4[%c0_5, %c0_6] : memref<8x384xf32, #tpu.memory_space<vmem>>, vector<8x384xf32>
    tpu.vector_store %arg4[%c0_5, %c0_6], %7 {strides = array<i32>} : memref<8x384xf32, #tpu.memory_space<vmem>>, vector<8x384xf32>,
    return
  }
  func.func @transform_0(%arg0: i32) -> (i32, i32) {
    %c0_i32 = arith.constant 0 : i32
    %c0_i32_0 = arith.constant 0 : i32
    return %arg0, %c0_i32 : i32, i32
  }
  func.func @transform_1(%arg0: i32) -> (i32, i32) {
    %c0_i32 = arith.constant 0 : i32
    %c0_i32_0 = arith.constant 0 : i32
    return %arg0, %c0_i32 : i32, i32
  }
  func.func @transform_2(%arg0: i32) -> (i32, i32) {
    %c0_i32 = arith.constant 0 : i32
    %c0_i32_0 = arith.constant 0 : i32
    return %arg0, %c0_i32 : i32, i32
  }
  func.func @transform_3(%arg0: i32) -> (i32, i32) {
    %c0_i32 = arith.constant 0 : i32
    %c0_i32_0 = arith.constant 0 : i32
    return %arg0, %c0_i32 : i32, i32
  }
}

</mosaic_0001>

<bundles_post_ra>
// kernel: tpu_custom_call.1
= control target key start
LH: loop header
LB: loop body
LE: loop exit
PB: predicated region body
PF: predicated region fallthrough
CT: control target
= control target key end

     0   :  { %s8883_s0 = inlined_call_operand.hbm [shape: f32[16,128], index: 0, kind: input, shape index: {}]   ;;  %s8884_s1 = inlined_call_operand.hbm [shape: f32[16,128], index: 1, kind: input, shape index: {}]   ;;  %s8885_s2 = inlined_call_operand.hbm [shape: f32[16,128], index: 2, kind: input, shape index: {}]   ;;  %s8886_s3 = inlined_call_operand.hbm [shape: f32[16,384], index: 3, kind: output, shape index: {}]  }
   0x1   :  { %8926 = sst [smem:[#allocation314_spill]] %s8884_s1 }
   0x2   :  { %8 = vsyncpa [#allocation3], 0 }
   0x3   :  { %10 = vsyncpa [#allocation3 + $0x1], 0 }
   0x4   :  { %11 = vsyncpa [#allocation6], 0 }
   0x5   :  { %13 = vsyncpa [#allocation6 + $0x1], 0 }
   0x6   :  { %14 = vsyncpa [#allocation4], 0 }
   0x7   :  { %16 = vsyncpa [#allocation4 + $0x1], 0  ;;  %s5711_s12 = smov 0   ;;  %s5713_s13 = smov 0  }
   0x8   :  { %s5715_s14 = smov 0   ;;  %s5717_s15 = smov 0  }
   0x9 LB: > { %s5732_s16 = sadd.s32 4294967295, %s5556_s15   ;;  %s5193_s17 = sadd.s32 4294967294, %s5556_s15   ;;  %s5556_s15 = sphi %s5717_s15, %s9619_s15   ;;  %s5552_s14 = sphi %s5715_s14, %s9618_s14   ;;  %s5548_s13 = sphi %s5713_s13, %s9617_s13   ;;  %s5544_s12 = sphi %s5711_s12, %s9616_s12  }
   0xa   : > { %s5736_s18 = sadd.s32 1, %s5556_s15   ;;  %s29_s19 = sadd.s32 1, %s5552_s14 }
   0xb   : > { %s26_s20 = ssub.s32 %s5556_s15, %s5736_s18  ;;  %p36_p0 = scmp.ne.s32.totalorder %s5552_s14, %s5548_s13 }
   0xc   : > { %p27_p1 = scmp.eq.s32.totalorder %s26_s20, 0  ;;  %p37_p2 = scmp.eq.s32.totalorder %s5556_s15, 0 }
   0xd   : > { %p42_p3 = scmp.ne.s32.totalorder %s5548_s13, %s5544_s12  ;;  %p43_p4 = scmp.eq.s32.totalorder %s5732_s16, 0 }
   0xe   : > { %s5748_s21 = scalar_select %p27_p1, %s5552_s14, %s29_s19  }
   0xf   : > { %p38_p5 = por %p37_p2, %p36_p0  ;;  %p5750_p6 = por %p43_p4, %p42_p3 }
  0x10   : > { %p118_p7 = scmp.eq.s32.totalorder %s5732_s16, 1  ;;  %p124_p8 = scmp.eq.s32.totalorder %s5193_s17, 1 }
  0x11   : > { %s8927_s22 = scalar_select %p5750_p6, 1, 0 }
  0x12   : > { %p5233_p10 = scmp.lt.s32.totalorder %s5556_s15, 2  ;;  %p5757_p11 = por %p118_p7, %p36_p0 }
  0x13   : > { %p5761_p12 = por %p124_p8, %p42_p3  ;;  %s144_s25 = sand.u32 1, %s5552_s14  }
  0x14   : > { %s8928_s23 = scalar_select %p5757_p11, 1, 0 }
  0x15   : > { %s8929_s24 = scalar_select %p5761_p12, 1, 0 }
  0x16   : > { %s5767_s26 = sshll.u32 %s5556_s15, 7  ;;  %s5771_s27 = sshll.u32 %s144_s25, 3 }
  0x17   : > { %p5773_p13 = pnand %p5233_p10, %p38_p5  ;;  %s162_s29 = sand.u32 1, %s5556_s15  }
  0x18   : > { %s8931_s1 = sld [smem:[#allocation314_spill]]  ;;  %s166_s6 = scalar_lea.vmem [#allocation5], %s5771_s27 }
  0x19   : > { %s8930_s28 = scalar_select %p5773_p13, 1, 0 }
  0x1a   : > { %s173_s7 = sshll.u32 %s166_s6, 4  ;;  %s5788_s8 = scalar_lea.sflag [#allocation6], %s162_s29  ;;  %s5785_s7 = int_to_ptr.vmem [resolvable:$true] %s173_s7 }
  0x1b   : > { %p5794_p2 = pneg %p5773_p13 }
  0x1e   : > { %s5782_s5 = scalar_lea.hbm %s8931_s1, %s5767_s26  ;;  %s5401_s19 = scalar_lea.hbm %s8931_s1, 256 }
  0x1f   : > { %s5396_s9 = scalar_lea.hbm %s5782_s5, 128  ;;  %p5402_p5 = scmp.lt.u32.totalorder %s5782_s5, %s8931_s1 }
  0x20   : > { %p5397_p1 = scmp.ne.s32.totalorder %s5782_s5, %s5396_s9  ;;  %p5403_p7 = scmp.lt.u32.totalorder %s5401_s19, %s5396_s9 }
  0x21   : > { %p5405_p10 = scmp.lt.u32.totalorder %s5396_s9, %s5782_s5 }
  0x22   : > { %p5399_p3 = pnand %p5794_p2, %p5397_p1  ;;  %p5404_p8 = por %p5403_p7, %p5402_p5 }
  0x24   : > { %p5400_p4 = pneg %p5399_p3  ;;  %p5406_p9 = por %p5405_p10, %p5404_p8 }
  0x26   : > { %p5407_p0 = pnand %p5406_p9, %p5400_p4 }
  0x28   : > { %5410 = shalt.err (!%p5407_p0)
}
  0x29   : > { %s5411_s29 = scalar_lea.vmem %s5785_s7, 128  ;;  %s5558_s4 = smov [#allocation5]  }
  0x2a   : > { %p5412_p1 = scmp.ne.s32.totalorder %s5785_s7, %s5411_s29  ;;  %s5416_s6 = sshll.u32 %s5558_s4, 4  ;;  %s5417_s6 = int_to_ptr.vmem [resolvable:$false] %s5416_s6 }
  0x2b   : > { %s5418_s11 = scalar_lea.vmem %s5417_s6, 256  ;;  %p5419_p11 = scmp.lt.s32.totalorder %s5785_s7, %s5417_s6 }
  0x2c   : > { %p5414_p3 = pnand %p5412_p1, %p5794_p2  ;;  %p5420_p6 = scmp.lt.s32.totalorder %s5418_s11, %s5411_s29 }
  0x2e   : > { %p5415_p12 = pneg %p5414_p3  ;;  %p5421_p5 = por %p5420_p6, %p5419_p11 }
  0x30   : > { %p5422_p7 = pnand %p5421_p5, %p5415_p12 }
  0x32   : > { %5425 = shalt.err (!%p5422_p7)
}
  0x33   : > { %5225 = dma.hbm_to_vmem [thread:$0]  (!%p5773_p13), %s5782_s5, 128, %s5785_s7, %s5788_s8  }
  0x34   : > { %p196_p9 = scmp.lt.s32.totalorder %s5556_s15, 3  ;;  %s5823_s19 = scalar_lea.hbm %s8883_s0, %s5767_s26 }
  0x35   : > { %p8933_p6 = scmp.ge.s32.totalorder %s5556_s15, 1  ;;  %s148_s30 = scalar_lea.vmem [#allocation2], %s5771_s27 }
  0x36   : > { %s155_s29 = sshll.u32 %s148_s30, 4  ;;  %s145_s5 = scalar_lea.sflag [#allocation3], %s144_s25  ;;  %s156_s29 = int_to_ptr.vmem [resolvable:$true] %s155_s29 }
  0x37   : > { %p5827_p11 = pnand %p8933_p6, %p196_p9  ;;  %s5426_s7 = scalar_lea.hbm %s5823_s19, 128 }
  0x38   : > { %p5427_p12 = scmp.ne.s32.totalorder %s5823_s19, %s5426_s7  ;;  %s5431_s11 = scalar_lea.hbm %s8883_s0, 256 }
  0x39   : > { %s8934_s20 = scalar_select %p5827_p11, 1, 0 }
  0x3a   : > { %p5429_p0 = pnand %p5427_p12, %p5794_p2  ;;  %p5432_p8 = scmp.lt.u32.totalorder %s5823_s19, %s8883_s0 }
  0x3b   : > { %p5433_p10 = scmp.lt.u32.totalorder %s5431_s11, %s5426_s7  ;;  %p5435_p3 = scmp.lt.u32.totalorder %s5426_s7, %s5823_s19 }
  0x3c   : > { %p5430_p4 = pneg %p5429_p0 }
  0x3d   : > { %p5434_p1 = por %p5433_p10, %p5432_p8 }
  0x3f   : > { %p5436_p5 = por %p5435_p3, %p5434_p1 }
  0x41   : > { %p5437_p7 = pnand %p5436_p5, %p5430_p4 }
  0x43   : > { %5440 = shalt.err (!%p5437_p7)
}
  0x44   : > { %s5441_s25 = scalar_lea.vmem %s156_s29, 128  ;;  %s5559_s30 = smov [#allocation2]  }
  0x45   : > { %p5442_p9 = scmp.ne.s32.totalorder %s156_s29, %s5441_s25  ;;  %s5446_s1 = sshll.u32 %s5559_s30, 4  ;;  %s5447_s1 = int_to_ptr.vmem [resolvable:$false] %s5446_s1 }
  0x46   : > { %s5448_s4 = scalar_lea.vmem %s5447_s1, 256  ;;  %p5449_p0 = scmp.lt.s32.totalorder %s156_s29, %s5447_s1 }
  0x47   : > { %p5444_p6 = pnand %p5442_p9, %p5794_p2  ;;  %p5450_p11 = scmp.lt.s32.totalorder %s5448_s4, %s5441_s25 }
  0x49   : > { %p5445_p12 = pneg %p5444_p6  ;;  %p5451_p13 = por %p5450_p11, %p5449_p0 }
  0x4b   : > { %p5452_p8 = pnand %p5451_p13, %p5445_p12 }
  0x4d   : > { %5455 = shalt.err (!%p5452_p8)
}
  0x4e   : > { %p8935_p10 = scmp.ne.s32.totalorder %s8930_s28, 0  ;;  %s5855_s11 = scalar_lea.hbm %s8885_s2, %s5767_s26 }
  0x4f   : > { %s184_s1 = scalar_lea.vmem [#allocation7], %s5771_s27  ;;  %s5456_s17 = scalar_lea.hbm %s5855_s11, 128 }
  0x50   : > { %5222 = dma.hbm_to_vmem [thread:$0]  (!%p8935_p10), %s5823_s19, 128, %s156_s29, %s145_s5  }
  0x51   : > { %s191_s9 = sshll.u32 %s184_s1, 4  ;;  %p5457_p13 = scmp.ne.s32.totalorder %s5855_s11, %s5456_s17  ;;  %s192_s9 = int_to_ptr.vmem [resolvable:$true] %s191_s9 }
  0x52   : > { %s5461_s19 = scalar_lea.hbm %s8885_s2, 256  ;;  %p5462_p1 = scmp.lt.u32.totalorder %s5855_s11, %s8885_s2 }
  0x53   : > { %p5459_p11 = pnand %p5457_p13, %p5794_p2  ;;  %p5463_p3 = scmp.lt.u32.totalorder %s5461_s19, %s5456_s17 }
  0x54   : > { %p5465_p7 = scmp.lt.u32.totalorder %s5456_s17, %s5855_s11 }
  0x55   : > { %p5460_p4 = pneg %p5459_p11  ;;  %p5464_p5 = por %p5463_p3, %p5462_p1 }
  0x57   : > { %p5466_p9 = por %p5465_p7, %p5464_p5 }
  0x59   : > { %p5467_p6 = pnand %p5466_p9, %p5460_p4 }
  0x5b   : > { %5470 = shalt.err (!%p5467_p6)
}
  0x5c   : > { %s5471_s26 = scalar_lea.vmem %s192_s9, 128  ;;  %s5560_s27 = smov [#allocation7]  }
  0x5d   : > { %p5472_p12 = scmp.ne.s32.totalorder %s192_s9, %s5471_s26  ;;  %s5476_s4 = sshll.u32 %s5560_s27, 4  ;;  %s5477_s4 = int_to_ptr.vmem [resolvable:$false] %s5476_s4 }
  0x5e   : > { %s5478_s7 = scalar_lea.vmem %s5477_s4, 256  ;;  %p5479_p13 = scmp.lt.s32.totalorder %s192_s9, %s5477_s4 }
  0x5f   : > { %p5474_p0 = pnand %p5472_p12, %p5794_p2  ;;  %p5480_p11 = scmp.lt.s32.totalorder %s5478_s7, %s5471_s26 }
  0x61   : > { %p5475_p8 = pneg %p5474_p0  ;;  %p5481_p10 = por %p5480_p11, %p5479_p13 }
  0x63   : > { %p5482_p1 = pnand %p5481_p10, %p5475_p8 }
  0x65   : > { %5485 = shalt.err (!%p5482_p1)
}
  0x66   : > { %p8936_p3 = scmp.ne.s32.totalorder %s8930_s28, 0  ;;  %p8937_p4 = scmp.ne.s32.totalorder %s8934_s20, 0 }
  0x68   : > { %5228 = dma.hbm_to_vmem [thread:$0]  (!%p8936_p3), %s5855_s11, 128, %s192_s9, %s5788_s8  }
  0x69   : > { %200 = sbr.rel (%p8937_p4) target bundleno = 1382 (0x566), region = 32 }
  0x70   : > { %s5879_s10 = sand.u32 1, %s5548_s13   ;;  %p8938_p2 = scmp.ne.s32.totalorder %s8927_s22, 0 }
  0x71   : > { %s5882_s6 = sshll.u32 %s5879_s10, 3  ;;  %s203_s1 = scalar_lea.sflag [#allocation3], %s5879_s10 }
  0x72   : > { %s206_s17 = scalar_lea.vmem [#allocation2], %s5882_s6 }
  0x73   : > { %5531 = dma.done.wait (%p8938_p2), %s203_s1, 128  }
  0x74   : > { %5533 = vsyncadd (%p8938_p2), %s203_s1, 4294967168  ;;  %s211_s28 = sand.u32 1, %s5732_s16   ;;  %s215_s20 = scalar_lea.vmem [#allocation5], %s5882_s6 }
  0x75   : > { %s212_s8 = scalar_lea.sflag [#allocation6], %s211_s28 }
  0x76   : > { %5535 = dma.done.wait (%p8938_p2), %s212_s8, 256  }
  0x77   : > { %5537 = vsyncadd (%p8938_p2), %s212_s8, 4294967040  ;;  %v260_v0 = vlaneseq  ;;  %v257_v9 = vld [vmem:[%s206_s17] sm:$0xff]  ;;  %v5912_v13 = vld [vmem:[%s215_s20] sm:$0xff]  ;;  %s224_s22 = scalar_lea.vmem [#allocation7], %s5882_s6  ;;  %vm1868_vm0 = vcmask 7168   ;;  %vm1997_vm1 = vcmask 15360  }
  0x78   : > { %v5929_v20 = vld [vmem:[%s224_s22] sm:$0xff]  ;;  %s5563_s11 = smov 6   ;;  %s5564_s9 = smov 3   ;;  %vm4810_vm2 = vcmask 23552   ;;  %vm4812_vm3 = vcmask 48128   ;;  %vm4814_vm4 = vcmask 72704  }
  0x79   : > { %v5896_v1 = vshrl.u32 %v260_v0, 7  ;;  %s5565_s25 = smov 12   ;;  %s5566_s30 = smov 9   ;;  %vm4816_vm5 = vcmask 97280   ;;  %vm4818_vm6 = vcmask 121856   ;;  %vm4820_vm7 = vcmask 146432  }
  0x7a   : > { %s5567_s19 = smov 18   ;;  %s5568_s29 = smov 15   ;;  %vm4822_vm8 = vcmask 171008   ;;  %vm4824_vm9 = vcmask 195584   ;;  %vm4826_vm10 = vcmask 220160   ;;  %vm4828_vm11 = vcmask 244736  }
  0x7b   : > { %v5899_v2 = vsub.s32 0, %v5896_v1  ;;  %v396_v3 = vsub.s32 2, %v5896_v1  ;;  %v463_v4 = vsub.s32 3, %v5896_v1  ;;  %v530_v5 = vsub.s32 4, %v5896_v1  ;;  %s5569_s5 = smov 24   ;;  %s5570_s26 = smov 21  }
  0x7c   : > { %v597_v6 = vsub.s32 5, %v5896_v1  ;;  %v664_v7 = vsub.s32 6, %v5896_v1  ;;  %v731_v8 = vsub.s32 7, %v5896_v1  ;;  %v5962_v31 = vsub.s32 1, %v5896_v1  ;;  %s5571_s27 = smov 30   ;;  %s5572_s4 = smov 27  }
  0x7d   : > { %v263_v10 = vrot.slane %v257_v9, %v5899_v2  ;;  %v5908_v11 = vrot.slane %v257_v9, %v396_v3  ;;  %v5910_v12 = vrot.slane %v257_v9, %v463_v4  ;;  %v5914_v14 = vrot.slane %v257_v9, %v530_v5  ;;  %s5573_s7 = smov 36   ;;  %s5574_s6 = smov 33  }
  0x7e   : > { %v5916_v15 = vrot.slane %v257_v9, %v597_v6  ;;  %v5918_v16 = vrot.slane %v257_v9, %v664_v7  ;;  %v5920_v17 = vrot.slane %v257_v9, %v731_v8  ;;  %v5923_v18 = vrot.slane %v5912_v13, %v396_v3  ;;  %s5575_s1 = smov 42   ;;  %s5576_s17 = smov 39  }
  0x7f   : > { %v5926_v19 = vrot.slane %v5912_v13, %v463_v4  ;;  %273 = vbcast.lane.b32.xlu1 %v263_v10, 272  ;;  %v5932_v21 = vrot.slane %v5912_v13, %v530_v5  ;;  %v5935_v22 = vrot.slane %v5912_v13, %v597_v6  ;;  %v5938_v23 = vrot.slane %v5912_v13, %v664_v7  ;;  %s5577_s28 = smov 48   ;;  %s5578_s8 = smov 45  }
  0x80   : > { %v5941_v24 = vrot.slane %v5912_v13, %v731_v8  ;;  %265 = vbcast.lane.b32.xlu0 %v263_v10, 256  ;;  %v5944_v25 = vrot.slane %v5929_v20, %v396_v3  ;;  %v5947_v26 = vrot.slane %v5929_v20, %v463_v4  ;;  %v5950_v27 = vrot.slane %v5929_v20, %v530_v5  ;;  %s5579_s20 = smov 54   ;;  %s5580_s22 = smov 51  }
  0x81   : > { %v5953_v28 = vrot.slane %v5929_v20, %v597_v6  ;;  %v5956_v29 = vrot.slane %v5929_v20, %v664_v7  ;;  %v5959_v30 = vrot.slane %v5929_v20, %v731_v8  ;;  %v330_v32 = vrot.slane %v257_v9, %v5962_v31  ;;  %p9613_p5 = scmp.ne.s32.totalorder %s8928_s23, 0 }
  0x82   : > { %vm4830_vm12 = vcmask 269312   ;;  %vm4832_vm13 = vcmask 293888   ;;  %vm4834_vm14 = vcmask 318464   ;;  %vm4836_vm15 = vcmask 343040  }
  0x83   : > { %277 = vbcast.lane.b32.xlu1 %v263_v10, 280 }
  0x84   : > { %269 = vbcast.lane.b32.xlu0 %v263_v10, 264 }
  0x87   : > { %285 = vbcast.lane.b32.xlu1 %v263_v10, 296 }
  0x88   : > { %281 = vbcast.lane.b32.xlu0 %v263_v10, 288 }
  0x8b   : > { %293 = vbcast.lane.b32.xlu1 %v263_v10, 312 }
  0x8c   : > { %289 = vbcast.lane.b32.xlu0 %v263_v10, 304 }
  0x8f   : > { %301 = vbcast.lane.b32.xlu1 %v263_v10, 328 }
  0x90   : > { %297 = vbcast.lane.b32.xlu0 %v263_v10, 320 }
  0x93   : > { %309 = vbcast.lane.b32.xlu1 %v263_v10, 344 }
  0x94   : > { %305 = vbcast.lane.b32.xlu0 %v263_v10, 336 }
  0x97   : > { %317 = vbcast.lane.b32.xlu1 %v263_v10, 360 }
  0x98   : > { %313 = vbcast.lane.b32.xlu0 %v263_v10, 352 }
  0x9b   : > { %325 = vbcast.lane.b32.xlu1 %v263_v10, 376 }
  0x9c   : > { %321 = vbcast.lane.b32.xlu0 %v263_v10, 368 }
  0x9f   : > { %336 = vbcast.lane.b32.xlu1 %v330_v32, 264 }
  0xa0   : > { %332 = vbcast.lane.b32.xlu0 %v330_v32, 256 }
  0xa3   : > { %344 = vbcast.lane.b32.xlu1 %v330_v32, 280 }
  0xa4   : > { %340 = vbcast.lane.b32.xlu0 %v330_v32, 272 }
  0xa7   : > { %352 = vbcast.lane.b32.xlu1 %v330_v32, 296 }
  0xa8   : > { %348 = vbcast.lane.b32.xlu0 %v330_v32, 288 }
  0xab   : > { %360 = vbcast.lane.b32.xlu1 %v330_v32, 312 }
  0xac   : > { %356 = vbcast.lane.b32.xlu0 %v330_v32, 304 }
  0xaf   : > { %368 = vbcast.lane.b32.xlu1 %v330_v32, 328 }
  0xb0   : > { %364 = vbcast.lane.b32.xlu0 %v330_v32, 320 }
  0xb3   : > { %376 = vbcast.lane.b32.xlu1 %v330_v32, 344 }
  0xb4   : > { %372 = vbcast.lane.b32.xlu0 %v330_v32, 336 }
  0xb7   : > { %384 = vbcast.lane.b32.xlu1 %v330_v32, 360 }
  0xb8   : > { %380 = vbcast.lane.b32.xlu0 %v330_v32, 352 }
  0xbb   : > { %392 = vbcast.lane.b32.xlu1 %v330_v32, 376 }
  0xbc   : > { %388 = vbcast.lane.b32.xlu0 %v330_v32, 368 }
  0xbf   : > { %403 = vbcast.lane.b32.xlu1 %v5908_v11, 264 }
  0xc0   : > { %399 = vbcast.lane.b32.xlu0 %v5908_v11, 256 }
  0xc3   : > { %411 = vbcast.lane.b32.xlu1 %v5908_v11, 280 }
  0xc4   : > { %407 = vbcast.lane.b32.xlu0 %v5908_v11, 272 }
  0xc7   : > { %419 = vbcast.lane.b32.xlu1 %v5908_v11, 296 }
  0xc8   : > { %415 = vbcast.lane.b32.xlu0 %v5908_v11, 288 }
  0xcb   : > { %427 = vbcast.lane.b32.xlu1 %v5908_v11, 312 }
  0xcc   : > { %423 = vbcast.lane.b32.xlu0 %v5908_v11, 304 }
  0xcf   : > { %435 = vbcast.lane.b32.xlu1 %v5908_v11, 328 }
  0xd0   : > { %431 = vbcast.lane.b32.xlu0 %v5908_v11, 320 }
  0xd3   : > { %443 = vbcast.lane.b32.xlu1 %v5908_v11, 344 }
  0xd4   : > { %439 = vbcast.lane.b32.xlu0 %v5908_v11, 336 }
  0xd7   : > { %451 = vbcast.lane.b32.xlu1 %v5908_v11, 360 }
  0xd8   : > { %447 = vbcast.lane.b32.xlu0 %v5908_v11, 352 }
  0xdb   : > { %459 = vbcast.lane.b32.xlu1 %v5908_v11, 376 }
  0xdc   : > { %455 = vbcast.lane.b32.xlu0 %v5908_v11, 368 }
  0xdf   : > { %470 = vbcast.lane.b32.xlu1 %v5910_v12, 264 }
  0xe0   : > { %466 = vbcast.lane.b32.xlu0 %v5910_v12, 256 }
  0xe3   : > { %478 = vbcast.lane.b32.xlu1 %v5910_v12, 280 }
  0xe4   : > { %474 = vbcast.lane.b32.xlu0 %v5910_v12, 272 }
  0xe7   : > { %486 = vbcast.lane.b32.xlu1 %v5910_v12, 296 }
  0xe8   : > { %482 = vbcast.lane.b32.xlu0 %v5910_v12, 288 }
  0xeb   : > { %494 = vbcast.lane.b32.xlu1 %v5910_v12, 312 }
  0xec   : > { %490 = vbcast.lane.b32.xlu0 %v5910_v12, 304 }
  0xef   : > { %502 = vbcast.lane.b32.xlu1 %v5910_v12, 328 }
  0xf0   : > { %498 = vbcast.lane.b32.xlu0 %v5910_v12, 320 }
  0xf1   : > { %v5991_v33 = vpop.permute.xlu1 %273 }
  0xf2   : > { %8939 = vst [vmem:[#allocation12_spill] sm:$0xff] %v5991_v33  ;;  %v5993_v34 = vpop.permute.xlu0 %265 }
  0xf3   : > { %510 = vbcast.lane.b32.xlu1 %v5910_v12, 344 }
  0xf4   : > { %506 = vbcast.lane.b32.xlu0 %v5910_v12, 336 }
  0xf5   : > { %v5997_v35 = vpop.permute.xlu1 %277 }
  0xf6   : > { %8940 = vst [vmem:[#allocation13_spill] sm:$0xff] %v5997_v35  ;;  %v5999_v36 = vpop.permute.xlu0 %269 }
  0xf7   : > { %8941 = vst [vmem:[#allocation14_spill] sm:$0xff] %v5999_v36  ;;  %518 = vbcast.lane.b32.xlu1 %v5910_v12, 360 }
  0xf8   : > { %514 = vbcast.lane.b32.xlu0 %v5910_v12, 352 }
  0xf9   : > { %v6003_v37 = vpop.permute.xlu1 %285 }
  0xfa   : > { %8942 = vst [vmem:[#allocation15_spill] sm:$0xff] %v6003_v37  ;;  %v6005_v38 = vpop.permute.xlu0 %281 }
  0xfb   : > { %8943 = vst [vmem:[#allocation16_spill] sm:$0xff] %v6005_v38  ;;  %526 = vbcast.lane.b32.xlu1 %v5910_v12, 376 }
  0xfc   : > { %522 = vbcast.lane.b32.xlu0 %v5910_v12, 368 }
  0xfd   : > { %v6009_v39 = vpop.permute.xlu1 %293 }
  0xfe   : > { %8944 = vst [vmem:[#allocation17_spill] sm:$0xff] %v6009_v39  ;;  %v6011_v40 = vpop.permute.xlu0 %289 }
  0xff   : > { %8945 = vst [vmem:[#allocation18_spill] sm:$0xff] %v6011_v40  ;;  %537 = vbcast.lane.b32.xlu1 %v5914_v14, 264 }
 0x100   : > { %533 = vbcast.lane.b32.xlu0 %v5914_v14, 256 }
 0x101   : > { %v6015_v41 = vpop.permute.xlu1 %301 }
 0x102   : > { %v6017_v42 = vpop.permute.xlu0 %297 }
 0x103   : > { %8946 = vst [vmem:[#allocation19_spill] sm:$0xff] %v6017_v42  ;;  %545 = vbcast.lane.b32.xlu1 %v5914_v14, 280 }
 0x104   : > { %541 = vbcast.lane.b32.xlu0 %v5914_v14, 272 }
 0x105   : > { %v6021_v43 = vpop.permute.xlu1 %309 }
 0x106   : > { %8947 = vst [vmem:[#allocation20_spill] sm:$0xff] %v6021_v43  ;;  %v6023_v44 = vpop.permute.xlu0 %305 }
 0x107   : > { %553 = vbcast.lane.b32.xlu1 %v5914_v14, 296 }
 0x108   : > { %549 = vbcast.lane.b32.xlu0 %v5914_v14, 288 }
 0x109   : > { %v6027_v45 = vpop.permute.xlu1 %317 }
 0x10a   : > { %8948 = vst [vmem:[#allocation21_spill] sm:$0xff] %v6027_v45  ;;  %v6029_v46 = vpop.permute.xlu0 %313 }
 0x10b   : > { %8949 = vst [vmem:[#allocation22_spill] sm:$0xff] %v6029_v46  ;;  %561 = vbcast.lane.b32.xlu1 %v5914_v14, 312 }
 0x10c   : > { %557 = vbcast.lane.b32.xlu0 %v5914_v14, 304 }
 0x10d   : > { %v6033_v47 = vpop.permute.xlu1 %325 }
 0x10e   : > { %8950 = vst [vmem:[#allocation23_spill] sm:$0xff] %v6033_v47  ;;  %v6035_v48 = vpop.permute.xlu0 %321 }
 0x10f   : > { %8951 = vst [vmem:[#allocation24_spill] sm:$0xff] %v6035_v48  ;;  %569 = vbcast.lane.b32.xlu1 %v5914_v14, 328 }
 0x110   : > { %565 = vbcast.lane.b32.xlu0 %v5914_v14, 320 }
 0x111   : > { %v6039_v49 = vpop.permute.xlu1 %336 }
 0x112   : > { %v6041_v50 = vpop.permute.xlu0 %332 }
 0x113   : > { %577 = vbcast.lane.b32.xlu1 %v5914_v14, 344 }
 0x114   : > { %573 = vbcast.lane.b32.xlu0 %v5914_v14, 336 }
 0x115   : > { %v6045_v51 = vpop.permute.xlu1 %344 }
 0x116   : > { %8952 = vst [vmem:[#allocation25_spill] sm:$0xff] %v6045_v51  ;;  %v6047_v52 = vpop.permute.xlu0 %340 }
 0x117   : > { %8953 = vst [vmem:[#allocation26_spill] sm:$0xff] %v6047_v52  ;;  %585 = vbcast.lane.b32.xlu1 %v5914_v14, 360 }
 0x118   : > { %581 = vbcast.lane.b32.xlu0 %v5914_v14, 352 }
 0x119   : > { %v6051_v53 = vpop.permute.xlu1 %352 }
 0x11a   : > { %8954 = vst [vmem:[#allocation27_spill] sm:$0xff] %v6051_v53  ;;  %v6053_v54 = vpop.permute.xlu0 %348 }
 0x11b   : > { %8955 = vst [vmem:[#allocation28_spill] sm:$0xff] %v6053_v54  ;;  %593 = vbcast.lane.b32.xlu1 %v5914_v14, 376 }
 0x11c   : > { %589 = vbcast.lane.b32.xlu0 %v5914_v14, 368 }
 0x11d   : > { %v6057_v55 = vpop.permute.xlu1 %360 }
 0x11e   : > { %8956 = vst [vmem:[#allocation29_spill] sm:$0xff] %v6057_v55  ;;  %v6059_v56 = vpop.permute.xlu0 %356 }
 0x11f   : > { %8957 = vst [vmem:[#allocation30_spill] sm:$0xff] %v6059_v56  ;;  %604 = vbcast.lane.b32.xlu1 %v5916_v15, 264 }
 0x120   : > { %600 = vbcast.lane.b32.xlu0 %v5916_v15, 256 }
 0x121   : > { %v6063_v57 = vpop.permute.xlu1 %368 }
 0x122   : > { %v6065_v58 = vpop.permute.xlu0 %364 }
 0x123   : > { %8958 = vst [vmem:[#allocation31_spill] sm:$0xff] %v6065_v58  ;;  %612 = vbcast.lane.b32.xlu1 %v5916_v15, 280 }
 0x124   : > { %608 = vbcast.lane.b32.xlu0 %v5916_v15, 272 }
 0x125   : > { %v6069_v59 = vpop.permute.xlu1 %376 }
 0x126   : > { %8959 = vst [vmem:[#allocation32_spill] sm:$0xff] %v6069_v59  ;;  %v6071_v60 = vpop.permute.xlu0 %372 }
 0x127   : > { %620 = vbcast.lane.b32.xlu1 %v5916_v15, 296 }
 0x128   : > { %616 = vbcast.lane.b32.xlu0 %v5916_v15, 288 }
 0x129   : > { %v6075_v61 = vpop.permute.xlu1 %384 }
 0x12a   : > { %8960 = vst [vmem:[#allocation33_spill] sm:$0xff] %v6075_v61  ;;  %v6077_v62 = vpop.permute.xlu0 %380 }
 0x12b   : > { %8961 = vst [vmem:[#allocation34_spill] sm:$0xff] %v6077_v62  ;;  %628 = vbcast.lane.b32.xlu1 %v5916_v15, 312 }
 0x12c   : > { %624 = vbcast.lane.b32.xlu0 %v5916_v15, 304 }
 0x12d   : > { %v6081_v63 = vpop.permute.xlu1 %392 }
 0x12e   : > { %8962 = vst [vmem:[#allocation35_spill] sm:$0xff] %v6081_v63  ;;  %v6083_v0 = vpop.permute.xlu0 %388 }
 0x12f   : > { %8963 = vst [vmem:[#allocation36_spill] sm:$0xff] %v6083_v0  ;;  %636 = vbcast.lane.b32.xlu1 %v5916_v15, 328 }
 0x130   : > { %632 = vbcast.lane.b32.xlu0 %v5916_v15, 320 }
 0x131   : > { %v6087_v3 = vpop.permute.xlu1 %403 }
 0x132   : > { %v6089_v4 = vpop.permute.xlu0 %399 }
 0x133   : > { %644 = vbcast.lane.b32.xlu1 %v5916_v15, 344 }
 0x134   : > { %640 = vbcast.lane.b32.xlu0 %v5916_v15, 336 }
 0x135   : > { %v6093_v5 = vpop.permute.xlu1 %411 }
 0x136   : > { %8964 = vst [vmem:[#allocation37_spill] sm:$0xff] %v6093_v5  ;;  %v6095_v6 = vpop.permute.xlu0 %407 }
 0x137   : > { %8965 = vst [vmem:[#allocation38_spill] sm:$0xff] %v6095_v6  ;;  %652 = vbcast.lane.b32.xlu1 %v5916_v15, 360 }
 0x138   : > { %648 = vbcast.lane.b32.xlu0 %v5916_v15, 352 }
 0x139   : > { %v6099_v7 = vpop.permute.xlu1 %419 }
 0x13a   : > { %8966 = vst [vmem:[#allocation39_spill] sm:$0xff] %v6099_v7  ;;  %v6101_v8 = vpop.permute.xlu0 %415 }
 0x13b   : > { %8967 = vst [vmem:[#allocation40_spill] sm:$0xff] %v6101_v8  ;;  %660 = vbcast.lane.b32.xlu1 %v5916_v15, 376 }
 0x13c   : > { %656 = vbcast.lane.b32.xlu0 %v5916_v15, 368 }
 0x13d   : > { %v6105_v9 = vpop.permute.xlu1 %427 }
 0x13e   : > { %8968 = vst [vmem:[#allocation41_spill] sm:$0xff] %v6105_v9  ;;  %v6107_v10 = vpop.permute.xlu0 %423 }
 0x13f   : > { %8969 = vst [vmem:[#allocation42_spill] sm:$0xff] %v6107_v10  ;;  %671 = vbcast.lane.b32.xlu1 %v5918_v16, 264 }
 0x140   : > { %667 = vbcast.lane.b32.xlu0 %v5918_v16, 256 }
 0x141   : > { %v6111_v11 = vpop.permute.xlu1 %435 }
 0x142   : > { %v6113_v12 = vpop.permute.xlu0 %431 }
 0x143   : > { %8970 = vst [vmem:[#allocation43_spill] sm:$0xff] %v6113_v12  ;;  %679 = vbcast.lane.b32.xlu1 %v5918_v16, 280 }
 0x144   : > { %675 = vbcast.lane.b32.xlu0 %v5918_v16, 272 }
 0x145   : > { %v6117_v14 = vpop.permute.xlu1 %443 }
 0x146   : > { %8971 = vst [vmem:[#allocation44_spill] sm:$0xff] %v6117_v14  ;;  %v6119_v32 = vpop.permute.xlu0 %439 }
 0x147   : > { %687 = vbcast.lane.b32.xlu1 %v5918_v16, 296 }
 0x148   : > { %683 = vbcast.lane.b32.xlu0 %v5918_v16, 288 }
 0x149   : > { %v6123_v15 = vpop.permute.xlu1 %451 }
 0x14a   : > { %8972 = vst [vmem:[#allocation45_spill] sm:$0xff] %v6123_v15  ;;  %v6125_v0 = vpop.permute.xlu0 %447 }
 0x14b   : > { %8973 = vst [vmem:[#allocation46_spill] sm:$0xff] %v6125_v0  ;;  %695 = vbcast.lane.b32.xlu1 %v5918_v16, 312 }
 0x14c   : > { %691 = vbcast.lane.b32.xlu0 %v5918_v16, 304 }
 0x14d   : > { %v6129_v63 = vpop.permute.xlu1 %459 }
 0x14e   : > { %8974 = vst [vmem:[#allocation47_spill] sm:$0xff] %v6129_v63  ;;  %v6131_v12 = vpop.permute.xlu0 %455 }
 0x14f   : > { %8975 = vst [vmem:[#allocation48_spill] sm:$0xff] %v6131_v12  ;;  %703 = vbcast.lane.b32.xlu1 %v5918_v16, 328 }
 0x150   : > { %699 = vbcast.lane.b32.xlu0 %v5918_v16, 320 }
 0x151   : > { %v6135_v14 = vpop.permute.xlu1 %470 }
 0x152   : > { %v6137_v62 = vpop.permute.xlu0 %466 }
 0x153   : > { %711 = vbcast.lane.b32.xlu1 %v5918_v16, 344 }
 0x154   : > { %707 = vbcast.lane.b32.xlu0 %v5918_v16, 336 }
 0x155   : > { %v6141_v0 = vpop.permute.xlu1 %478 }
 0x156   : > { %8976 = vst [vmem:[#allocation49_spill] sm:$0xff] %v6141_v0  ;;  %v6143_v15 = vpop.permute.xlu0 %474 }
 0x157   : > { %8977 = vst [vmem:[#allocation50_spill] sm:$0xff] %v6143_v15  ;;  %719 = vbcast.lane.b32.xlu1 %v5918_v16, 360 }
 0x158   : > { %715 = vbcast.lane.b32.xlu0 %v5918_v16, 352 }
 0x159   : > { %v6147_v12 = vpop.permute.xlu1 %486 }
 0x15a   : > { %8978 = vst [vmem:[#allocation51_spill] sm:$0xff] %v6147_v12  ;;  %v6149_v63 = vpop.permute.xlu0 %482 }
 0x15b   : > { %8979 = vst [vmem:[#allocation52_spill] sm:$0xff] %v6149_v63  ;;  %727 = vbcast.lane.b32.xlu1 %v5918_v16, 376 }
 0x15c   : > { %723 = vbcast.lane.b32.xlu0 %v5918_v16, 368 }
 0x15d   : > { %v6153_v61 = vpop.permute.xlu1 %494 }
 0x15e   : > { %8980 = vst [vmem:[#allocation53_spill] sm:$0xff] %v6153_v61  ;;  %v6155_v59 = vpop.permute.xlu0 %490  ;;  %v799_v61 = vrot.slane %v5912_v13, %v5899_v2 }
 0x15f   : > { %8981 = vst [vmem:[#allocation54_spill] sm:$0xff] %v6155_v59  ;;  %738 = vbcast.lane.b32.xlu1 %v5920_v17, 264 }
 0x160   : > { %734 = vbcast.lane.b32.xlu0 %v5920_v17, 256 }
 0x161   : > { %v6159_v58 = vpop.permute.xlu1 %502 }
 0x162   : > { %v6161_v48 = vpop.permute.xlu0 %498 }
 0x163   : > { %8982 = vst [vmem:[#allocation55_spill] sm:$0xff] %v6161_v48  ;;  %746 = vbcast.lane.b32.xlu1 %v5920_v17, 280 }
 0x164   : > { %742 = vbcast.lane.b32.xlu0 %v5920_v17, 272 }
 0x165   : > { %v6165_v47 = vpop.permute.xlu1 %510 }
 0x166   : > { %8983 = vst [vmem:[#allocation56_spill] sm:$0xff] %v6165_v47  ;;  %v6167_v46 = vpop.permute.xlu0 %506 }
 0x167   : > { %754 = vbcast.lane.b32.xlu1 %v5920_v17, 296 }
 0x168   : > { %750 = vbcast.lane.b32.xlu0 %v5920_v17, 288 }
 0x169   : > { %v6171_v16 = vpop.permute.xlu1 %518 }
 0x16a   : > { %8984 = vst [vmem:[#allocation57_spill] sm:$0xff] %v6171_v16  ;;  %v6173_v45 = vpop.permute.xlu0 %514 }
 0x16b   : > { %8985 = vst [vmem:[#allocation58_spill] sm:$0xff] %v6173_v45  ;;  %762 = vbcast.lane.b32.xlu1 %v5920_v17, 312 }
 0x16c   : > { %758 = vbcast.lane.b32.xlu0 %v5920_v17, 304 }
 0x16d   : > { %v6177_v48 = vpop.permute.xlu1 %526 }
 0x16e   : > { %8986 = vst [vmem:[#allocation59_spill] sm:$0xff] %v6177_v48  ;;  %v6179_v43 = vpop.permute.xlu0 %522 }
 0x16f   : > { %8987 = vst [vmem:[#allocation60_spill] sm:$0xff] %v6179_v43  ;;  %770 = vbcast.lane.b32.xlu1 %v5920_v17, 328 }
 0x170   : > { %766 = vbcast.lane.b32.xlu0 %v5920_v17, 320 }
 0x171   : > { %v6183_v47 = vpop.permute.xlu1 %537 }
 0x172   : > { %v6185_v42 = vpop.permute.xlu0 %533 }
 0x173   : > { %778 = vbcast.lane.b32.xlu1 %v5920_v17, 344 }
 0x174   : > { %774 = vbcast.lane.b32.xlu0 %v5920_v17, 336 }
 0x175   : > { %v6189_v45 = vpop.permute.xlu1 %545 }
 0x176   : > { %8988 = vst [vmem:[#allocation61_spill] sm:$0xff] %v6189_v45  ;;  %v6191_v16 = vpop.permute.xlu0 %541 }
 0x177   : > { %8989 = vst [vmem:[#allocation62_spill] sm:$0xff] %v6191_v16  ;;  %786 = vbcast.lane.b32.xlu1 %v5920_v17, 360 }
 0x178   : > { %782 = vbcast.lane.b32.xlu0 %v5920_v17, 352 }
 0x179   : > { %v6195_v43 = vpop.permute.xlu1 %553 }
 0x17a   : > { %8990 = vst [vmem:[#allocation63_spill] sm:$0xff] %v6195_v43  ;;  %v6197_v48 = vpop.permute.xlu0 %549 }
 0x17b   : > { %8991 = vst [vmem:[#allocation64_spill] sm:$0xff] %v6197_v48  ;;  %794 = vbcast.lane.b32.xlu1 %v5920_v17, 376 }
 0x17c   : > { %790 = vbcast.lane.b32.xlu0 %v5920_v17, 368 }
 0x17d   : > { %v6203_v9 = vpop.permute.xlu1 %561 }
 0x17e   : > { %8992 = vst [vmem:[#allocation65_spill] sm:$0xff] %v6203_v9  ;;  %v6205_v55 = vpop.permute.xlu0 %557 }
 0x17f   : > { %8993 = vst [vmem:[#allocation66_spill] sm:$0xff] %v6205_v55  ;;  %805 = vbcast.lane.b32.xlu1 %v799_v61, 264 }
 0x180   : > { %801 = vbcast.lane.b32.xlu0 %v799_v61, 256 }
 0x181   : > { %v6207_v39 = vpop.permute.xlu1 %569 }
 0x182   : > { %v6209_v59 = vpop.permute.xlu0 %565 }
 0x183   : > { %8994 = vst [vmem:[#allocation67_spill] sm:$0xff] %v6209_v59  ;;  %813 = vbcast.lane.b32.xlu1 %v799_v61, 280 }
 0x184   : > { %809 = vbcast.lane.b32.xlu0 %v799_v61, 272 }
 0x185   : > { %v6211_v10 = vpop.permute.xlu1 %577 }
 0x186   : > { %8995 = vst [vmem:[#allocation68_spill] sm:$0xff] %v6211_v10  ;;  %v6213_v56 = vpop.permute.xlu0 %573 }
 0x187   : > { %821 = vbcast.lane.b32.xlu1 %v799_v61, 296 }
 0x188   : > { %817 = vbcast.lane.b32.xlu0 %v799_v61, 288 }
 0x189   : > { %v6215_v40 = vpop.permute.xlu1 %585 }
 0x18a   : > { %8996 = vst [vmem:[#allocation69_spill] sm:$0xff] %v6215_v40  ;;  %v6217_v17 = vpop.permute.xlu0 %581 }
 0x18b   : > { %8997 = vst [vmem:[#allocation70_spill] sm:$0xff] %v6217_v17  ;;  %829 = vbcast.lane.b32.xlu1 %v799_v61, 312 }
 0x18c   : > { %825 = vbcast.lane.b32.xlu0 %v799_v61, 304 }
 0x18d   : > { %v6219_v9 = vpop.permute.xlu1 %593 }
 0x18e   : > { %8998 = vst [vmem:[#allocation71_spill] sm:$0xff] %v6219_v9  ;;  %v6221_v55 = vpop.permute.xlu0 %589 }
 0x18f   : > { %8999 = vst [vmem:[#allocation72_spill] sm:$0xff] %v6221_v55  ;;  %837 = vbcast.lane.b32.xlu1 %v799_v61, 328  ;;  %v866_v55 = vrot.slane %v5912_v13, %v5962_v31 }
 0x190   : > { %833 = vbcast.lane.b32.xlu0 %v799_v61, 320 }
 0x191   : > { %v6223_v59 = vpop.permute.xlu1 %604 }
 0x192   : > { %9000 = vst [vmem:[#allocation73_spill] sm:$0xff] %v6223_v59  ;;  %v6225_v48 = vpop.permute.xlu0 %600 }
 0x193   : > { %845 = vbcast.lane.b32.xlu1 %v799_v61, 344 }
 0x194   : > { %841 = vbcast.lane.b32.xlu0 %v799_v61, 336 }
 0x195   : > { %v6227_v10 = vpop.permute.xlu1 %612 }
 0x196   : > { %9001 = vst [vmem:[#allocation74_spill] sm:$0xff] %v6227_v10  ;;  %v6229_v43 = vpop.permute.xlu0 %608 }
 0x197   : > { %9002 = vst [vmem:[#allocation75_spill] sm:$0xff] %v6229_v43  ;;  %853 = vbcast.lane.b32.xlu1 %v799_v61, 360 }
 0x198   : > { %849 = vbcast.lane.b32.xlu0 %v799_v61, 352 }
 0x199   : > { %v6231_v17 = vpop.permute.xlu1 %620 }
 0x19a   : > { %9003 = vst [vmem:[#allocation76_spill] sm:$0xff] %v6231_v17  ;;  %v6233_v40 = vpop.permute.xlu0 %616 }
 0x19b   : > { %9004 = vst [vmem:[#allocation77_spill] sm:$0xff] %v6233_v40  ;;  %861 = vbcast.lane.b32.xlu1 %v799_v61, 376 }
 0x19c   : > { %857 = vbcast.lane.b32.xlu0 %v799_v61, 368 }
 0x19d   : > { %v6237_v9 = vpop.permute.xlu1 %628 }
 0x19e   : > { %9005 = vst [vmem:[#allocation78_spill] sm:$0xff] %v6237_v9  ;;  %v6239_v45 = vpop.permute.xlu0 %624 }
 0x19f   : > { %9006 = vst [vmem:[#allocation79_spill] sm:$0xff] %v6239_v45  ;;  %872 = vbcast.lane.b32.xlu1 %v866_v55, 264 }
 0x1a0   : > { %868 = vbcast.lane.b32.xlu0 %v866_v55, 256 }
 0x1a1   : > { %v6241_v10 = vpop.permute.xlu1 %636 }
 0x1a2   : > { %9007 = vst [vmem:[#allocation80_spill] sm:$0xff] %v6241_v10  ;;  %v6243_v63 = vpop.permute.xlu0 %632 }
 0x1a3   : > { %9008 = vst [vmem:[#allocation81_spill] sm:$0xff] %v6243_v63  ;;  %880 = vbcast.lane.b32.xlu1 %v866_v55, 280 }
 0x1a4   : > { %876 = vbcast.lane.b32.xlu0 %v866_v55, 272 }
 0x1a5   : > { %v6245_v17 = vpop.permute.xlu1 %644 }
 0x1a6   : > { %9009 = vst [vmem:[#allocation82_spill] sm:$0xff] %v6245_v17  ;;  %v6247_v40 = vpop.permute.xlu0 %640 }
 0x1a7   : > { %9010 = vst [vmem:[#allocation83_spill] sm:$0xff] %v6247_v40  ;;  %888 = vbcast.lane.b32.xlu1 %v866_v55, 296 }
 0x1a8   : > { %884 = vbcast.lane.b32.xlu0 %v866_v55, 288 }
 0x1a9   : > { %v6249_v13 = vpop.permute.xlu1 %652 }
 0x1aa   : > { %9011 = vst [vmem:[#allocation84_spill] sm:$0xff] %v6249_v13  ;;  %v6251_v61 = vpop.permute.xlu0 %648 }
 0x1ab   : > { %9012 = vst [vmem:[#allocation85_spill] sm:$0xff] %v6251_v61  ;;  %896 = vbcast.lane.b32.xlu1 %v866_v55, 312 }
 0x1ac   : > { %892 = vbcast.lane.b32.xlu0 %v866_v55, 304 }
 0x1ad   : > { %v6253_v9 = vpop.permute.xlu1 %660 }
 0x1ae   : > { %9013 = vst [vmem:[#allocation86_spill] sm:$0xff] %v6253_v9  ;;  %v6255_v45 = vpop.permute.xlu0 %656 }
 0x1af   : > { %9014 = vst [vmem:[#allocation87_spill] sm:$0xff] %v6255_v45  ;;  %904 = vbcast.lane.b32.xlu1 %v866_v55, 328 }
 0x1b0   : > { %900 = vbcast.lane.b32.xlu0 %v866_v55, 320 }
 0x1b1   : > { %v6257_v63 = vpop.permute.xlu1 %671 }
 0x1b2   : > { %9015 = vst [vmem:[#allocation88_spill] sm:$0xff] %v6257_v63  ;;  %v6259_v12 = vpop.permute.xlu0 %667 }
 0x1b3   : > { %912 = vbcast.lane.b32.xlu1 %v866_v55, 344 }
 0x1b4   : > { %908 = vbcast.lane.b32.xlu0 %v866_v55, 336 }
 0x1b5   : > { %v6261_v17 = vpop.permute.xlu1 %679 }
 0x1b6   : > { %9016 = vst [vmem:[#allocation89_spill] sm:$0xff] %v6261_v17  ;;  %v6263_v0 = vpop.permute.xlu0 %675 }
 0x1b7   : > { %9017 = vst [vmem:[#allocation90_spill] sm:$0xff] %v6263_v0  ;;  %920 = vbcast.lane.b32.xlu1 %v866_v55, 360 }
 0x1b8   : > { %916 = vbcast.lane.b32.xlu0 %v866_v55, 352 }
 0x1b9   : > { %v6265_v61 = vpop.permute.xlu1 %687 }
 0x1ba   : > { %9018 = vst [vmem:[#allocation91_spill] sm:$0xff] %v6265_v61  ;;  %v6267_v13 = vpop.permute.xlu0 %683 }
 0x1bb   : > { %9019 = vst [vmem:[#allocation92_spill] sm:$0xff] %v6267_v13  ;;  %928 = vbcast.lane.b32.xlu1 %v866_v55, 376 }
 0x1bc   : > { %924 = vbcast.lane.b32.xlu0 %v866_v55, 368 }
 0x1bd   : > { %v6269_v45 = vpop.permute.xlu1 %695 }
 0x1be   : > { %9020 = vst [vmem:[#allocation93_spill] sm:$0xff] %v6269_v45  ;;  %v6271_v9 = vpop.permute.xlu0 %691 }
 0x1bf   : > { %9021 = vst [vmem:[#allocation94_spill] sm:$0xff] %v6271_v9  ;;  %939 = vbcast.lane.b32.xlu1 %v5923_v18, 264 }
 0x1c0   : > { %935 = vbcast.lane.b32.xlu0 %v5923_v18, 256 }
 0x1c1   : > { %v6275_v8 = vpop.permute.xlu1 %703 }
 0x1c2   : > { %9022 = vst [vmem:[#allocation95_spill] sm:$0xff] %v6275_v8  ;;  %v6277_v17 = vpop.permute.xlu0 %699 }
 0x1c3   : > { %9023 = vst [vmem:[#allocation96_spill] sm:$0xff] %v6277_v17  ;;  %947 = vbcast.lane.b32.xlu1 %v5923_v18, 280 }
 0x1c4   : > { %943 = vbcast.lane.b32.xlu0 %v5923_v18, 272 }
 0x1c5   : > { %v6281_v61 = vpop.permute.xlu1 %711 }
 0x1c6   : > { %9024 = vst [vmem:[#allocation97_spill] sm:$0xff] %v6281_v61  ;;  %v6283_v13 = vpop.permute.xlu0 %707 }
 0x1c7   : > { %955 = vbcast.lane.b32.xlu1 %v5923_v18, 296 }
 0x1c8   : > { %951 = vbcast.lane.b32.xlu0 %v5923_v18, 288 }
 0x1c9   : > { %v6287_v55 = vpop.permute.xlu1 %719 }
 0x1ca   : > { %9025 = vst [vmem:[#allocation98_spill] sm:$0xff] %v6287_v55  ;;  %v6289_v45 = vpop.permute.xlu0 %715 }
 0x1cb   : > { %9026 = vst [vmem:[#allocation99_spill] sm:$0xff] %v6289_v45  ;;  %963 = vbcast.lane.b32.xlu1 %v5923_v18, 312 }
 0x1cc   : > { %959 = vbcast.lane.b32.xlu0 %v5923_v18, 304 }
 0x1cd   : > { %v6293_v17 = vpop.permute.xlu1 %727 }
 0x1ce   : > { %9027 = vst [vmem:[#allocation100_spill] sm:$0xff] %v6293_v17  ;;  %v6295_v9 = vpop.permute.xlu0 %723 }
 0x1cf   : > { %9028 = vst [vmem:[#allocation101_spill] sm:$0xff] %v6295_v9  ;;  %971 = vbcast.lane.b32.xlu1 %v5923_v18, 328 }
 0x1d0   : > { %967 = vbcast.lane.b32.xlu0 %v5923_v18, 320 }
 0x1d1   : > { %v6299_v61 = vpop.permute.xlu1 %738 }
 0x1d2   : > { %9029 = vst [vmem:[#allocation102_spill] sm:$0xff] %v6299_v61  ;;  %v6301_v7 = vpop.permute.xlu0 %734 }
 0x1d3   : > { %979 = vbcast.lane.b32.xlu1 %v5923_v18, 344 }
 0x1d4   : > { %975 = vbcast.lane.b32.xlu0 %v5923_v18, 336 }
 0x1d5   : > { %v6305_v45 = vpop.permute.xlu1 %746 }
 0x1d6   : > { %9030 = vst [vmem:[#allocation103_spill] sm:$0xff] %v6305_v45  ;;  %v6307_v55 = vpop.permute.xlu0 %742 }
 0x1d7   : > { %9031 = vst [vmem:[#allocation104_spill] sm:$0xff] %v6307_v55  ;;  %987 = vbcast.lane.b32.xlu1 %v5923_v18, 360 }
 0x1d8   : > { %983 = vbcast.lane.b32.xlu0 %v5923_v18, 352 }
 0x1d9   : > { %v6311_v9 = vpop.permute.xlu1 %754 }
 0x1da   : > { %9032 = vst [vmem:[#allocation105_spill] sm:$0xff] %v6311_v9  ;;  %v6313_v17 = vpop.permute.xlu0 %750 }
 0x1db   : > { %9033 = vst [vmem:[#allocation106_spill] sm:$0xff] %v6313_v17  ;;  %995 = vbcast.lane.b32.xlu1 %v5923_v18, 376 }
 0x1dc   : > { %991 = vbcast.lane.b32.xlu0 %v5923_v18, 368 }
 0x1dd   : > { %v6317_v5 = vpop.permute.xlu1 %762 }
 0x1de   : > { %9034 = vst [vmem:[#allocation107_spill] sm:$0xff] %v6317_v5  ;;  %v6319_v54 = vpop.permute.xlu0 %758 }
 0x1df   : > { %9035 = vst [vmem:[#allocation108_spill] sm:$0xff] %v6319_v54  ;;  %1006 = vbcast.lane.b32.xlu1 %v5926_v19, 264 }
 0x1e0   : > { %1002 = vbcast.lane.b32.xlu0 %v5926_v19, 256 }
 0x1e1   : > { %v6323_v45 = vpop.permute.xlu1 %770 }
 0x1e2   : > { %9036 = vst [vmem:[#allocation109_spill] sm:$0xff] %v6323_v45  ;;  %v6325_v53 = vpop.permute.xlu0 %766 }
 0x1e3   : > { %9037 = vst [vmem:[#allocation110_spill] sm:$0xff] %v6325_v53  ;;  %1014 = vbcast.lane.b32.xlu1 %v5926_v19, 280 }
 0x1e4   : > { %1010 = vbcast.lane.b32.xlu0 %v5926_v19, 272 }
 0x1e5   : > { %v6329_v17 = vpop.permute.xlu1 %778 }
 0x1e6   : > { %9038 = vst [vmem:[#allocation111_spill] sm:$0xff] %v6329_v17  ;;  %v6331_v9 = vpop.permute.xlu0 %774 }
 0x1e7   : > { %9039 = vst [vmem:[#allocation112_spill] sm:$0xff] %v6331_v9  ;;  %1022 = vbcast.lane.b32.xlu1 %v5926_v19, 296 }
 0x1e8   : > { %1018 = vbcast.lane.b32.xlu0 %v5926_v19, 288 }
 0x1e9   : > { %v6335_v18 = vpop.permute.xlu1 %786 }
 0x1ea   : > { %9040 = vst [vmem:[#allocation113_spill] sm:$0xff] %v6335_v18  ;;  %v6337_v5 = vpop.permute.xlu0 %782 }
 0x1eb   : > { %9041 = vst [vmem:[#allocation114_spill] sm:$0xff] %v6337_v5  ;;  %1030 = vbcast.lane.b32.xlu1 %v5926_v19, 312 }
 0x1ec   : > { %1026 = vbcast.lane.b32.xlu0 %v5926_v19, 304 }
 0x1ed   : > { %v6341_v53 = vpop.permute.xlu1 %794 }
 0x1ee   : > { %9042 = vst [vmem:[#allocation115_spill] sm:$0xff] %v6341_v53  ;;  %v6343_v54 = vpop.permute.xlu0 %790 }
 0x1ef   : > { %9043 = vst [vmem:[#allocation116_spill] sm:$0xff] %v6343_v54  ;;  %1038 = vbcast.lane.b32.xlu1 %v5926_v19, 328 }
 0x1f0   : > { %1034 = vbcast.lane.b32.xlu0 %v5926_v19, 320 }
 0x1f1   : > { %v6347_v17 = vpop.permute.xlu1 %805 }
 0x1f2   : > { %9044 = vst [vmem:[#allocation117_spill] sm:$0xff] %v6347_v17  ;;  %v6349_v51 = vpop.permute.xlu0 %801 }
 0x1f3   : > { %1046 = vbcast.lane.b32.xlu1 %v5926_v19, 344 }
 0x1f4   : > { %1042 = vbcast.lane.b32.xlu0 %v5926_v19, 336 }
 0x1f5   : > { %v6353_v5 = vpop.permute.xlu1 %813 }
 0x1f6   : > { %9045 = vst [vmem:[#allocation118_spill] sm:$0xff] %v6353_v5  ;;  %v6355_v18 = vpop.permute.xlu0 %809  ;;  %v1335_v5 = vrot.slane %v5929_v20, %v5899_v2 }
 0x1f7   : > { %9046 = vst [vmem:[#allocation119_spill] sm:$0xff] %v6355_v18  ;;  %1054 = vbcast.lane.b32.xlu1 %v5926_v19, 360 }
 0x1f8   : > { %1050 = vbcast.lane.b32.xlu0 %v5926_v19, 352 }
 0x1f9   : > { %v6359_v53 = vpop.permute.xlu1 %821 }
 0x1fa   : > { %9047 = vst [vmem:[#allocation120_spill] sm:$0xff] %v6359_v53  ;;  %v6361_v54 = vpop.permute.xlu0 %817 }
 0x1fb   : > { %9048 = vst [vmem:[#allocation121_spill] sm:$0xff] %v6361_v54  ;;  %1062 = vbcast.lane.b32.xlu1 %v5926_v19, 376 }
 0x1fc   : > { %1058 = vbcast.lane.b32.xlu0 %v5926_v19, 368 }
 0x1fd   : > { %v6365_v38 = vpop.permute.xlu1 %829 }
 0x1fe   : > { %9049 = vst [vmem:[#allocation122_spill] sm:$0xff] %v6365_v38  ;;  %v6367_v55 = vpop.permute.xlu0 %825 }
 0x1ff   : > { %9050 = vst [vmem:[#allocation123_spill] sm:$0xff] %v6367_v55  ;;  %1073 = vbcast.lane.b32.xlu1 %v5932_v21, 264 }
 0x200   : > { %1069 = vbcast.lane.b32.xlu0 %v5932_v21, 256 }
 0x201   : > { %v6371_v0 = vpop.permute.xlu1 %837 }
 0x202   : > { %v6373_v43 = vpop.permute.xlu0 %833 }
 0x203   : > { %9051 = vst [vmem:[#allocation124_spill] sm:$0xff] %v6373_v43  ;;  %1081 = vbcast.lane.b32.xlu1 %v5932_v21, 280 }
 0x204   : > { %1077 = vbcast.lane.b32.xlu0 %v5932_v21, 272 }
 0x205   : > { %v6377_v54 = vpop.permute.xlu1 %845 }
 0x206   : > { %9052 = vst [vmem:[#allocation125_spill] sm:$0xff] %v6377_v54  ;;  %v6379_v40 = vpop.permute.xlu0 %841 }
 0x207   : > { %1089 = vbcast.lane.b32.xlu1 %v5932_v21, 296 }
 0x208   : > { %1085 = vbcast.lane.b32.xlu0 %v5932_v21, 288 }
 0x209   : > { %v6383_v19 = vpop.permute.xlu1 %853 }
 0x20a   : > { %9053 = vst [vmem:[#allocation126_spill] sm:$0xff] %v6383_v19  ;;  %v6385_v38 = vpop.permute.xlu0 %849 }
 0x20b   : > { %9054 = vst [vmem:[#allocation127_spill] sm:$0xff] %v6385_v38  ;;  %1097 = vbcast.lane.b32.xlu1 %v5932_v21, 312 }
 0x20c   : > { %1093 = vbcast.lane.b32.xlu0 %v5932_v21, 304 }
 0x20d   : > { %v6389_v43 = vpop.permute.xlu1 %861 }
 0x20e   : > { %9055 = vst [vmem:[#allocation128_spill] sm:$0xff] %v6389_v43  ;;  %v6391_v55 = vpop.permute.xlu0 %857 }
 0x20f   : > { %9056 = vst [vmem:[#allocation129_spill] sm:$0xff] %v6391_v55  ;;  %1105 = vbcast.lane.b32.xlu1 %v5932_v21, 328 }
 0x210   : > { %1101 = vbcast.lane.b32.xlu0 %v5932_v21, 320 }
 0x211   : > { %v6395_v54 = vpop.permute.xlu1 %872 }
 0x212   : > { %v6397_v16 = vpop.permute.xlu0 %868 }
 0x213   : > { %1113 = vbcast.lane.b32.xlu1 %v5932_v21, 344 }
 0x214   : > { %1109 = vbcast.lane.b32.xlu0 %v5932_v21, 336 }
 0x215   : > { %v6401_v38 = vpop.permute.xlu1 %880 }
 0x216   : > { %9057 = vst [vmem:[#allocation130_spill] sm:$0xff] %v6401_v38  ;;  %v6403_v19 = vpop.permute.xlu0 %876 }
 0x217   : > { %9058 = vst [vmem:[#allocation131_spill] sm:$0xff] %v6403_v19  ;;  %1121 = vbcast.lane.b32.xlu1 %v5932_v21, 360 }
 0x218   : > { %1117 = vbcast.lane.b32.xlu0 %v5932_v21, 352 }
 0x219   : > { %v6407_v55 = vpop.permute.xlu1 %888 }
 0x21a   : > { %9059 = vst [vmem:[#allocation132_spill] sm:$0xff] %v6407_v55  ;;  %v6409_v43 = vpop.permute.xlu0 %884 }
 0x21b   : > { %9060 = vst [vmem:[#allocation133_spill] sm:$0xff] %v6409_v43  ;;  %1129 = vbcast.lane.b32.xlu1 %v5932_v21, 376 }
 0x21c   : > { %1125 = vbcast.lane.b32.xlu0 %v5932_v21, 368 }
 0x21d   : > { %v6413_v15 = vpop.permute.xlu1 %896 }
 0x21e   : > { %9061 = vst [vmem:[#allocation134_spill] sm:$0xff] %v6413_v15  ;;  %v6415_v6 = vpop.permute.xlu0 %892 }
 0x21f   : > { %9062 = vst [vmem:[#allocation135_spill] sm:$0xff] %v6415_v6  ;;  %1140 = vbcast.lane.b32.xlu1 %v5935_v22, 264 }
 0x220   : > { %1136 = vbcast.lane.b32.xlu0 %v5935_v22, 256 }
 0x221   : > { %v6419_v38 = vpop.permute.xlu1 %904 }
 0x222   : > { %v6421_v9 = vpop.permute.xlu0 %900 }
 0x223   : > { %9063 = vst [vmem:[#allocation136_spill] sm:$0xff] %v6421_v9  ;;  %1148 = vbcast.lane.b32.xlu1 %v5935_v22, 280 }
 0x224   : > { %1144 = vbcast.lane.b32.xlu0 %v5935_v22, 272 }
 0x225   : > { %v6425_v43 = vpop.permute.xlu1 %912 }
 0x226   : > { %9064 = vst [vmem:[#allocation137_spill] sm:$0xff] %v6425_v43  ;;  %v6427_v55 = vpop.permute.xlu0 %908 }
 0x227   : > { %1156 = vbcast.lane.b32.xlu1 %v5935_v22, 296 }
 0x228   : > { %1152 = vbcast.lane.b32.xlu0 %v5935_v22, 288 }
 0x229   : > { %v6431_v21 = vpop.permute.xlu1 %920 }
 0x22a   : > { %9065 = vst [vmem:[#allocation138_spill] sm:$0xff] %v6431_v21  ;;  %v6433_v15 = vpop.permute.xlu0 %916 }
 0x22b   : > { %9066 = vst [vmem:[#allocation139_spill] sm:$0xff] %v6433_v15  ;;  %1164 = vbcast.lane.b32.xlu1 %v5935_v22, 312 }
 0x22c   : > { %1160 = vbcast.lane.b32.xlu0 %v5935_v22, 304 }
 0x22d   : > { %v6437_v9 = vpop.permute.xlu1 %928 }
 0x22e   : > { %9067 = vst [vmem:[#allocation140_spill] sm:$0xff] %v6437_v9  ;;  %v6439_v6 = vpop.permute.xlu0 %924 }
 0x22f   : > { %9068 = vst [vmem:[#allocation141_spill] sm:$0xff] %v6439_v6  ;;  %1172 = vbcast.lane.b32.xlu1 %v5935_v22, 328 }
 0x230   : > { %1168 = vbcast.lane.b32.xlu0 %v5935_v22, 320 }
 0x231   : > { %v6443_v43 = vpop.permute.xlu1 %939 }
 0x232   : > { %v6445_v52 = vpop.permute.xlu0 %935 }
 0x233   : > { %1180 = vbcast.lane.b32.xlu1 %v5935_v22, 344 }
 0x234   : > { %1176 = vbcast.lane.b32.xlu0 %v5935_v22, 336 }
 0x235   : > { %v6449_v15 = vpop.permute.xlu1 %947 }
 0x236   : > { %9069 = vst [vmem:[#allocation142_spill] sm:$0xff] %v6449_v15  ;;  %v6451_v21 = vpop.permute.xlu0 %943 }
 0x237   : > { %9070 = vst [vmem:[#allocation143_spill] sm:$0xff] %v6451_v21  ;;  %1188 = vbcast.lane.b32.xlu1 %v5935_v22, 360 }
 0x238   : > { %1184 = vbcast.lane.b32.xlu0 %v5935_v22, 352 }
 0x239   : > { %v6455_v6 = vpop.permute.xlu1 %955 }
 0x23a   : > { %9071 = vst [vmem:[#allocation144_spill] sm:$0xff] %v6455_v6  ;;  %v6457_v9 = vpop.permute.xlu0 %951 }
 0x23b   : > { %9072 = vst [vmem:[#allocation145_spill] sm:$0xff] %v6457_v9  ;;  %1196 = vbcast.lane.b32.xlu1 %v5935_v22, 376 }
 0x23c   : > { %1192 = vbcast.lane.b32.xlu0 %v5935_v22, 368 }
 0x23d   : > { %v6461_v19 = vpop.permute.xlu1 %963 }
 0x23e   : > { %9073 = vst [vmem:[#allocation146_spill] sm:$0xff] %v6461_v19  ;;  %v6463_v37 = vpop.permute.xlu0 %959 }
 0x23f   : > { %9074 = vst [vmem:[#allocation147_spill] sm:$0xff] %v6463_v37  ;;  %1207 = vbcast.lane.b32.xlu1 %v5938_v23, 264 }
 0x240   : > { %1203 = vbcast.lane.b32.xlu0 %v5938_v23, 256 }
 0x241   : > { %v6467_v15 = vpop.permute.xlu1 %971 }
 0x242   : > { %v6469_v21 = vpop.permute.xlu0 %967 }
 0x243   : > { %9075 = vst [vmem:[#allocation148_spill] sm:$0xff] %v6469_v21  ;;  %1215 = vbcast.lane.b32.xlu1 %v5938_v23, 280 }
 0x244   : > { %1211 = vbcast.lane.b32.xlu0 %v5938_v23, 272 }
 0x245   : > { %v6473_v9 = vpop.permute.xlu1 %979 }
 0x246   : > { %9076 = vst [vmem:[#allocation149_spill] sm:$0xff] %v6473_v9  ;;  %v6475_v6 = vpop.permute.xlu0 %975 }
 0x247   : > { %1223 = vbcast.lane.b32.xlu1 %v5938_v23, 296 }
 0x248   : > { %1219 = vbcast.lane.b32.xlu0 %v5938_v23, 288 }
 0x249   : > { %v6479_v22 = vpop.permute.xlu1 %987 }
 0x24a   : > { %9077 = vst [vmem:[#allocation150_spill] sm:$0xff] %v6479_v22  ;;  %v6481_v19 = vpop.permute.xlu0 %983 }
 0x24b   : > { %9078 = vst [vmem:[#allocation151_spill] sm:$0xff] %v6481_v19  ;;  %1231 = vbcast.lane.b32.xlu1 %v5938_v23, 312 }
 0x24c   : > { %1227 = vbcast.lane.b32.xlu0 %v5938_v23, 304 }
 0x24d   : > { %v6485_v21 = vpop.permute.xlu1 %995 }
 0x24e   : > { %9079 = vst [vmem:[#allocation152_spill] sm:$0xff] %v6485_v21  ;;  %v6487_v37 = vpop.permute.xlu0 %991 }
 0x24f   : > { %9080 = vst [vmem:[#allocation153_spill] sm:$0xff] %v6487_v37  ;;  %1239 = vbcast.lane.b32.xlu1 %v5938_v23, 328 }
 0x250   : > { %1235 = vbcast.lane.b32.xlu0 %v5938_v23, 320 }
 0x251   : > { %v6491_v9 = vpop.permute.xlu1 %1006 }
 0x252   : > { %v6493_v53 = vpop.permute.xlu0 %1002 }
 0x253   : > { %1247 = vbcast.lane.b32.xlu1 %v5938_v23, 344 }
 0x254   : > { %1243 = vbcast.lane.b32.xlu0 %v5938_v23, 336 }
 0x255   : > { %v6497_v19 = vpop.permute.xlu1 %1014 }
 0x256   : > { %9081 = vst [vmem:[#allocation154_spill] sm:$0xff] %v6497_v19  ;;  %v6499_v22 = vpop.permute.xlu0 %1010 }
 0x257   : > { %9082 = vst [vmem:[#allocation155_spill] sm:$0xff] %v6499_v22  ;;  %1255 = vbcast.lane.b32.xlu1 %v5938_v23, 360 }
 0x258   : > { %1251 = vbcast.lane.b32.xlu0 %v5938_v23, 352 }
 0x259   : > { %v6503_v37 = vpop.permute.xlu1 %1022 }
 0x25a   : > { %9083 = vst [vmem:[#allocation156_spill] sm:$0xff] %v6503_v37  ;;  %v6505_v21 = vpop.permute.xlu0 %1018 }
 0x25b   : > { %9084 = vst [vmem:[#allocation157_spill] sm:$0xff] %v6505_v21  ;;  %1263 = vbcast.lane.b32.xlu1 %v5938_v23, 376 }
 0x25c   : > { %1259 = vbcast.lane.b32.xlu0 %v5938_v23, 368 }
 0x25d   : > { %v6509_v33 = vpop.permute.xlu1 %1030 }
 0x25e   : > { %9085 = vst [vmem:[#allocation158_spill] sm:$0xff] %v6509_v33  ;;  %v6511_v18 = vpop.permute.xlu0 %1026 }
 0x25f   : > { %9086 = vst [vmem:[#allocation159_spill] sm:$0xff] %v6511_v18  ;;  %1274 = vbcast.lane.b32.xlu1 %v5941_v24, 264 }
 0x260   : > { %1270 = vbcast.lane.b32.xlu0 %v5941_v24, 256 }
 0x261   : > { %v6515_v19 = vpop.permute.xlu1 %1038 }
 0x262   : > { %v6517_v22 = vpop.permute.xlu0 %1034 }
 0x263   : > { %9087 = vst [vmem:[#allocation160_spill] sm:$0xff] %v6517_v22  ;;  %1282 = vbcast.lane.b32.xlu1 %v5941_v24, 280 }
 0x264   : > { %1278 = vbcast.lane.b32.xlu0 %v5941_v24, 272 }
 0x265   : > { %v6521_v21 = vpop.permute.xlu1 %1046 }
 0x266   : > { %9088 = vst [vmem:[#allocation161_spill] sm:$0xff] %v6521_v21  ;;  %v6523_v37 = vpop.permute.xlu0 %1042 }
 0x267   : > { %1290 = vbcast.lane.b32.xlu1 %v5941_v24, 296 }
 0x268   : > { %1286 = vbcast.lane.b32.xlu0 %v5941_v24, 288 }
 0x269   : > { %v6527_v23 = vpop.permute.xlu1 %1054 }
 0x26a   : > { %9089 = vst [vmem:[#allocation162_spill] sm:$0xff] %v6527_v23  ;;  %v6529_v33 = vpop.permute.xlu0 %1050 }
 0x26b   : > { %9090 = vst [vmem:[#allocation163_spill] sm:$0xff] %v6529_v33  ;;  %1298 = vbcast.lane.b32.xlu1 %v5941_v24, 312 }
 0x26c   : > { %1294 = vbcast.lane.b32.xlu0 %v5941_v24, 304 }
 0x26d   : > { %v6533_v22 = vpop.permute.xlu1 %1062 }
 0x26e   : > { %9091 = vst [vmem:[#allocation164_spill] sm:$0xff] %v6533_v22  ;;  %v6535_v18 = vpop.permute.xlu0 %1058 }
 0x26f   : > { %9092 = vst [vmem:[#allocation165_spill] sm:$0xff] %v6535_v18  ;;  %1306 = vbcast.lane.b32.xlu1 %v5941_v24, 328 }
 0x270   : > { %1302 = vbcast.lane.b32.xlu0 %v5941_v24, 320 }
 0x271   : > { %v6539_v21 = vpop.permute.xlu1 %1073 }
 0x272   : > { %v6541_v35 = vpop.permute.xlu0 %1069 }
 0x273   : > { %1314 = vbcast.lane.b32.xlu1 %v5941_v24, 344 }
 0x274   : > { %1310 = vbcast.lane.b32.xlu0 %v5941_v24, 336 }
 0x275   : > { %v6545_v33 = vpop.permute.xlu1 %1081 }
 0x276   : > { %9093 = vst [vmem:[#allocation166_spill] sm:$0xff] %v6545_v33  ;;  %v6547_v23 = vpop.permute.xlu0 %1077 }
 0x277   : > { %9094 = vst [vmem:[#allocation167_spill] sm:$0xff] %v6547_v23  ;;  %1322 = vbcast.lane.b32.xlu1 %v5941_v24, 360 }
 0x278   : > { %1318 = vbcast.lane.b32.xlu0 %v5941_v24, 352 }
 0x279   : > { %v6551_v18 = vpop.permute.xlu1 %1089 }
 0x27a   : > { %9095 = vst [vmem:[#allocation168_spill] sm:$0xff] %v6551_v18  ;;  %v6553_v22 = vpop.permute.xlu0 %1085 }
 0x27b   : > { %9096 = vst [vmem:[#allocation169_spill] sm:$0xff] %v6553_v22  ;;  %1330 = vbcast.lane.b32.xlu1 %v5941_v24, 376 }
 0x27c   : > { %1326 = vbcast.lane.b32.xlu0 %v5941_v24, 368 }
 0x27d   : > { %v6559_v36 = vpop.permute.xlu1 %1097 }
 0x27e   : > { %9097 = vst [vmem:[#allocation170_spill] sm:$0xff] %v6559_v36  ;;  %v6561_v33 = vpop.permute.xlu0 %1093 }
 0x27f   : > { %9098 = vst [vmem:[#allocation171_spill] sm:$0xff] %v6561_v33  ;;  %1341 = vbcast.lane.b32.xlu1 %v1335_v5, 264 }
 0x280   : > { %1337 = vbcast.lane.b32.xlu0 %v1335_v5, 256 }
 0x281   : > { %v6563_v23 = vpop.permute.xlu1 %1105 }
 0x282   : > { %v6565_v17 = vpop.permute.xlu0 %1101 }
 0x283   : > { %9099 = vst [vmem:[#allocation172_spill] sm:$0xff] %v6565_v17  ;;  %1349 = vbcast.lane.b32.xlu1 %v1335_v5, 280 }
 0x284   : > { %1345 = vbcast.lane.b32.xlu0 %v1335_v5, 272 }
 0x285   : > { %v6567_v22 = vpop.permute.xlu1 %1113 }
 0x286   : > { %9100 = vst [vmem:[#allocation173_spill] sm:$0xff] %v6567_v22  ;;  %v6569_v18 = vpop.permute.xlu0 %1109 }
 0x287   : > { %1357 = vbcast.lane.b32.xlu1 %v1335_v5, 296 }
 0x288   : > { %1353 = vbcast.lane.b32.xlu0 %v1335_v5, 288 }
 0x289   : > { %v6571_v2 = vpop.permute.xlu1 %1121 }
 0x28a   : > { %9101 = vst [vmem:[#allocation174_spill] sm:$0xff] %v6571_v2  ;;  %v6573_v24 = vpop.permute.xlu0 %1117 }
 0x28b   : > { %9102 = vst [vmem:[#allocation175_spill] sm:$0xff] %v6573_v24  ;;  %1365 = vbcast.lane.b32.xlu1 %v1335_v5, 312 }
 0x28c   : > { %1361 = vbcast.lane.b32.xlu0 %v1335_v5, 304 }
 0x28d   : > { %v6575_v36 = vpop.permute.xlu1 %1129 }
 0x28e   : > { %9103 = vst [vmem:[#allocation176_spill] sm:$0xff] %v6575_v36  ;;  %v6577_v33 = vpop.permute.xlu0 %1125 }
 0x28f   : > { %9104 = vst [vmem:[#allocation177_spill] sm:$0xff] %v6577_v33  ;;  %1373 = vbcast.lane.b32.xlu1 %v1335_v5, 328  ;;  %v1402_v33 = vrot.slane %v5929_v20, %v5962_v31 }
 0x290   : > { %1369 = vbcast.lane.b32.xlu0 %v1335_v5, 320 }
 0x291   : > { %v6579_v17 = vpop.permute.xlu1 %1140 }
 0x292   : > { %9105 = vst [vmem:[#allocation178_spill] sm:$0xff] %v6579_v17  ;;  %v6581_v63 = vpop.permute.xlu0 %1136 }
 0x293   : > { %1381 = vbcast.lane.b32.xlu1 %v1335_v5, 344 }
 0x294   : > { %1377 = vbcast.lane.b32.xlu0 %v1335_v5, 336 }
 0x295   : > { %v6583_v22 = vpop.permute.xlu1 %1148 }
 0x296   : > { %9106 = vst [vmem:[#allocation179_spill] sm:$0xff] %v6583_v22  ;;  %v6585_v10 = vpop.permute.xlu0 %1144 }
 0x297   : > { %9107 = vst [vmem:[#allocation180_spill] sm:$0xff] %v6585_v10  ;;  %1389 = vbcast.lane.b32.xlu1 %v1335_v5, 360 }
 0x298   : > { %1385 = vbcast.lane.b32.xlu0 %v1335_v5, 352 }
 0x299   : > { %v6587_v24 = vpop.permute.xlu1 %1156 }
 0x29a   : > { %9108 = vst [vmem:[#allocation181_spill] sm:$0xff] %v6587_v24  ;;  %v6589_v2 = vpop.permute.xlu0 %1152 }
 0x29b   : > { %9109 = vst [vmem:[#allocation182_spill] sm:$0xff] %v6589_v2  ;;  %1397 = vbcast.lane.b32.xlu1 %v1335_v5, 376 }
 0x29c   : > { %1393 = vbcast.lane.b32.xlu0 %v1335_v5, 368 }
 0x29d   : > { %v6593_v36 = vpop.permute.xlu1 %1164 }
 0x29e   : > { %9110 = vst [vmem:[#allocation183_spill] sm:$0xff] %v6593_v36  ;;  %v6595_v59 = vpop.permute.xlu0 %1160 }
 0x29f   : > { %9111 = vst [vmem:[#allocation184_spill] sm:$0xff] %v6595_v59  ;;  %1408 = vbcast.lane.b32.xlu1 %v1402_v33, 264 }
 0x2a0   : > { %1404 = vbcast.lane.b32.xlu0 %v1402_v33, 256 }
 0x2a1   : > { %v6597_v22 = vpop.permute.xlu1 %1172 }
 0x2a2   : > { %9112 = vst [vmem:[#allocation185_spill] sm:$0xff] %v6597_v22  ;;  %v6599_v10 = vpop.permute.xlu0 %1168 }
 0x2a3   : > { %9113 = vst [vmem:[#allocation186_spill] sm:$0xff] %v6599_v10  ;;  %1416 = vbcast.lane.b32.xlu1 %v1402_v33, 280 }
 0x2a4   : > { %1412 = vbcast.lane.b32.xlu0 %v1402_v33, 272 }
 0x2a5   : > { %v6601_v24 = vpop.permute.xlu1 %1180 }
 0x2a6   : > { %9114 = vst [vmem:[#allocation187_spill] sm:$0xff] %v6601_v24  ;;  %v6603_v2 = vpop.permute.xlu0 %1176 }
 0x2a7   : > { %9115 = vst [vmem:[#allocation188_spill] sm:$0xff] %v6603_v2  ;;  %1424 = vbcast.lane.b32.xlu1 %v1402_v33, 296 }
 0x2a8   : > { %1420 = vbcast.lane.b32.xlu0 %v1402_v33, 288 }
 0x2a9   : > { %v6605_v20 = vpop.permute.xlu1 %1188 }
 0x2aa   : > { %9116 = vst [vmem:[#allocation189_spill] sm:$0xff] %v6605_v20  ;;  %v6607_v31 = vpop.permute.xlu0 %1184 }
 0x2ab   : > { %9117 = vst [vmem:[#allocation190_spill] sm:$0xff] %v6607_v31  ;;  %1432 = vbcast.lane.b32.xlu1 %v1402_v33, 312 }
 0x2ac   : > { %1428 = vbcast.lane.b32.xlu0 %v1402_v33, 304 }
 0x2ad   : > { %v6609_v5 = vpop.permute.xlu1 %1196 }
 0x2ae   : > { %9118 = vst [vmem:[#allocation191_spill] sm:$0xff] %v6609_v5  ;;  %v6611_v36 = vpop.permute.xlu0 %1192 }
 0x2af   : > { %9119 = vst [vmem:[#allocation192_spill] sm:$0xff] %v6611_v36  ;;  %1440 = vbcast.lane.b32.xlu1 %v1402_v33, 328 }
 0x2b0   : > { %1436 = vbcast.lane.b32.xlu0 %v1402_v33, 320 }
 0x2b1   : > { %v6613_v10 = vpop.permute.xlu1 %1207 }
 0x2b2   : > { %9120 = vst [vmem:[#allocation193_spill] sm:$0xff] %v6613_v10  ;;  %v6615_v59 = vpop.permute.xlu0 %1203 }
 0x2b3   : > { %1448 = vbcast.lane.b32.xlu1 %v1402_v33, 344 }
 0x2b4   : > { %1444 = vbcast.lane.b32.xlu0 %v1402_v33, 336 }
 0x2b5   : > { %v6617_v24 = vpop.permute.xlu1 %1215 }
 0x2b6   : > { %9121 = vst [vmem:[#allocation194_spill] sm:$0xff] %v6617_v24  ;;  %v6619_v2 = vpop.permute.xlu0 %1211 }
 0x2b7   : > { %9122 = vst [vmem:[#allocation195_spill] sm:$0xff] %v6619_v2  ;;  %1456 = vbcast.lane.b32.xlu1 %v1402_v33, 360 }
 0x2b8   : > { %1452 = vbcast.lane.b32.xlu0 %v1402_v33, 352 }
 0x2b9   : > { %v6621_v31 = vpop.permute.xlu1 %1223 }
 0x2ba   : > { %9123 = vst [vmem:[#allocation196_spill] sm:$0xff] %v6621_v31  ;;  %v6623_v20 = vpop.permute.xlu0 %1219 }
 0x2bb   : > { %9124 = vst [vmem:[#allocation197_spill] sm:$0xff] %v6623_v20  ;;  %1464 = vbcast.lane.b32.xlu1 %v1402_v33, 376 }
 0x2bc   : > { %1460 = vbcast.lane.b32.xlu0 %v1402_v33, 368 }
 0x2bd   : > { %v6625_v36 = vpop.permute.xlu1 %1231 }
 0x2be   : > { %9125 = vst [vmem:[#allocation198_spill] sm:$0xff] %v6625_v36  ;;  %v6627_v5 = vpop.permute.xlu0 %1227 }
 0x2bf   : > { %9126 = vst [vmem:[#allocation199_spill] sm:$0xff] %v6627_v5  ;;  %1475 = vbcast.lane.b32.xlu1 %v5944_v25, 264 }
 0x2c0   : > { %1471 = vbcast.lane.b32.xlu0 %v5944_v25, 256 }
 0x2c1   : > { %v6631_v10 = vpop.permute.xlu1 %1239 }
 0x2c2   : > { %9127 = vst [vmem:[#allocation200_spill] sm:$0xff] %v6631_v10  ;;  %v6633_v24 = vpop.permute.xlu0 %1235 }
 0x2c3   : > { %9128 = vst [vmem:[#allocation201_spill] sm:$0xff] %v6633_v24  ;;  %1483 = vbcast.lane.b32.xlu1 %v5944_v25, 280 }
 0x2c4   : > { %1479 = vbcast.lane.b32.xlu0 %v5944_v25, 272 }
 0x2c5   : > { %v6637_v31 = vpop.permute.xlu1 %1247 }
 0x2c6   : > { %9129 = vst [vmem:[#allocation202_spill] sm:$0xff] %v6637_v31  ;;  %v6639_v20 = vpop.permute.xlu0 %1243 }
 0x2c7   : > { %1491 = vbcast.lane.b32.xlu1 %v5944_v25, 296 }
 0x2c8   : > { %1487 = vbcast.lane.b32.xlu0 %v5944_v25, 288 }
 0x2c9   : > { %v6643_v33 = vpop.permute.xlu1 %1255 }
 0x2ca   : > { %9130 = vst [vmem:[#allocation203_spill] sm:$0xff] %v6643_v33  ;;  %v6645_v36 = vpop.permute.xlu0 %1251 }
 0x2cb   : > { %9131 = vst [vmem:[#allocation204_spill] sm:$0xff] %v6645_v36  ;;  %1499 = vbcast.lane.b32.xlu1 %v5944_v25, 312 }
 0x2cc   : > { %1495 = vbcast.lane.b32.xlu0 %v5944_v25, 304 }
 0x2cd   : > { %v6649_v24 = vpop.permute.xlu1 %1263 }
 0x2ce   : > { %9132 = vst [vmem:[#allocation205_spill] sm:$0xff] %v6649_v24  ;;  %v6651_v5 = vpop.permute.xlu0 %1259 }
 0x2cf   : > { %9133 = vst [vmem:[#allocation206_spill] sm:$0xff] %v6651_v5  ;;  %1507 = vbcast.lane.b32.xlu1 %v5944_v25, 328 }
 0x2d0   : > { %1503 = vbcast.lane.b32.xlu0 %v5944_v25, 320 }
 0x2d1   : > { %v6655_v31 = vpop.permute.xlu1 %1274 }
 0x2d2   : > { %9134 = vst [vmem:[#allocation207_spill] sm:$0xff] %v6655_v31  ;;  %v6657_v2 = vpop.permute.xlu0 %1270 }
 0x2d3   : > { %1515 = vbcast.lane.b32.xlu1 %v5944_v25, 344 }
 0x2d4   : > { %1511 = vbcast.lane.b32.xlu0 %v5944_v25, 336 }
 0x2d5   : > { %v6661_v36 = vpop.permute.xlu1 %1282 }
 0x2d6   : > { %9135 = vst [vmem:[#allocation208_spill] sm:$0xff] %v6661_v36  ;;  %v6663_v33 = vpop.permute.xlu0 %1278 }
 0x2d7   : > { %9136 = vst [vmem:[#allocation209_spill] sm:$0xff] %v6663_v33  ;;  %1523 = vbcast.lane.b32.xlu1 %v5944_v25, 360 }
 0x2d8   : > { %1519 = vbcast.lane.b32.xlu0 %v5944_v25, 352 }
 0x2d9   : > { %v6667_v5 = vpop.permute.xlu1 %1290 }
 0x2da   : > { %9137 = vst [vmem:[#allocation210_spill] sm:$0xff] %v6667_v5  ;;  %v6669_v24 = vpop.permute.xlu0 %1286 }
 0x2db   : > { %9138 = vst [vmem:[#allocation211_spill] sm:$0xff] %v6669_v24  ;;  %1531 = vbcast.lane.b32.xlu1 %v5944_v25, 376 }
 0x2dc   : > { %1527 = vbcast.lane.b32.xlu0 %v5944_v25, 368 }
 0x2dd   : > { %v6673_v22 = vpop.permute.xlu1 %1298 }
 0x2de   : > { %9139 = vst [vmem:[#allocation212_spill] sm:$0xff] %v6673_v22  ;;  %v6675_v17 = vpop.permute.xlu0 %1294 }
 0x2df   : > { %9140 = vst [vmem:[#allocation213_spill] sm:$0xff] %v6675_v17  ;;  %1542 = vbcast.lane.b32.xlu1 %v5947_v26, 264 }
 0x2e0   : > { %1538 = vbcast.lane.b32.xlu0 %v5947_v26, 256 }
 0x2e1   : > { %v6679_v36 = vpop.permute.xlu1 %1306 }
 0x2e2   : > { %9141 = vst [vmem:[#allocation214_spill] sm:$0xff] %v6679_v36  ;;  %v6681_v33 = vpop.permute.xlu0 %1302 }
 0x2e3   : > { %9142 = vst [vmem:[#allocation215_spill] sm:$0xff] %v6681_v33  ;;  %1550 = vbcast.lane.b32.xlu1 %v5947_v26, 280 }
 0x2e4   : > { %1546 = vbcast.lane.b32.xlu0 %v5947_v26, 272 }
 0x2e5   : > { %v6685_v24 = vpop.permute.xlu1 %1314 }
 0x2e6   : > { %9143 = vst [vmem:[#allocation216_spill] sm:$0xff] %v6685_v24  ;;  %v6687_v5 = vpop.permute.xlu0 %1310 }
 0x2e7   : > { %9144 = vst [vmem:[#allocation217_spill] sm:$0xff] %v6687_v5  ;;  %1558 = vbcast.lane.b32.xlu1 %v5947_v26, 296 }
 0x2e8   : > { %1554 = vbcast.lane.b32.xlu0 %v5947_v26, 288 }
 0x2e9   : > { %v6691_v25 = vpop.permute.xlu1 %1322 }
 0x2ea   : > { %9145 = vst [vmem:[#allocation218_spill] sm:$0xff] %v6691_v25  ;;  %v6693_v22 = vpop.permute.xlu0 %1318 }
 0x2eb   : > { %9146 = vst [vmem:[#allocation219_spill] sm:$0xff] %v6693_v22  ;;  %1566 = vbcast.lane.b32.xlu1 %v5947_v26, 312 }
 0x2ec   : > { %1562 = vbcast.lane.b32.xlu0 %v5947_v26, 304 }
 0x2ed   : > { %v6697_v33 = vpop.permute.xlu1 %1330 }
 0x2ee   : > { %9147 = vst [vmem:[#allocation220_spill] sm:$0xff] %v6697_v33  ;;  %v6699_v17 = vpop.permute.xlu0 %1326 }
 0x2ef   : > { %9148 = vst [vmem:[#allocation221_spill] sm:$0xff] %v6699_v17  ;;  %1574 = vbcast.lane.b32.xlu1 %v5947_v26, 328 }
 0x2f0   : > { %1570 = vbcast.lane.b32.xlu0 %v5947_v26, 320 }
 0x2f1   : > { %v6703_v24 = vpop.permute.xlu1 %1341 }
 0x2f2   : > { %9149 = vst [vmem:[#allocation222_spill] sm:$0xff] %v6703_v24  ;;  %v6705_v5 = vpop.permute.xlu0 %1337 }
 0x2f3   : > { %1582 = vbcast.lane.b32.xlu1 %v5947_v26, 344 }
 0x2f4   : > { %1578 = vbcast.lane.b32.xlu0 %v5947_v26, 336 }
 0x2f5   : > { %v6709_v22 = vpop.permute.xlu1 %1349 }
 0x2f6   : > { %9150 = vst [vmem:[#allocation223_spill] sm:$0xff] %v6709_v22  ;;  %v6711_v25 = vpop.permute.xlu0 %1345 }
 0x2f7   : > { %9151 = vst [vmem:[#allocation224_spill] sm:$0xff] %v6711_v25  ;;  %1590 = vbcast.lane.b32.xlu1 %v5947_v26, 360 }
 0x2f8   : > { %1586 = vbcast.lane.b32.xlu0 %v5947_v26, 352 }
 0x2f9   : > { %v6715_v33 = vpop.permute.xlu1 %1357 }
 0x2fa   : > { %9152 = vst [vmem:[#allocation225_spill] sm:$0xff] %v6715_v33  ;;  %v6717_v17 = vpop.permute.xlu0 %1353 }
 0x2fb   : > { %9153 = vst [vmem:[#allocation226_spill] sm:$0xff] %v6717_v17  ;;  %1598 = vbcast.lane.b32.xlu1 %v5947_v26, 376 }
 0x2fc   : > { %1594 = vbcast.lane.b32.xlu0 %v5947_v26, 368 }
 0x2fd   : > { %v6721_v24 = vpop.permute.xlu1 %1365 }
 0x2fe   : > { %9154 = vst [vmem:[#allocation227_spill] sm:$0xff] %v6721_v24  ;;  %v6723_v45 = vpop.permute.xlu0 %1361 }
 0x2ff   : > { %9155 = vst [vmem:[#allocation228_spill] sm:$0xff] %v6723_v45  ;;  %1609 = vbcast.lane.b32.xlu1 %v5950_v27, 264 }
 0x300   : > { %1605 = vbcast.lane.b32.xlu0 %v5950_v27, 256 }
 0x301   : > { %v6727_v22 = vpop.permute.xlu1 %1373 }
 0x302   : > { %v6729_v25 = vpop.permute.xlu0 %1369 }
 0x303   : > { %9156 = vst [vmem:[#allocation229_spill] sm:$0xff] %v6729_v25  ;;  %1617 = vbcast.lane.b32.xlu1 %v5950_v27, 280 }
 0x304   : > { %1613 = vbcast.lane.b32.xlu0 %v5950_v27, 272 }
 0x305   : > { %v6733_v17 = vpop.permute.xlu1 %1381 }
 0x306   : > { %9157 = vst [vmem:[#allocation230_spill] sm:$0xff] %v6733_v17  ;;  %v6735_v33 = vpop.permute.xlu0 %1377 }
 0x307   : > { %1625 = vbcast.lane.b32.xlu1 %v5950_v27, 296 }
 0x308   : > { %1621 = vbcast.lane.b32.xlu0 %v5950_v27, 288 }
 0x309   : > { %v6739_v26 = vpop.permute.xlu1 %1389 }
 0x30a   : > { %9158 = vst [vmem:[#allocation231_spill] sm:$0xff] %v6739_v26  ;;  %v6741_v24 = vpop.permute.xlu0 %1385 }
 0x30b   : > { %9159 = vst [vmem:[#allocation232_spill] sm:$0xff] %v6741_v24  ;;  %1633 = vbcast.lane.b32.xlu1 %v5950_v27, 312 }
 0x30c   : > { %1629 = vbcast.lane.b32.xlu0 %v5950_v27, 304 }
 0x30d   : > { %v6745_v25 = vpop.permute.xlu1 %1397 }
 0x30e   : > { %9160 = vst [vmem:[#allocation233_spill] sm:$0xff] %v6745_v25  ;;  %v6747_v45 = vpop.permute.xlu0 %1393 }
 0x30f   : > { %9161 = vst [vmem:[#allocation234_spill] sm:$0xff] %v6747_v45  ;;  %1641 = vbcast.lane.b32.xlu1 %v5950_v27, 328 }
 0x310   : > { %1637 = vbcast.lane.b32.xlu0 %v5950_v27, 320 }
 0x311   : > { %v6751_v17 = vpop.permute.xlu1 %1408 }
 0x312   : > { %9162 = vst [vmem:[#allocation235_spill] sm:$0xff] %v6751_v17  ;;  %v6753_v36 = vpop.permute.xlu0 %1404 }
 0x313   : > { %1649 = vbcast.lane.b32.xlu1 %v5950_v27, 344 }
 0x314   : > { %1645 = vbcast.lane.b32.xlu0 %v5950_v27, 336 }
 0x315   : > { %v6757_v26 = vpop.permute.xlu1 %1416 }
 0x316   : > { %9163 = vst [vmem:[#allocation236_spill] sm:$0xff] %v6757_v26  ;;  %v6759_v24 = vpop.permute.xlu0 %1412 }
 0x317   : > { %9164 = vst [vmem:[#allocation237_spill] sm:$0xff] %v6759_v24  ;;  %1657 = vbcast.lane.b32.xlu1 %v5950_v27, 360 }
 0x318   : > { %1653 = vbcast.lane.b32.xlu0 %v5950_v27, 352 }
 0x319   : > { %v6763_v25 = vpop.permute.xlu1 %1424 }
 0x31a   : > { %9165 = vst [vmem:[#allocation238_spill] sm:$0xff] %v6763_v25  ;;  %v6765_v45 = vpop.permute.xlu0 %1420 }
 0x31b   : > { %9166 = vst [vmem:[#allocation239_spill] sm:$0xff] %v6765_v45  ;;  %1665 = vbcast.lane.b32.xlu1 %v5950_v27, 376 }
 0x31c   : > { %1661 = vbcast.lane.b32.xlu0 %v5950_v27, 368 }
 0x31d   : > { %v6769_v17 = vpop.permute.xlu1 %1432 }
 0x31e   : > { %9167 = vst [vmem:[#allocation240_spill] sm:$0xff] %v6769_v17  ;;  %v6771_v61 = vpop.permute.xlu0 %1428 }
 0x31f   : > { %9168 = vst [vmem:[#allocation241_spill] sm:$0xff] %v6771_v61  ;;  %1676 = vbcast.lane.b32.xlu1 %v5953_v28, 264 }
 0x320   : > { %1672 = vbcast.lane.b32.xlu0 %v5953_v28, 256 }
 0x321   : > { %v6775_v26 = vpop.permute.xlu1 %1440 }
 0x322   : > { %v6777_v24 = vpop.permute.xlu0 %1436 }
 0x323   : > { %9169 = vst [vmem:[#allocation242_spill] sm:$0xff] %v6777_v24  ;;  %1684 = vbcast.lane.b32.xlu1 %v5953_v28, 280 }
 0x324   : > { %1680 = vbcast.lane.b32.xlu0 %v5953_v28, 272 }
 0x325   : > { %v6781_v45 = vpop.permute.xlu1 %1448 }
 0x326   : > { %9170 = vst [vmem:[#allocation243_spill] sm:$0xff] %v6781_v45  ;;  %v6783_v25 = vpop.permute.xlu0 %1444 }
 0x327   : > { %1692 = vbcast.lane.b32.xlu1 %v5953_v28, 296 }
 0x328   : > { %1688 = vbcast.lane.b32.xlu0 %v5953_v28, 288 }
 0x329   : > { %v6787_v27 = vpop.permute.xlu1 %1456 }
 0x32a   : > { %9171 = vst [vmem:[#allocation244_spill] sm:$0xff] %v6787_v27  ;;  %v6789_v17 = vpop.permute.xlu0 %1452 }
 0x32b   : > { %9172 = vst [vmem:[#allocation245_spill] sm:$0xff] %v6789_v17  ;;  %1700 = vbcast.lane.b32.xlu1 %v5953_v28, 312 }
 0x32c   : > { %1696 = vbcast.lane.b32.xlu0 %v5953_v28, 304 }
 0x32d   : > { %v6793_v24 = vpop.permute.xlu1 %1464 }
 0x32e   : > { %9173 = vst [vmem:[#allocation246_spill] sm:$0xff] %v6793_v24  ;;  %v6795_v61 = vpop.permute.xlu0 %1460 }
 0x32f   : > { %9174 = vst [vmem:[#allocation247_spill] sm:$0xff] %v6795_v61  ;;  %1708 = vbcast.lane.b32.xlu1 %v5953_v28, 328 }
 0x330   : > { %1704 = vbcast.lane.b32.xlu0 %v5953_v28, 320 }
 0x331   : > { %v6799_v45 = vpop.permute.xlu1 %1475 }
 0x332   : > { %9175 = vst [vmem:[#allocation248_spill] sm:$0xff] %v6799_v45  ;;  %v6801_v31 = vpop.permute.xlu0 %1471 }
 0x333   : > { %1716 = vbcast.lane.b32.xlu1 %v5953_v28, 344 }
 0x334   : > { %1712 = vbcast.lane.b32.xlu0 %v5953_v28, 336 }
 0x335   : > { %v6805_v27 = vpop.permute.xlu1 %1483 }
 0x336   : > { %9176 = vst [vmem:[#allocation249_spill] sm:$0xff] %v6805_v27  ;;  %v6807_v17 = vpop.permute.xlu0 %1479 }
 0x337   : > { %9177 = vst [vmem:[#allocation250_spill] sm:$0xff] %v6807_v17  ;;  %1724 = vbcast.lane.b32.xlu1 %v5953_v28, 360 }
 0x338   : > { %1720 = vbcast.lane.b32.xlu0 %v5953_v28, 352 }
 0x339   : > { %v6811_v24 = vpop.permute.xlu1 %1491 }
 0x33a   : > { %9178 = vst [vmem:[#allocation251_spill] sm:$0xff] %v6811_v24  ;;  %v6813_v61 = vpop.permute.xlu0 %1487 }
 0x33b   : > { %9179 = vst [vmem:[#allocation252_spill] sm:$0xff] %v6813_v61  ;;  %1732 = vbcast.lane.b32.xlu1 %v5953_v28, 376 }
 0x33c   : > { %1728 = vbcast.lane.b32.xlu0 %v5953_v28, 368  ;;  %v1879_v28 = vsel %vm1868_vm0, %v6023_v44, %v6379_v40 }
 0x33d   : > { %v6817_v45 = vpop.permute.xlu1 %1499 }
 0x33e   : > { %9180 = vst [vmem:[#allocation253_spill] sm:$0xff] %v6817_v45  ;;  %v6819_v8 = vpop.permute.xlu0 %1495  ;;  %v1911_v45 = vsel %vm1868_vm0, %v6119_v32, %v6475_v6 }
 0x33f   : > { %9181 = vst [vmem:[#allocation254_spill] sm:$0xff] %v6819_v8  ;;  %1743 = vbcast.lane.b32.xlu1 %v5956_v29, 264 }
 0x340   : > { %1739 = vbcast.lane.b32.xlu0 %v5956_v29, 256 }
 0x341   : > { %v1508_v27 = vpop.permute.xlu1 %1507 }
 0x342   : > { %v6823_v17 = vpop.permute.xlu0 %1503 }
 0x343   : > { %9182 = vst [vmem:[#allocation255_spill] sm:$0xff] %v6823_v17  ;;  %1751 = vbcast.lane.b32.xlu1 %v5956_v29, 280  ;;  %v6837_v17 = vsel %vm1997_vm1, %v1879_v28, %v6735_v33 }
 0x344   : > { %1747 = vbcast.lane.b32.xlu0 %v5956_v29, 272  ;;  %9184 = vst [vmem:[#allocation257_spill] sm:$0xff] %v6837_v17 }
 0x345   : > { %v6827_v24 = vpop.permute.xlu1 %1515 }
 0x346   : > { %9183 = vst [vmem:[#allocation256_spill] sm:$0xff] %v6827_v24  ;;  %v1512_v8 = vpop.permute.xlu0 %1511 }
 0x347   : > { %v6840_v61 = vsel %vm1997_vm1, %v1911_v45, %v1512_v8  ;;  %1759 = vbcast.lane.b32.xlu1 %v5956_v29, 296 }
 0x348   : > { %9185 = vst [vmem:[#allocation258_spill] sm:$0xff] %v6840_v61  ;;  %1755 = vbcast.lane.b32.xlu0 %v5956_v29, 288 }
 0x349   : > { %v6846_v40 = vpop.permute.xlu1 %1523 }
 0x34a   : > { %9186 = vst [vmem:[#allocation259_spill] sm:$0xff] %v6846_v40  ;;  %v6848_v44 = vpop.permute.xlu0 %1519 }
 0x34b   : > { %9187 = vst [vmem:[#allocation260_spill] sm:$0xff] %v6848_v44  ;;  %1767 = vbcast.lane.b32.xlu1 %v5956_v29, 312 }
 0x34c   : > { %1763 = vbcast.lane.b32.xlu0 %v5956_v29, 304 }
 0x34d   : > { %v6852_v6 = vpop.permute.xlu1 %1531 }
 0x34e   : > { %9188 = vst [vmem:[#allocation261_spill] sm:$0xff] %v6852_v6  ;;  %v6854_v32 = vpop.permute.xlu0 %1527 }
 0x34f   : > { %9189 = vst [vmem:[#allocation262_spill] sm:$0xff] %v6854_v32  ;;  %1775 = vbcast.lane.b32.xlu1 %v5956_v29, 328 }
 0x350   : > { %1771 = vbcast.lane.b32.xlu0 %v5956_v29, 320 }
 0x351   : > { %v6858_v45 = vpop.permute.xlu1 %1542 }
 0x352   : > { %9190 = vst [vmem:[#allocation263_spill] sm:$0xff] %v6858_v45  ;;  %v6860_v8 = vpop.permute.xlu0 %1538 }
 0x353   : > { %1783 = vbcast.lane.b32.xlu1 %v5956_v29, 344 }
 0x354   : > { %1779 = vbcast.lane.b32.xlu0 %v5956_v29, 336 }
 0x355   : > { %v6864_v33 = vpop.permute.xlu1 %1550 }
 0x356   : > { %9191 = vst [vmem:[#allocation264_spill] sm:$0xff] %v6864_v33  ;;  %v6866_v28 = vpop.permute.xlu0 %1546 }
 0x357   : > { %9192 = vst [vmem:[#allocation265_spill] sm:$0xff] %v6866_v28  ;;  %1791 = vbcast.lane.b32.xlu1 %v5956_v29, 360  ;;  %v5561_v28 = vmov 1983009808  }
 0x358   : > { %1787 = vbcast.lane.b32.xlu0 %v5956_v29, 352 }
 0x359   : > { %v6870_v24 = vpop.permute.xlu1 %1558 }
 0x35a   : > { %9193 = vst [vmem:[#allocation266_spill] sm:$0xff] %v6870_v24  ;;  %v6872_v6 = vpop.permute.xlu0 %1554 }
 0x35b   : > { %9194 = vst [vmem:[#allocation267_spill] sm:$0xff] %v6872_v6  ;;  %1799 = vbcast.lane.b32.xlu1 %v5956_v29, 376 }
 0x35c   : > { %1795 = vbcast.lane.b32.xlu0 %v5956_v29, 368  ;;  %v2129_v29 = vunpack.c.l.s4 %v5561_v28  ;;  %v1878_v28 = vsel %vm1868_vm0, %v6015_v41, %v6371_v0 }
 0x35d   : > { %v6876_v32 = vpop.permute.xlu1 %1566 }
 0x35e   : > { %9195 = vst [vmem:[#allocation268_spill] sm:$0xff] %v6876_v32  ;;  %v6878_v40 = vpop.permute.xlu0 %1562  ;;  %v1910_v32 = vsel %vm1868_vm0, %v6111_v11, %v6467_v15  ;;  %v2130_v10 = vunpack.c.0.s8 %v2129_v29  ;;  %v6909_v11 = vsel %vm1997_vm1, %v1878_v28, %v6727_v22  ;;  %v9211_v28 = vcombine.low %v6837_v17, %v6840_v61 }
 0x35f   : > { %9196 = vst [vmem:[#allocation269_spill] sm:$0xff] %v6878_v40  ;;  %1810 = vbcast.lane.b32.xlu1 %v5959_v30, 264  ;;  %9202 = vst [vmem:[#allocation275_spill] sm:$0xff] %v6909_v11  ;;  %v1943_v61 = vsel %vm1868_vm0, %v6213_v56, %v6569_v18  ;;  %v1917_v56 = vsel %vm1868_vm0, %v6137_v62, %v6493_v53  ;;  %v1901_v18 = vsel %vm1868_vm0, %v6089_v4, %v6445_v52 }
 0x360   : > { %1806 = vbcast.lane.b32.xlu0 %v5959_v30, 256  ;;  %v6929_v22 = vsub.s32 %v2130_v10, %v5896_v1  ;;  %v2030_v62 = vsel %vm1997_vm1, %v1901_v18, %v6801_v31  ;;  %v1869_v52 = vsel %vm1868_vm0, %v5993_v34, %v6349_v51  ;;  %v1981_v34 = vsel %vm1868_vm0, %v6301_v7, %v6657_v2 }
 0x361   : > { %v1575_v44 = vpop.permute.xlu1 %1574 }
 0x362   : > { %v6882_v33 = vpop.permute.xlu0 %1570 }
 0x363   : > { %9197 = vst [vmem:[#allocation270_spill] sm:$0xff] %v6882_v33  ;;  %1818 = vbcast.lane.b32.xlu1 %v5959_v30, 280  ;;  %v6896_v33 = vsel %vm1997_vm1, %v1910_v32, %v1508_v27  ;;  %v1894_v27 = vsel %vm1868_vm0, %v6063_v57, %v6419_v38  ;;  %v1895_v57 = vsel %vm1868_vm0, %v6071_v60, %v6427_v55 }
 0x364   : > { %1814 = vbcast.lane.b32.xlu0 %v5959_v30, 272  ;;  %9200 = vst [vmem:[#allocation273_spill] sm:$0xff] %v6896_v33  ;;  %v3351_v41 = vcombine.high %v6909_v11, %v6896_v33  ;;  %v6946_v10 = vsel %vm1997_vm1, %v1895_v57, %v6783_v25 }
 0x365   : > { %v6886_v24 = vpop.permute.xlu1 %1582  ;;  %9207 = vst [vmem:[#allocation280_spill] sm:$0xff] %v6946_v10 }
 0x366   : > { %9198 = vst [vmem:[#allocation271_spill] sm:$0xff] %v6886_v24  ;;  %v1579_v6 = vpop.permute.xlu0 %1578  ;;  %v1926_v24 = vsel %vm1868_vm0, %v6159_v58, %v6515_v19  ;;  %v6924_v58 = vsel %vm1997_vm1, %v1894_v27, %v6775_v26  ;;  %v6976_v27 = vrot.slane %v9211_v28, %v6929_v22 }
 0x367   : > { %1826 = vbcast.lane.b32.xlu1 %v5959_v30, 296  ;;  %v6912_v15 = vsel %vm1997_vm1, %v1926_v24, %v1575_v44  ;;  %9205 = vst [vmem:[#allocation278_spill] sm:$0xff] %v6924_v58  ;;  %v1927_v24 = vsel %vm1868_vm0, %v6167_v46, %v6523_v37  ;;  %v6949_v37 = vrot.slane %v3351_v41, %v6929_v22 }
 0x368   : > { %1822 = vbcast.lane.b32.xlu0 %v5959_v30, 288  ;;  %9203 = vst [vmem:[#allocation276_spill] sm:$0xff] %v6912_v15  ;;  %v3367_v38 = vcombine.high %v6924_v58, %v6912_v15  ;;  %v6941_v26 = vsel %vm1997_vm1, %v1927_v24, %v1579_v6  ;;  %9212 = vst [vmem:[#allocation284_spill] sm:$0xff] %v6976_v27 }
 0x369   : > { %v6893_v40 = vpop.permute.xlu1 %1590  ;;  %9208 = vst [vmem:[#allocation281_spill] sm:$0xff] %v6949_v37  ;;  %v3502_v60 = vcombine.low %v6946_v10, %v6941_v26 }
 0x36a   : > { %9199 = vst [vmem:[#allocation272_spill] sm:$0xff] %v6893_v40  ;;  %v6898_v45 = vpop.permute.xlu0 %1586  ;;  %v6952_v46 = vrot.slane %v3367_v38, %v6929_v22 }
 0x36b   : > { %9201 = vst [vmem:[#allocation274_spill] sm:$0xff] %v6898_v45  ;;  %1834 = vbcast.lane.b32.xlu1 %v5959_v30, 312  ;;  %v6969_v29 = vrot.slane %v3502_v60, %v6929_v22 }
 0x36c   : > { %1830 = vbcast.lane.b32.xlu0 %v5959_v30, 304  ;;  %9209 = vst [vmem:[#allocation282_spill] sm:$0xff] %v6952_v46 }
 0x36d   : > { %v6920_v0 = vpop.permute.xlu1 %1598  ;;  %9210 = vst [vmem:[#allocation283_spill] sm:$0xff] %v6969_v29 }
 0x36e   : > { %9204 = vst [vmem:[#allocation277_spill] sm:$0xff] %v6920_v0  ;;  %v6926_v19 = vpop.permute.xlu0 %1594 }
 0x36f   : > { %9206 = vst [vmem:[#allocation279_spill] sm:$0xff] %v6926_v19  ;;  %1842 = vbcast.lane.b32.xlu1 %v5959_v30, 328 }
 0x370   : > { %1838 = vbcast.lane.b32.xlu0 %v5959_v30, 320 }
 0x371   : > { %v6954_v44 = vpop.permute.xlu1 %1609 }
 0x372   : > { %v6958_v55 = vpop.permute.xlu0 %1605 }
 0x373   : > { %1850 = vbcast.lane.b32.xlu1 %v5959_v30, 344 }
 0x374   : > { %1846 = vbcast.lane.b32.xlu0 %v5959_v30, 336 }
 0x375   : > { %v6964_v25 = vpop.permute.xlu1 %1617 }
 0x376   : > { %v6966_v32 = vpop.permute.xlu0 %1613 }
 0x377   : > { %1858 = vbcast.lane.b32.xlu1 %v5959_v30, 360 }
 0x378   : > { %1854 = vbcast.lane.b32.xlu0 %v5959_v30, 352 }
 0x379   : > { %v6979_v41 = vpop.permute.xlu1 %1625 }
 0x37a   : > { %9213 = vst [vmem:[#allocation285_spill] sm:$0xff] %v6979_v41  ;;  %v6985_v57 = vpop.permute.xlu0 %1621 }
 0x37b   : > { %9214 = vst [vmem:[#allocation286_spill] sm:$0xff] %v6985_v57  ;;  %1866 = vbcast.lane.b32.xlu1 %v5959_v30, 376 }
 0x37c   : > { %1862 = vbcast.lane.b32.xlu0 %v5959_v30, 368 }
 0x37d   : > { %v6989_v60 = vpop.permute.xlu1 %1633 }
 0x37e   : > { %9215 = vst [vmem:[#allocation287_spill] sm:$0xff] %v6989_v60  ;;  %v6991_v28 = vpop.permute.xlu0 %1629 }
 0x37f   : > { %9216 = vst [vmem:[#allocation288_spill] sm:$0xff] %v6991_v28 }
 0x381   : > { %v6993_v6 = vpop.permute.xlu1 %1641 }
 0x382   : > { %v6995_v0 = vpop.permute.xlu0 %1637 }
 0x383   : > { %9217 = vst [vmem:[#allocation289_spill] sm:$0xff] %v6995_v0 }
 0x385   : > { %v6997_v19 = vpop.permute.xlu1 %1649 }
 0x386   : > { %9218 = vst [vmem:[#allocation290_spill] sm:$0xff] %v6997_v19  ;;  %v1646_v24 = vpop.permute.xlu0 %1645 }
 0x387   : > { %v7064_v10 = vsel %vm1997_vm1, %v1943_v61, %v1646_v24  ;;  %v1885_v61 = vsel %vm1868_vm0, %v6041_v50, %v6397_v16  ;;  %v5562_v24 = vmov 1934713408  }
 0x388   : > { %v2014_v53 = vsel %vm1997_vm1, %v1885_v61, %v6753_v36  ;;  %v2193_v50 = vunpack.c.l.s4 %v5562_v24  ;;  %v1998_v36 = vsel %vm1997_vm1, %v1869_v52, %v6705_v5 }
 0x389   : > { %v6999_v40 = vpop.permute.xlu1 %1657 }
 0x38a   : > { %9219 = vst [vmem:[#allocation291_spill] sm:$0xff] %v6999_v40  ;;  %v7001_v38 = vpop.permute.xlu0 %1653  ;;  %v2194_v61 = vunpack.c.0.s8 %v2193_v50 }
 0x38b   : > { %9220 = vst [vmem:[#allocation292_spill] sm:$0xff] %v7001_v38 }
 0x38c   : > { %v7123_v7 = vsub.s32 %v2194_v61, %v5896_v1 }
 0x38d   : > { %v7003_v45 = vpop.permute.xlu1 %1665 }
 0x38e   : > { %9221 = vst [vmem:[#allocation293_spill] sm:$0xff] %v7003_v45  ;;  %v7005_v11 = vpop.permute.xlu0 %1661 }
 0x38f   : > { %9222 = vst [vmem:[#allocation294_spill] sm:$0xff] %v7005_v11 }
 0x391   : > { %v7007_v30 = vpop.permute.xlu1 %1676 }
 0x392   : > { %v1673_v33 = vpop.permute.xlu0 %1672 }
 0x395   : > { %v7009_v58 = vpop.permute.xlu1 %1684 }
 0x396   : > { %v7011_v15 = vpop.permute.xlu0 %1680 }
 0x399   : > { %v7013_v60 = vpop.permute.xlu1 %1692 }
 0x39a   : > { %9223 = vst [vmem:[#allocation295_spill] sm:$0xff] %v7013_v60  ;;  %v7015_v0 = vpop.permute.xlu0 %1688 }
 0x39d   : > { %v7017_v19 = vpop.permute.xlu1 %1700 }
 0x39e   : > { %9224 = vst [vmem:[#allocation296_spill] sm:$0xff] %v7017_v19  ;;  %v7019_v40 = vpop.permute.xlu0 %1696 }
 0x39f   : > { %9225 = vst [vmem:[#allocation297_spill] sm:$0xff] %v7019_v40 }
 0x3a1   : > { %v7021_v38 = vpop.permute.xlu1 %1708 }
 0x3a2   : > { %v7023_v45 = vpop.permute.xlu0 %1704 }
 0x3a3   : > { %9226 = vst [vmem:[#allocation298_spill] sm:$0xff] %v7023_v45 }
 0x3a5   : > { %v7025_v11 = vpop.permute.xlu1 %1716 }
 0x3a6   : > { %9227 = vst [vmem:[#allocation299_spill] sm:$0xff] %v7025_v11  ;;  %v7027_v28 = vpop.permute.xlu0 %1712 }
 0x3a9   : > { %v7029_v41 = vpop.permute.xlu1 %1724 }
 0x3aa   : > { %9228 = vst [vmem:[#allocation300_spill] sm:$0xff] %v7029_v41  ;;  %v7031_v29 = vpop.permute.xlu0 %1720 }
 0x3ab   : > { %9229 = vst [vmem:[#allocation301_spill] sm:$0xff] %v7031_v29 }
 0x3ad   : > { %v7033_v27 = vpop.permute.xlu1 %1732 }
 0x3ae   : > { %9230 = vst [vmem:[#allocation302_spill] sm:$0xff] %v7033_v27  ;;  %v7035_v60 = vpop.permute.xlu0 %1728 }
 0x3af   : > { %9231 = vst [vmem:[#allocation303_spill] sm:$0xff] %v7035_v60 }
 0x3b1   : > { %v7037_v46 = vpop.permute.xlu1 %1743 }
 0x3b2   : > { %v1740_v19 = vpop.permute.xlu0 %1739 }
 0x3b5   : > { %v7039_v40 = vpop.permute.xlu1 %1751 }
 0x3b6   : > { %v7041_v37 = vpop.permute.xlu0 %1747 }
 0x3b9   : > { %v7043_v45 = vpop.permute.xlu1 %1759 }
 0x3ba   : > { %9232 = vst [vmem:[#allocation304_spill] sm:$0xff] %v7043_v45  ;;  %v7045_v11 = vpop.permute.xlu0 %1755  ;;  %v1975_v45 = vsel %vm1868_vm0, %v6283_v13, %v6639_v20  ;;  %v2046_v13 = vsel %vm1997_vm1, %v1917_v56, %v6860_v8  ;;  %v1949_v56 = vsel %vm1868_vm0, %v6225_v48, %v6581_v63 }
 0x3bb   : > { %v2142_v4 = vcombine.low %v2014_v53, %v2046_v13  ;;  %v2143_v52 = vcombine.high %v2014_v53, %v2046_v13 }
 0x3bd   : > { %v7047_v17 = vpop.permute.xlu1 %1767  ;;  %v7135_v1 = vrot.slane %v2143_v52, %v6929_v22 }
 0x3be   : > { %9233 = vst [vmem:[#allocation305_spill] sm:$0xff] %v7047_v17  ;;  %v7049_v41 = vpop.permute.xlu0 %1763 }
 0x3bf   : > { %9234 = vst [vmem:[#allocation306_spill] sm:$0xff] %v7049_v41 }
 0x3c1   : > { %v7051_v29 = vpop.permute.xlu1 %1775 }
 0x3c2   : > { %v7053_v27 = vpop.permute.xlu0 %1771 }
 0x3c3   : > { %9235 = vst [vmem:[#allocation307_spill] sm:$0xff] %v7053_v27  ;;  %v9273_v27 = vld [vmem:[#allocation26_spill] sm:$0xff] }
 0x3c5   : > { %v7055_v60 = vpop.permute.xlu1 %1783 }
 0x3c6   : > { %9236 = vst [vmem:[#allocation308_spill] sm:$0xff] %v7055_v60  ;;  %v1780_v57 = vpop.permute.xlu0 %1779 }
 0x3c7   : > { %v7067_v17 = vsel %vm1997_vm1, %v1975_v45, %v1780_v57  ;;  %v1965_v45 = vsel %vm1868_vm0, %v6259_v12, %v6615_v59  ;;  %v1933_v59 = vsel %vm1868_vm0, %v6185_v42, %v6541_v35  ;;  %v2126_v12 = vcombine.low %v1998_v36, %v2030_v62 }
 0x3c8   : > { %v2094_v16 = vsel %vm1997_vm1, %v1965_v45, %v1740_v19  ;;  %v2062_v31 = vsel %vm1997_vm1, %v1933_v59, %v6958_v55  ;;  %v2150_v35 = vrot.slane %v2142_v4, %v6929_v22  ;;  %v2078_v42 = vsel %vm1997_vm1, %v1949_v56, %v1673_v33 }
 0x3c9   : > { %v7071_v41 = vpop.permute.xlu1 %1791  ;;  %v2158_v51 = vcombine.low %v2062_v31, %v2094_v16  ;;  %v2134_v55 = vrot.slane %v2126_v12, %v6929_v22  ;;  %v2159_v4 = vcombine.high %v2062_v31, %v2094_v16  ;;  %v2127_v56 = vcombine.high %v1998_v36, %v2030_v62 }
 0x3ca   : > { %9237 = vst [vmem:[#allocation309_spill] sm:$0xff] %v7071_v41  ;;  %v7073_v60 = vpop.permute.xlu0 %1787 }
 0x3cb   : > { %9238 = vst [vmem:[#allocation310_spill] sm:$0xff] %v7073_v60  ;;  %v2166_v48 = vrot.slane %v2158_v51, %v6929_v22  ;;  %v2191_v2 = vcombine.high %v2134_v55, %v2150_v35  ;;  %v7138_v61 = vrot.slane %v2159_v4, %v6929_v22  ;;  %v2190_v53 = vcombine.low %v2134_v55, %v2150_v35  ;;  %v9277_v60 = vld [vmem:[#allocation38_spill] sm:$0xff] }
 0x3cc   : > { %v7141_v16 = vrot.slane %v2127_v56, %v6929_v22  ;;  %v1942_v4 = vsel %vm1868_vm0, %v6207_v39, %v6563_v23 }
 0x3cd   : > { %v7086_v20 = vpop.permute.xlu1 %1799  ;;  %v2205_v12 = vrot.slane %v2191_v2, %v7123_v7  ;;  %v1902_v2 = vsel %vm1868_vm0, %v6087_v3, %v6443_v43  ;;  %v9244_v43 = vld [vmem:[#allocation207_spill] sm:$0xff]  ;;  %v9245_v3 = vld [vmem:[#allocation102_spill] sm:$0xff] }
 0x3ce   : > { %9239 = vst [vmem:[#allocation311_spill] sm:$0xff] %v7086_v20  ;;  %v7095_v8 = vpop.permute.xlu0 %1795 }
 0x3cf   : > { %9240 = vst [vmem:[#allocation312_spill] sm:$0xff] %v7095_v8  ;;  %v9274_v8 = vld [vmem:[#allocation217_spill] sm:$0xff] }
 0x3d1   : > { %v1811_v57 = vpop.permute.xlu1 %1810 }
 0x3d2   : > { %v1807_v19 = vpop.permute.xlu0 %1806 }
 0x3d3   : > { %v2110_v5 = vsel %vm1997_vm1, %v1981_v34, %v1807_v19 }
 0x3d4   : > { %v2174_v18 = vcombine.low %v2078_v42, %v2110_v5  ;;  %v2175_v24 = vcombine.high %v2078_v42, %v2110_v5  ;;  %v2206_v42 = vcombine.low %v7141_v16, %v7135_v1  ;;  %v7153_v5 = vrot.slane %v2190_v53, %v7123_v7 }
 0x3d5   : > { %v7118_v45 = vpop.permute.xlu1 %1818 }
 0x3d6   : > { %v2182_v63 = vrot.slane %v2174_v18, %v6929_v22  ;;  %v7130_v34 = vrot.slane %v2175_v24, %v6929_v22  ;;  %v7132_v19 = vpop.permute.xlu0 %1814  ;;  %v1918_v24 = vsel %vm1868_vm0, %v6135_v14, %v6491_v9  ;;  %v9246_v14 = vld [vmem:[#allocation214_spill] sm:$0xff] }
 0x3d8   : > { %v2223_v50 = vcombine.high %v2166_v48, %v2182_v63  ;;  %v2222_v51 = vcombine.low %v2166_v48, %v2182_v63  ;;  %v2238_v62 = vcombine.low %v7138_v61, %v7130_v34  ;;  %v7163_v48 = vrot.slane %v2206_v42, %v7123_v7  ;;  %v9251_v42 = vld [vmem:[#allocation73_spill] sm:$0xff] }
 0x3d9   : > { %v7126_v59 = vpop.permute.xlu1 %1826  ;;  %v1886_v63 = vsel %vm1868_vm0, %v6039_v49, %v6395_v54  ;;  %v9242_v49 = vld [vmem:[#allocation200_spill] sm:$0xff]  ;;  %v9243_v54 = vld [vmem:[#allocation95_spill] sm:$0xff] }
 0x3da   : > { %v2237_v33 = vrot.slane %v2223_v50, %v7123_v7  ;;  %v7146_v36 = vrot.slane %v2222_v51, %v7123_v7  ;;  %v7155_v35 = vpop.permute.xlu0 %1822  ;;  %v7158_v18 = vrot.slane %v2238_v62, %v7123_v7  ;;  %v1934_v50 = vsel %vm1868_vm0, %v6183_v47, %v6539_v21  ;;  %v9247_v47 = vld [vmem:[#allocation109_spill] sm:$0xff]  ;;  %v9250_v62 = vld [vmem:[#allocation178_spill] sm:$0xff] }
 0x3db   : > { %v1974_v56 = vsel %vm1868_vm0, %v9243_v54, %v9242_v49  ;;  %v1982_v51 = vsel %vm1868_vm0, %v9245_v3, %v9244_v43  ;;  %v1990_v21 = vsel %vm1868_vm0, %v9247_v47, %v9246_v14  ;;  %v9252_v49 = vld [vmem:[#allocation185_spill] sm:$0xff]  ;;  %v9253_v54 = vld [vmem:[#allocation80_spill] sm:$0xff] }
 0x3dc   : > { %v2256_v13 = vcombine.low %v2205_v12, %v2237_v33  ;;  %v2255_v55 = vcombine.high %v7153_v5, %v7146_v36  ;;  %v2258_v9 = vcombine.low %v7163_v48, %v7158_v18  ;;  %v7196_v39 = vsel %vm1997_vm1, %v1982_v51, %v1811_v57  ;;  %v9254_v3 = vld [vmem:[#allocation193_spill] sm:$0xff]  ;;  %v9255_v14 = vld [vmem:[#allocation88_spill] sm:$0xff]  ;;  %v9257_v57 = vld [vmem:[#allocation263_spill] sm:$0xff] }
 0x3dd   : > { %v7148_v31 = vpop.permute.xlu1 %1834  ;;  %v2257_v53 = vcombine.high %v2205_v12, %v2237_v33  ;;  %v1958_v43 = vsel %vm1868_vm0, %v9253_v54, %v9252_v49  ;;  %v1966_v47 = vsel %vm1868_vm0, %v9255_v14, %v9254_v3  ;;  %v7214_v33 = vsel %vm1997_vm1, %v1918_v24, %v9257_v57 }
 0x3de   : > { %4307 = vrot.lane.b32.xlu1 %v2256_v13, %s5563_s11  ;;  %9241 = vst [vmem:[#allocation313_spill] sm:$0xff] %v7148_v31  ;;  %4303 = vrot.lane.b32.xlu0 %v2255_v55, %s5564_s9  ;;  %v7193_v13 = vsel %vm1997_vm1, %v1974_v56, %v7051_v29  ;;  %v7198_v23 = vpop.permute.xlu0 %1830  ;;  %v1950_v55 = vsel %vm1868_vm0, %v9251_v42, %v9250_v62  ;;  %v9317_v31 = vld [vmem:[#allocation166_spill] sm:$0xff]  ;;  %s5581_s11 = smov 60   ;;  %s5582_s9 = smov 57  }
 0x3df   : > { %9248 = vst [vmem:[#allocation200_spill] sm:$0xff] %v7193_v13  ;;  %9249 = vst [vmem:[#allocation95_spill] sm:$0xff] %v7198_v23  ;;  %v7218_v12 = vsel %vm1997_vm1, %v1942_v4, %v6993_v6  ;;  %v2079_v56 = vsel %vm1997_vm1, %v1950_v55, %v7007_v30  ;;  %v7224_v51 = vsel %vm1997_vm1, %v1966_v47, %v7037_v46  ;;  %v9262_v30 = vld [vmem:[#allocation14_spill] sm:$0xff]  ;;  %v9263_v46 = vld [vmem:[#allocation235_spill] sm:$0xff] }
 0x3e0   : > { %9258 = vst [vmem:[#allocation102_spill] sm:$0xff] %v7218_v12  ;;  %v7230_v24 = vsel %vm1997_vm1, %v1958_v43, %v7021_v38  ;;  %v3383_v6 = vcombine.high %v7218_v12, %v7193_v13  ;;  %v2310_v4 = vcombine.low %v2079_v56, %v7196_v39  ;;  %v2015_v42 = vsel %vm1997_vm1, %v1886_v63, %v9263_v46  ;;  %v9264_v38 = vld [vmem:[#allocation222_spill] sm:$0xff]  ;;  %v9268_v46 = vld [vmem:[#allocation119_spill] sm:$0xff]  ;;  %v9304_v13 = vld [vmem:[#allocation28_spill] sm:$0xff] }
 0x3e1   : > { %v1843_v52 = vpop.permute.xlu1 %1842  ;;  %9260 = vst [vmem:[#allocation214_spill] sm:$0xff] %v7230_v24  ;;  %v2278_v49 = vcombine.low %v2015_v42, %v7214_v33  ;;  %v2239_v43 = vcombine.high %v7138_v61, %v7130_v34  ;;  %v2207_v63 = vcombine.high %v7141_v16, %v7135_v1  ;;  %v9319_v23 = vld [vmem:[#allocation168_spill] sm:$0xff] }
 0x3e2   : > { %v7210_v29 = vsel %vm1997_vm1, %v1990_v21, %v1843_v52  ;;  %4315 = vrot.lane.b32.xlu1 %v2258_v9, %s5565_s25  ;;  %4311 = vrot.lane.b32.xlu0 %v2257_v53, %s5566_s30  ;;  %v9259_v52 = vld [vmem:[#allocation248_spill] sm:$0xff]  ;;  %v9261_v21 = vld [vmem:[#allocation117_spill] sm:$0xff]  ;;  %v2063_v53 = vsel %vm1997_vm1, %v1934_v50, %v6954_v44  ;;  %v7250_v14 = vpop.permute.xlu0 %1838  ;;  %v7255_v44 = vrot.slane %v3383_v6, %v6929_v22  ;;  %s5583_s25 = smov 66   ;;  %s5584_s30 = smov 63  }
 0x3e3   : > { %9256 = vst [vmem:[#allocation207_spill] sm:$0xff] %v7210_v29  ;;  %v2031_v9 = vsel %vm1997_vm1, %v1902_v2, %v9259_v52  ;;  %v1870_v62 = vsel %vm1868_vm0, %v9262_v30, %v9261_v21  ;;  %v3399_v2 = vcombine.high %v7230_v24, %v7210_v29  ;;  %v2294_v54 = vcombine.low %v2063_v53, %v7224_v51  ;;  %v9266_v21 = vld [vmem:[#allocation118_spill] sm:$0xff]  ;;  %v9306_v24 = vld [vmem:[#allocation37_spill] sm:$0xff]  ;;  %v9308_v29 = vld [vmem:[#allocation39_spill] sm:$0xff] }
 0x3e4   : > { %v1999_v55 = vsel %vm1997_vm1, %v1870_v62, %v9264_v38  ;;  %9265 = vst [vmem:[#allocation109_spill] sm:$0xff] %v7250_v14  ;;  %v2318_v50 = vrot.slane %v2310_v4, %v6929_v22  ;;  %v7262_v57 = vrot.slane %v2278_v49, %v6929_v22  ;;  %v2253_v34 = vrot.slane %v2239_v43, %v7123_v7  ;;  %v9267_v4 = vld [vmem:[#allocation13_spill] sm:$0xff]  ;;  %v9270_v49 = vld [vmem:[#allocation120_spill] sm:$0xff] }
 0x3e5   : > { %v2262_v3 = vcombine.low %v1999_v55, %v2031_v9  ;;  %v7259_v47 = vrot.slane %v3399_v2, %v6929_v22  ;;  %v2302_v52 = vrot.slane %v2294_v54, %v6929_v22  ;;  %v2221_v16 = vrot.slane %v2207_v63, %v7123_v7  ;;  %v9269_v2 = vld [vmem:[#allocation12_spill] sm:$0xff]  ;;  %v9271_v54 = vld [vmem:[#allocation15_spill] sm:$0xff]  ;;  %v9315_v14 = vld [vmem:[#allocation157_spill] sm:$0xff] }
 0x3e6   : > { %v7273_v30 = vsel %vm1868_vm0, %v9267_v4, %v9266_v21  ;;  %v1847_v62 = vpop.permute.xlu0 %1846  ;;  %v1871_v38 = vsel %vm1868_vm0, %v9269_v2, %v9268_v46  ;;  %v7281_v43 = vsel %vm1868_vm0, %v9271_v54, %v9270_v49  ;;  %v9272_v63 = vld [vmem:[#allocation131_spill] sm:$0xff]  ;;  %v9275_v21 = vld [vmem:[#allocation112_spill] sm:$0xff]  ;;  %v2263_v41 = vcombine.high %v1999_v55, %v2031_v9 }
 0x3e7   : > { %v2270_v1 = vrot.slane %v2262_v3, %v6929_v22  ;;  %v2358_v6 = vcombine.low %v2302_v52, %v2318_v50  ;;  %v2260_v61 = vcombine.low %v2221_v16, %v2253_v34  ;;  %v1887_v20 = vsel %vm1868_vm0, %v9273_v27, %v9272_v63  ;;  %v9276_v2 = vld [vmem:[#allocation143_spill] sm:$0xff] }
 0x3e8   : > { %v1991_v4 = vsel %vm1868_vm0, %v9275_v21, %v9274_v8  ;;  %v2259_v46 = vcombine.high %v7163_v48, %v7158_v18  ;;  %v1903_v49 = vsel %vm1868_vm0, %v9277_v60, %v9276_v2  ;;  %v2311_v54 = vcombine.high %v2079_v56, %v7196_v39  ;;  %v9278_v63 = vld [vmem:[#allocation155_spill] sm:$0xff]  ;;  %v9279_v8 = vld [vmem:[#allocation50_spill] sm:$0xff]  ;;  %v9282_v21 = vld [vmem:[#allocation188_spill] sm:$0xff] }
 0x3e9   : > { %v2326_v3 = vcombine.low %v2270_v1, %v7262_v57  ;;  %v7297_v12 = vrot.slane %v2358_v6, %v7123_v7  ;;  %4323 = vrot.lane.b32.xlu1 %v2260_v61, %s5567_s19  ;;  %v7300_v27 = vsel %vm1997_vm1, %v1991_v4, %v1847_v62  ;;  %v1919_v9 = vsel %vm1868_vm0, %v9279_v8, %v9278_v63  ;;  %v9280_v55 = vld [vmem:[#allocation167_spill] sm:$0xff]  ;;  %v9281_v18 = vld [vmem:[#allocation62_spill] sm:$0xff]  ;;  %v9284_v61 = vld [vmem:[#allocation180_spill] sm:$0xff]  ;;  %s5585_s19 = smov 72  }
 0x3ea   : > { %v1935_v48 = vsel %vm1868_vm0, %v9281_v18, %v9280_v55  ;;  %v9283_v60 = vld [vmem:[#allocation83_spill] sm:$0xff]  ;;  %v2279_v56 = vcombine.high %v2015_v42, %v7214_v33  ;;  %4319 = vrot.lane.b32.xlu0 %v2259_v46, %s5568_s29  ;;  %v2295_v63 = vcombine.high %v2063_v53, %v7224_v51  ;;  %v9287_v55 = vld [vmem:[#allocation90_spill] sm:$0xff]  ;;  %v9289_v33 = vld [vmem:[#allocation104_spill] sm:$0xff]  ;;  %v7328_v46 = vrot.slane %v2263_v41, %v6929_v22  ;;  %s5586_s29 = smov 69  }
 0x3eb   : > { %v1959_v39 = vsel %vm1868_vm0, %v9283_v60, %v9282_v21  ;;  %v9285_v6 = vld [vmem:[#allocation75_spill] sm:$0xff]  ;;  %v2334_v4 = vrot.slane %v2326_v3, %v7123_v7  ;;  %v9288_v21 = vld [vmem:[#allocation209_spill] sm:$0xff]  ;;  %v2325_v60 = vrot.slane %v2311_v54, %v6929_v22  ;;  %v2261_v51 = vcombine.high %v2221_v16, %v2253_v34 }
 0x3ec   : > { %v1951_v62 = vsel %vm1868_vm0, %v9285_v6, %v9284_v61  ;;  %v7318_v2 = vsel %vm1997_vm1, %v1959_v39, %v7027_v28  ;;  %v9286_v8 = vld [vmem:[#allocation195_spill] sm:$0xff]  ;;  %v1983_v42 = vsel %vm1868_vm0, %v9289_v33, %v9288_v21  ;;  %v2359_v28 = vcombine.high %v2302_v52, %v2318_v50  ;;  %v9293_v52 = vld [vmem:[#allocation265_spill] sm:$0xff] }
 0x3ed   : > { %v1967_v18 = vsel %vm1868_vm0, %v9287_v55, %v9286_v8  ;;  %v3534_v3 = vcombine.low %v7318_v2, %v7300_v27  ;;  %v2390_v39 = vcombine.low %v2334_v4, %v7297_v12  ;;  %v2293_v53 = vrot.slane %v2279_v56, %v6929_v22 }
 0x3ee   : > { %v9290_v61 = vcombine.low %v7064_v10, %v7067_v17  ;;  %v7343_v41 = vsel %vm1997_vm1, %v1983_v42, %v7132_v19  ;;  %v2327_v50 = vcombine.high %v2270_v1, %v7262_v57  ;;  %v7351_v34 = vsel %vm1997_vm1, %v1919_v9, %v9293_v52  ;;  %4327 = vrot.lane.b32.xlu0 %v2261_v51, %s5570_s26  ;;  %v9294_v9 = vld [vmem:[#allocation250_spill] sm:$0xff]  ;;  %v9298_v42 = vld [vmem:[#allocation237_spill] sm:$0xff]  ;;  %s5588_s26 = smov 75  }
 0x3ef   : > { %v7346_v8 = vrot.slane %v3534_v3, %v6929_v22  ;;  %v2309_v16 = vrot.slane %v2295_v63, %v6929_v22  ;;  %4331 = vrot.lane.b32.xlu1 %v2390_v39, %s5569_s5  ;;  %v2080_v54 = vsel %vm1997_vm1, %v1951_v62, %v7011_v15  ;;  %v7358_v19 = vsel %vm1997_vm1, %v1967_v18, %v7041_v37  ;;  %v9295_v15 = vld [vmem:[#allocation121_spill] sm:$0xff]  ;;  %v9296_v62 = vld [vmem:[#allocation16_spill] sm:$0xff]  ;;  %v9299_v52 = vld [vmem:[#allocation130_spill] sm:$0xff]  ;;  %s5587_s5 = smov 78  }
 0x3f0   : > { %v7339_v6 = vrot.slane %v9290_v61, %v6929_v22  ;;  %v7366_v56 = vsel %vm1997_vm1, %v1903_v49, %v9294_v9  ;;  %v2373_v63 = vrot.slane %v2359_v28, %v7123_v7  ;;  %v2446_v21 = vcombine.low %v2080_v54, %v7343_v41  ;;  %v9297_v18 = vld [vmem:[#allocation224_spill] sm:$0xff]  ;;  %v9300_v9 = vld [vmem:[#allocation25_spill] sm:$0xff] }
 0x3f1   : > { %9292 = vst [vmem:[#allocation73_spill] sm:$0xff] %v7346_v8  ;;  %v2374_v55 = vcombine.low %v2309_v16, %v2325_v60  ;;  %v7373_v37 = vsel %vm1868_vm0, %v9296_v62, %v9295_v15  ;;  %v7377_v33 = vsel %vm1997_vm1, %v1871_v38, %v9297_v18  ;;  %v2016_v3 = vsel %vm1997_vm1, %v1887_v20, %v9298_v42  ;;  %v9301_v38 = vld [vmem:[#allocation132_spill] sm:$0xff]  ;;  %v9302_v62 = vld [vmem:[#allocation27_spill] sm:$0xff]  ;;  %v9303_v57 = vld [vmem:[#allocation133_spill] sm:$0xff] }
 0x3f2   : > { %9291 = vst [vmem:[#allocation178_spill] sm:$0xff] %v7339_v6  ;;  %v2064_v49 = vsel %vm1997_vm1, %v1935_v48, %v6966_v32  ;;  %v2341_v28 = vrot.slane %v2327_v50, %v7123_v7  ;;  %v2342_v39 = vcombine.low %v7328_v46, %v2293_v53  ;;  %v2414_v51 = vcombine.low %v2016_v3, %v7351_v34 }
 0x3f3   : > { %v2430_v61 = vcombine.low %v2064_v49, %v7358_v19  ;;  %v7390_v15 = vsel %vm1868_vm0, %v9300_v9, %v9299_v52  ;;  %v7395_v20 = vsel %vm1868_vm0, %v9302_v62, %v9301_v38  ;;  %v2398_v32 = vcombine.low %v7377_v33, %v7366_v56  ;;  %v9305_v9 = vld [vmem:[#allocation142_spill] sm:$0xff]  ;;  %v9307_v62 = vld [vmem:[#allocation144_spill] sm:$0xff] }
 0x3f4   : > { %v2375_v48 = vcombine.high %v2309_v16, %v2325_v60  ;;  %v2382_v50 = vrot.slane %v2374_v55, %v7123_v7  ;;  %v2454_v18 = vrot.slane %v2446_v21, %v6929_v22  ;;  %v2392_v42 = vcombine.low %v2341_v28, %v2373_v63  ;;  %v9311_v21 = vld [vmem:[#allocation154_spill] sm:$0xff] }
 0x3f5   : > { %v2391_v1 = vcombine.high %v2334_v4, %v7297_v12  ;;  %v7405_v52 = vsel %vm1868_vm0, %v9304_v13, %v9303_v57  ;;  %v1904_v38 = vsel %vm1868_vm0, %v9306_v24, %v9305_v9  ;;  %v7413_v60 = vsel %vm1868_vm0, %v9308_v29, %v9307_v62  ;;  %v9309_v13 = vld [vmem:[#allocation145_spill] sm:$0xff]  ;;  %v9310_v57 = vld [vmem:[#allocation40_spill] sm:$0xff] }
 0x3f6   : > { %v2343_v16 = vcombine.high %v7328_v46, %v2293_v53  ;;  %v2350_v55 = vrot.slane %v2342_v39, %v7123_v7  ;;  %v2422_v12 = vrot.slane %v2414_v51, %v6929_v22  ;;  %v2438_v4 = vrot.slane %v2430_v61, %v6929_v22  ;;  %4339 = vrot.lane.b32.xlu1 %v2392_v42, %s5571_s27  ;;  %v9312_v29 = vld [vmem:[#allocation49_spill] sm:$0xff]  ;;  %v9313_v46 = vld [vmem:[#allocation156_spill] sm:$0xff]  ;;  %v9314_v53 = vld [vmem:[#allocation51_spill] sm:$0xff]  ;;  %s5589_s27 = smov 84  }
 0x3f7   : > { %4335 = vrot.lane.b32.xlu0 %v2391_v1, %s5572_s4  ;;  %v7422_v24 = vsel %vm1868_vm0, %v9310_v57, %v9309_v13  ;;  %v1920_v9 = vsel %vm1868_vm0, %v9312_v29, %v9311_v21  ;;  %v7430_v39 = vsel %vm1868_vm0, %v9314_v53, %v9313_v46  ;;  %v2406_v51 = vrot.slane %v2398_v32, %v6929_v22  ;;  %v9316_v13 = vld [vmem:[#allocation52_spill] sm:$0xff]  ;;  %v9318_v21 = vld [vmem:[#allocation61_spill] sm:$0xff]  ;;  %v9320_v46 = vld [vmem:[#allocation63_spill] sm:$0xff]  ;;  %s5590_s4 = smov 81  }
 0x3f8   : > { %v2389_v61 = vrot.slane %v2375_v48, %v7123_v7  ;;  %v2447_v1 = vcombine.high %v2080_v54, %v7343_v41  ;;  %v2494_v42 = vcombine.low %v2438_v4, %v2454_v18  ;;  %v2394_v62 = vcombine.low %v2350_v55, %v2382_v50 }
 0x3f9   : > { %v7438_v57 = vsel %vm1868_vm0, %v9316_v13, %v9315_v14  ;;  %v1936_v29 = vsel %vm1868_vm0, %v9318_v21, %v9317_v31  ;;  %v7446_v53 = vsel %vm1868_vm0, %v9320_v46, %v9319_v23  ;;  %v2393_v32 = vcombine.high %v2341_v28, %v2373_v63  ;;  %v9321_v14 = vld [vmem:[#allocation169_spill] sm:$0xff]  ;;  %v9322_v13 = vld [vmem:[#allocation64_spill] sm:$0xff]  ;;  %v9323_v31 = vld [vmem:[#allocation179_spill] sm:$0xff] }
 0x3fa   : > { %v2357_v48 = vrot.slane %v2343_v16, %v7123_v7  ;;  %v2415_v41 = vcombine.high %v2016_v3, %v7351_v34  ;;  %v2462_v54 = vcombine.low %v2406_v51, %v2422_v12  ;;  %v2431_v8 = vcombine.high %v2064_v49, %v7358_v19  ;;  %4347 = vrot.lane.b32.xlu1 %v2394_v62, %s5573_s7  ;;  %v9324_v21 = vld [vmem:[#allocation74_spill] sm:$0xff]  ;;  %v9325_v46 = vld [vmem:[#allocation208_spill] sm:$0xff]  ;;  %v9326_v63 = vld [vmem:[#allocation103_spill] sm:$0xff]  ;;  %s5591_s7 = smov 90  }
 0x3fb   : > { %v7454_v6 = vsel %vm1868_vm0, %v9322_v13, %v9321_v14  ;;  %v1952_v23 = vsel %vm1868_vm0, %v9324_v21, %v9323_v31  ;;  %v1984_v28 = vsel %vm1868_vm0, %v9326_v63, %v9325_v46  ;;  %v2399_v34 = vcombine.high %v7377_v33, %v7366_v56  ;;  %4343 = vrot.lane.b32.xlu0 %v2393_v32, %s5574_s6  ;;  %v9327_v62 = vld [vmem:[#allocation194_spill] sm:$0xff]  ;;  %v9328_v14 = vld [vmem:[#allocation89_spill] sm:$0xff]  ;;  %v9330_v32 = vld [vmem:[#allocation264_spill] sm:$0xff]  ;;  %s5592_s6 = smov 87  }
 0x3fc   : > { %v2461_v19 = vrot.slane %v2447_v1, %v6929_v22  ;;  %v2495_v3 = vcombine.high %v2438_v4, %v2454_v18  ;;  %v2502_v49 = vrot.slane %v2494_v42, %v7123_v7  ;;  %v2396_v16 = vcombine.low %v2357_v48, %v2389_v61  ;;  %v9329_v31 = vld [vmem:[#allocation249_spill] sm:$0xff] }
 0x3fd   : > { %v1968_v13 = vsel %vm1868_vm0, %v9328_v14, %v9327_v62  ;;  %v7471_v21 = vsel %vm1997_vm1, %v1904_v38, %v9329_v31  ;;  %v7475_v46 = vsel %vm1997_vm1, %v1984_v28, %v7118_v45  ;;  %v2395_v56 = vcombine.high %v2350_v55, %v2382_v50  ;;  %v9335_v62 = vld [vmem:[#allocation182_spill] sm:$0xff] }
 0x3fe   : > { %v7478_v33 = vrot.slane %v2415_v41, %v6929_v22  ;;  %v2463_v18 = vcombine.high %v2406_v51, %v2422_v12  ;;  %v2470_v4 = vrot.slane %v2462_v54, %v7123_v7  ;;  %v2445_v1 = vrot.slane %v2431_v8, %v6929_v22  ;;  %4355 = vrot.lane.b32.xlu1 %v2396_v16, %s5575_s1  ;;  %v9331_v41 = vld [vmem:[#allocation223_spill] sm:$0xff]  ;;  %v9332_v54 = vld [vmem:[#allocation236_spill] sm:$0xff]  ;;  %s5593_s1 = smov 96  }
 0x3ff   : > { %v2413_v42 = vrot.slane %v2399_v34, %v6929_v22  ;;  %v7485_v38 = vsel %vm1997_vm1, %v1920_v9, %v9330_v32  ;;  %v7489_v45 = vsel %vm1997_vm1, %v1952_v23, %v7009_v58  ;;  %v7493_v50 = vsel %vm1997_vm1, %v1968_v13, %v7039_v40  ;;  %4351 = vrot.lane.b32.xlu0 %v2395_v56, %s5576_s17  ;;  %v9334_v16 = vld [vmem:[#allocation76_spill] sm:$0xff]  ;;  %s5594_s17 = smov 93  }
 0x400   : > { %v2582_v8 = vcombine.low %v7489_v45, %v7475_v46  ;;  %v2509_v55 = vrot.slane %v2495_v3, %v7123_v7  ;;  %v2510_v12 = vcombine.low %v2445_v1, %v2461_v19  ;;  %v2526_v51 = vcombine.low %v2470_v4, %v2502_v49 }
 0x401   : > { %v2001_v9 = vsel %vm1997_vm1, %v7273_v30, %v9331_v41  ;;  %v2017_v58 = vsel %vm1997_vm1, %v7390_v15, %v9332_v54  ;;  %v7506_v40 = vsel %vm1997_vm1, %v1936_v29, %v6964_v25  ;;  %v2397_v23 = vcombine.high %v2357_v48, %v2389_v61  ;;  %v9333_v30 = vld [vmem:[#allocation181_spill] sm:$0xff]  ;;  %v9337_v29 = vld [vmem:[#allocation196_spill] sm:$0xff]  ;;  %v9338_v48 = vld [vmem:[#allocation91_spill] sm:$0xff] }
 0x402   : > { %v2550_v63 = vcombine.low %v2017_v58, %v7485_v38  ;;  %v2477_v28 = vrot.slane %v2463_v18, %v7123_v7  ;;  %v2478_v34 = vcombine.low %v2413_v42, %v7478_v33  ;;  %v2566_v3 = vcombine.low %v7506_v40, %v7493_v50  ;;  %4363 = vrot.lane.b32.xlu1 %v2526_v51, %s5577_s28  ;;  %v9336_v25 = vld [vmem:[#allocation77_spill] sm:$0xff]  ;;  %v9340_v41 = vld [vmem:[#allocation92_spill] sm:$0xff]  ;;  %s5595_s28 = smov 102  }
 0x403   : > { %v7516_v15 = vsel %vm1868_vm0, %v9334_v16, %v9333_v30  ;;  %v1953_v61 = vsel %vm1868_vm0, %v9336_v25, %v9335_v62  ;;  %v7524_v14 = vsel %vm1868_vm0, %v9338_v48, %v9337_v29  ;;  %v2534_v13 = vcombine.low %v2001_v9, %v7471_v21  ;;  %4359 = vrot.lane.b32.xlu0 %v2397_v23, %s5578_s8  ;;  %v9339_v51 = vld [vmem:[#allocation197_spill] sm:$0xff]  ;;  %v9341_v30 = vld [vmem:[#allocation210_spill] sm:$0xff]  ;;  %v9343_v25 = vld [vmem:[#allocation211_spill] sm:$0xff]  ;;  %s5596_s8 = smov 99  }
 0x404   : > { %v2590_v31 = vrot.slane %v2582_v8, %v6929_v22  ;;  %v2511_v56 = vcombine.high %v2445_v1, %v2461_v19  ;;  %v2518_v18 = vrot.slane %v2510_v12, %v7123_v7  ;;  %v2528_v32 = vcombine.low %v2477_v28, %v2509_v55  ;;  %v9342_v16 = vld [vmem:[#allocation105_spill] sm:$0xff]  ;;  %v9344_v29 = vld [vmem:[#allocation106_spill] sm:$0xff] }
 0x405   : > { %v1969_v54 = vsel %vm1868_vm0, %v9340_v41, %v9339_v51  ;;  %v7535_v62 = vsel %vm1868_vm0, %v9342_v16, %v9341_v30  ;;  %v1985_v48 = vsel %vm1868_vm0, %v9344_v29, %v9343_v25  ;;  %v2527_v23 = vcombine.high %v2470_v4, %v2502_v49  ;;  %v9345_v30 = vld [vmem:[#allocation252_spill] sm:$0xff] }
 0x406   : > { %v2558_v8 = vrot.slane %v2550_v63, %v6929_v22  ;;  %v2479_v19 = vcombine.high %v2413_v42, %v7478_v33  ;;  %v2486_v1 = vrot.slane %v2478_v34, %v7123_v7  ;;  %v2574_v12 = vrot.slane %v2566_v3, %v6929_v22  ;;  %4371 = vrot.lane.b32.xlu1 %v2528_v32, %s5579_s20  ;;  %v9347_v34 = vld [vmem:[#allocation226_spill] sm:$0xff]  ;;  %s5597_s20 = smov 108   ;;  %v9452_v63 = vld [vmem:[#allocation67_spill] sm:$0xff] }
 0x407   : > { %v2535_v51 = vcombine.high %v2001_v9, %v7471_v21  ;;  %v2542_v41 = vrot.slane %v2534_v13, %v6929_v22  ;;  %v7549_v16 = vsel %vm1997_vm1, %v7422_v24, %v9345_v30  ;;  %v2583_v49 = vcombine.high %v7489_v45, %v7475_v46  ;;  %4367 = vrot.lane.b32.xlu0 %v2527_v23, %s5580_s22  ;;  %v9346_v21 = vld [vmem:[#allocation225_spill] sm:$0xff]  ;;  %v9348_v3 = vld [vmem:[#allocation238_spill] sm:$0xff]  ;;  %v9351_v23 = vld [vmem:[#allocation251_spill] sm:$0xff]  ;;  %s5598_s22 = smov 105  }
 0x408   : > { %v2630_v33 = vcombine.low %v2574_v12, %v2590_v31  ;;  %v2525_v4 = vrot.slane %v2511_v56, %v7123_v7  ;;  %v2530_v42 = vcombine.low %v2486_v1, %v2518_v18  ;;  %v7559_v9 = vsel %vm1997_vm1, %v7281_v43, %v9346_v21  ;;  %v9349_v43 = vld [vmem:[#allocation239_spill] sm:$0xff] }
 0x409   : > { %v2002_v24 = vsel %vm1997_vm1, %v7373_v37, %v9347_v34  ;;  %v2551_v46 = vcombine.high %v2017_v58, %v7485_v38  ;;  %v2529_v45 = vcombine.high %v2477_v28, %v2509_v55  ;;  %v7568_v13 = vsel %vm1997_vm1, %v7395_v20, %v9348_v3  ;;  %v9350_v58 = vld [vmem:[#allocation267_spill] sm:$0xff]  ;;  %v9353_v34 = vld [vmem:[#allocation286_spill] sm:$0xff] }
 0x40a   : > { %v2598_v56 = vcombine.low %v2542_v41, %v2558_v8  ;;  %v2493_v32 = vrot.slane %v2479_v19, %v7123_v7  ;;  %v2567_v25 = vcombine.high %v7506_v40, %v7493_v50  ;;  %4379 = vrot.lane.b32.xlu1 %v2530_v42, %s5581_s11  ;;  %v7576_v37 = vsel %vm1997_vm1, %v7405_v52, %v9349_v43  ;;  %s5599_s11 = smov 114  }
 0x40b   : > { %v2549_v38 = vrot.slane %v2535_v51, %v6929_v22  ;;  %v2670_v55 = vcombine.low %v2002_v24, %v7549_v16  ;;  %v7583_v20 = vsel %vm1997_vm1, %v7438_v57, %v9350_v58  ;;  %4375 = vrot.lane.b32.xlu0 %v2529_v45, %s5582_s9  ;;  %v2597_v50 = vrot.slane %v2583_v49, %v6929_v22  ;;  %v9355_v45 = vld [vmem:[#allocation257_spill] sm:$0xff]  ;;  %s5600_s9 = smov 111  }
 0x40c   : > { %v2631_v40 = vcombine.high %v2574_v12, %v2590_v31  ;;  %v2638_v28 = vrot.slane %v2630_v33, %v7123_v7  ;;  %v2532_v29 = vcombine.low %v2493_v32, %v2525_v4  ;;  %v7590_v52 = vsel %vm1997_vm1, %v7413_v60, %v9351_v23  ;;  %v9352_v33 = vld [vmem:[#allocation280_spill] sm:$0xff] }
 0x40d   : > { %v2565_v19 = vrot.slane %v2551_v46, %v6929_v22  ;;  %v7595_v51 = vsel %vm1997_vm1, %v1985_v48, %v7155_v35  ;;  %v2531_v57 = vcombine.high %v2486_v1, %v2518_v18  ;;  %v2599_v30 = vcombine.high %v2542_v41, %v2558_v8 }
 0x40e   : > { %v2606_v42 = vrot.slane %v2598_v56, %v7123_v7  ;;  %v2686_v31 = vcombine.low %v7576_v37, %v7583_v20  ;;  %v2581_v12 = vrot.slane %v2567_v25, %v6929_v22  ;;  %4387 = vrot.lane.b32.xlu1 %v2532_v29, %s5583_s25  ;;  %v2671_v60 = vcombine.high %v2002_v24, %v7549_v16  ;;  %s5601_s25 = smov 120  }
 0x40f   : > { %v7603_v49 = vrot.slane %v2670_v55, %v6929_v22  ;;  %v7607_v35 = vsel %vm1997_vm1, %v1953_v61, %v7015_v0  ;;  %v7611_v18 = vsel %vm1997_vm1, %v1969_v54, %v7045_v11  ;;  %4383 = vrot.lane.b32.xlu0 %v2531_v57, %s5584_s30  ;;  %v2645_v48 = vrot.slane %v2631_v40, %v7123_v7  ;;  %s5602_s30 = smov 117  }
 0x410   : > { %v2646_v8 = vcombine.low %v2581_v12, %v2597_v50  ;;  %v2718_v1 = vcombine.low %v7607_v35, %v7595_v51  ;;  %v2662_v41 = vcombine.low %v2606_v42, %v2638_v28  ;;  %v2614_v16 = vcombine.low %v2549_v38, %v2565_v19 }
 0x411   : > { %v3503_v21 = vcombine.high %v9352_v33, %v6941_v26  ;;  %v7621_v0 = vsel %vm1997_vm1, %v7454_v6, %v9353_v34  ;;  %v2533_v11 = vcombine.high %v2493_v32, %v2525_v4  ;;  %v2613_v61 = vrot.slane %v2599_v30, %v7123_v7  ;;  %v9354_v26 = vld [vmem:[#allocation258_spill] sm:$0xff] }
 0x412   : > { %v7625_v54 = vrot.slane %v2686_v31, %v6929_v22  ;;  %v2702_v24 = vcombine.low %v7621_v0, %v7611_v18  ;;  %v3535_v46 = vcombine.high %v7318_v2, %v7300_v27  ;;  %4395 = vrot.lane.b32.xlu1 %v2662_v41, %s5585_s19  ;;  %v3487_v3 = vcombine.high %v9355_v45, %v9354_v26  ;;  %v9356_v6 = vld [vmem:[#allocation266_spill] sm:$0xff]  ;;  %s5603_s19 = smov 126  }
 0x413   : > { %v2615_v56 = vcombine.high %v2549_v38, %v2565_v19  ;;  %v7636_v4 = vsel %vm1997_vm1, %v7430_v39, %v9356_v6  ;;  %v3519_v32 = vcombine.high %v7064_v10, %v7067_v17  ;;  %4391 = vrot.lane.b32.xlu0 %v2533_v11, %s5586_s29  ;;  %v2647_v25 = vcombine.high %v2581_v12, %v2597_v50  ;;  %s5604_s29 = smov 123  }
 0x414   : > { %v2654_v43 = vrot.slane %v2646_v8, %v7123_v7  ;;  %v2726_v27 = vrot.slane %v2718_v1, %v6929_v22  ;;  %v2664_v2 = vcombine.low %v2613_v61, %v2645_v48  ;;  %v7643_v55 = vrot.slane %v2671_v60, %v6929_v22 }
 0x415   : > { %v2687_v38 = vcombine.high %v7576_v37, %v7583_v20  ;;  %v7648_v39 = vrot.slane %v3503_v21, %v6929_v22  ;;  %v2663_v58 = vcombine.high %v2606_v42, %v2638_v28  ;;  %v2622_v17 = vrot.slane %v2614_v16, %v7123_v7  ;;  %v9363_v21 = vld [vmem:[#allocation284_spill] sm:$0xff] }
 0x416   : > { %v2734_v10 = vcombine.low %v7603_v49, %v7625_v54  ;;  %v2710_v50 = vrot.slane %v2702_v24, %v6929_v22  ;;  %v7655_v40 = vrot.slane %v3535_v46, %v6929_v22  ;;  %4403 = vrot.lane.b32.xlu1 %v2664_v2, %s5587_s5  ;;  %v7658_v29 = vrot.slane %v3487_v3, %v6929_v22  ;;  %s5605_s5 = smov 4  }
 0x417   : > { %v2629_v37 = vrot.slane %v2615_v56, %v7123_v7  ;;  %v2822_v20 = vcombine.low %v7568_v13, %v7636_v4  ;;  %v7664_v28 = vrot.slane %v3519_v32, %v6929_v22  ;;  %4399 = vrot.lane.b32.xlu0 %v2663_v58, %s5588_s26  ;;  %v2661_v23 = vrot.slane %v2647_v25, %v7123_v7  ;;  %s5606_s26 = smov 1  }
 0x418   : > { %v2719_v19 = vcombine.high %v7607_v35, %v7595_v51  ;;  %v2766_v57 = vcombine.low %v2710_v50, %v2726_v27  ;;  %v2666_v30 = vcombine.low %v2622_v17, %v2654_v43  ;;  %v7670_v42 = vrot.slane %v2687_v38, %v6929_v22 }
 0x419   : > { %v2735_v31 = vcombine.high %v7603_v49, %v7625_v54  ;;  %v3566_v12 = vcombine.low %v7658_v29, %v7648_v39  ;;  %v2665_v60 = vcombine.high %v2613_v61, %v2645_v48  ;;  %v7677_v8 = vrot.slane %v2734_v10, %v7123_v7  ;;  %v9359_v49 = vld [vmem:[#allocation281_spill] sm:$0xff]  ;;  %v9360_v48 = vld [vmem:[#allocation282_spill] sm:$0xff] }
 0x41a   : > { %v2703_v1 = vcombine.high %v7621_v0, %v7611_v18  ;;  %v9357_v51 = vcombine.high %v7255_v44, %v7259_v47  ;;  %v3598_v41 = vcombine.low %v7664_v28, %v7655_v40  ;;  %4411 = vrot.lane.b32.xlu1 %v2666_v30, %s5589_s27  ;;  %v9361_v16 = vcombine.high %v9359_v49, %v9360_v48  ;;  %v9364_v18 = vld [vmem:[#allocation283_spill] sm:$0xff]  ;;  %v9367_v61 = vld [vmem:[#allocation178_spill] sm:$0xff]  ;;  %v9368_v54 = vld [vmem:[#allocation73_spill] sm:$0xff]  ;;  %s5607_s27 = smov 10  }
 0x41b   : > { %v9365_v34 = vcombine.low %v9363_v21, %v9364_v18  ;;  %v7704_v11 = vsel %vm1997_vm1, %v7535_v62, %v7126_v59  ;;  %v9369_v24 = vcombine.low %v9367_v61, %v9368_v54  ;;  %4407 = vrot.lane.b32.xlu0 %v2665_v60, %s5590_s4  ;;  %v2733_v26 = vrot.slane %v2719_v19, %v6929_v22  ;;  %v9376_v19 = vld [vmem:[#allocation304_spill] sm:$0xff]  ;;  %s5608_s4 = smov 7  }
 0x41c   : > { %v7685_v35 = vrot.slane %v9357_v51, %v7123_v7  ;;  %v7693_v33 = vrot.slane %v9361_v16, %v7123_v7  ;;  %v2767_v45 = vcombine.high %v2710_v50, %v2726_v27  ;;  %v2774_v3 = vrot.slane %v2766_v57, %v7123_v7  ;;  %v9375_v27 = vld [vmem:[#allocation295_spill] sm:$0xff] }
 0x41d   : > { %v7699_v0 = vrot.slane %v9365_v34, %v7123_v7  ;;  %v7710_v46 = vrot.slane %v9369_v24, %v7123_v7  ;;  %v2668_v56 = vcombine.low %v2629_v37, %v2661_v23  ;;  %v9371_v6 = vcombine.high %v9363_v21, %v9364_v18  ;;  %v9437_v21 = vld [vmem:[#allocation129_spill] sm:$0xff] }
 0x41e   : > { %9358 = vst [vmem:[#allocation185_spill] sm:$0xff] %v7685_v35  ;;  %9362 = vst [vmem:[#allocation80_spill] sm:$0xff] %v7693_v33  ;;  %v7721_v62 = vrot.slane %v3566_v12, %v7123_v7  ;;  %v9373_v32 = vcombine.high %v9367_v61, %v9368_v54  ;;  %v2667_v2 = vcombine.high %v2622_v17, %v2654_v43  ;;  %v9414_v54 = vld [vmem:[#allocation212_spill] sm:$0xff]  ;;  %v9445_v17 = vld [vmem:[#allocation139_spill] sm:$0xff] }
 0x41f   : > { %9366 = vst [vmem:[#allocation193_spill] sm:$0xff] %v7699_v0  ;;  %9370 = vst [vmem:[#allocation88_spill] sm:$0xff] %v7710_v46  ;;  %v7718_v59 = vrot.slane %v9371_v6, %v7123_v7  ;;  %v7732_v38 = vsel %vm1997_vm1, %v7516_v15, %v9375_v27  ;;  %v2717_v58 = vrot.slane %v2703_v1, %v6929_v22  ;;  %4419 = vrot.lane.b32.xlu1 %v2668_v56, %s5591_s7  ;;  %v9377_v1 = vld [vmem:[#allocation285_spill] sm:$0xff]  ;;  %v9379_v27 = vld [vmem:[#allocation18_spill] sm:$0xff]  ;;  %s5609_s7 = smov 16  }
 0x420   : > { %v7727_v25 = vrot.slane %v9373_v32, %v7123_v7  ;;  %v7736_v10 = vrot.slane %v3598_v41, %v7123_v7  ;;  %v7743_v57 = vsel %vm1997_vm1, %v7524_v14, %v9376_v19  ;;  %v2854_v43 = vcombine.low %v7732_v38, %v7704_v11  ;;  %4415 = vrot.lane.b32.xlu0 %v2667_v2, %s5592_s6  ;;  %v9380_v19 = vld [vmem:[#allocation135_spill] sm:$0xff]  ;;  %s5610_s6 = smov 13   ;;  %v7990_v14 = vpop.permute.xlu0 %1854  ;;  %v9447_v15 = vld [vmem:[#allocation148_spill] sm:$0xff] }
 0x421   : > { %9372 = vst [vmem:[#allocation263_spill] sm:$0xff] %v7718_v59  ;;  %v2781_v30 = vrot.slane %v2767_v45, %v7123_v7  ;;  %v2782_v12 = vcombine.low %v2717_v58, %v2733_v26  ;;  %v2798_v60 = vcombine.low %v7677_v8, %v2774_v3  ;;  %v2067_v51 = vsel %vm1997_vm1, %v7446_v53, %v9377_v1  ;;  %v9383_v1 = vld [vmem:[#allocation42_spill] sm:$0xff]  ;;  %v9462_v59 = vld [vmem:[#allocation255_spill] sm:$0xff] }
 0x422   : > { %9374 = vst [vmem:[#allocation248_spill] sm:$0xff] %v7727_v25  ;;  %v2669_v41 = vcombine.high %v2629_v37, %v2661_v23  ;;  %v2749_v18 = vrot.slane %v2735_v31, %v7123_v7  ;;  %v2750_v34 = vcombine.low %v7643_v55, %v7670_v42  ;;  %v2838_v61 = vcombine.low %v2067_v51, %v7743_v57 }
 0x423   : > { %4427 = vrot.lane.b32.xlu1 %v2798_v60, %s5593_s1  ;;  %v2806_v53 = vcombine.low %v7559_v9, %v7590_v52  ;;  %v2862_v37 = vrot.slane %v2854_v43, %v6929_v22  ;;  %v2783_v23 = vcombine.high %v2717_v58, %v2733_v26  ;;  %v2790_v31 = vrot.slane %v2782_v12, %v7123_v7  ;;  %v9378_v26 = vld [vmem:[#allocation123_spill] sm:$0xff]  ;;  %v9381_v43 = vld [vmem:[#allocation30_spill] sm:$0xff]  ;;  %s5611_s1 = smov 22  }
 0x424   : > { %4423 = vrot.lane.b32.xlu0 %v2669_v41, %s5594_s17  ;;  %v2800_v24 = vcombine.low %v2749_v18, %v2781_v30  ;;  %v2799_v45 = vcombine.high %v7677_v8, %v2774_v3  ;;  %v2830_v56 = vrot.slane %v2822_v20, %v6929_v22  ;;  %v2751_v6 = vcombine.high %v7643_v55, %v7670_v42  ;;  %v9382_v60 = vld [vmem:[#allocation147_spill] sm:$0xff]  ;;  %s5612_s17 = smov 19  }
 0x425   : > { %v2758_v32 = vrot.slane %v2750_v34, %v7123_v7  ;;  %v2846_v2 = vrot.slane %v2838_v61, %v6929_v22  ;;  %v1875_v58 = vsel %vm1868_vm0, %v9379_v27, %v9378_v26  ;;  %v2814_v8 = vrot.slane %v2806_v53, %v6929_v22  ;;  %v9386_v27 = vld [vmem:[#allocation171_spill] sm:$0xff] }
 0x426   : > { %v2855_v20 = vcombine.high %v7732_v38, %v7704_v11  ;;  %v2797_v55 = vrot.slane %v2783_v23, %v7123_v7  ;;  %v1891_v12 = vsel %vm1868_vm0, %v9381_v43, %v9380_v19  ;;  %v1907_v41 = vsel %vm1868_vm0, %v9383_v1, %v9382_v60  ;;  %v9387_v19 = vld [vmem:[#allocation66_spill] sm:$0xff]  ;;  %v9392_v60 = vld [vmem:[#allocation199_spill] sm:$0xff] }
 0x427   : > { %4435 = vrot.lane.b32.xlu1 %v2800_v24, %s5595_s28  ;;  %v2902_v3 = vcombine.low %v2846_v2, %v2862_v37  ;;  %v2802_v42 = vcombine.low %v2758_v32, %v2790_v31  ;;  %v2807_v34 = vcombine.high %v7559_v9, %v7590_v52  ;;  %v2801_v61 = vcombine.high %v2749_v18, %v2781_v30  ;;  %v9384_v24 = vld [vmem:[#allocation159_spill] sm:$0xff]  ;;  %v9388_v9 = vld [vmem:[#allocation184_spill] sm:$0xff]  ;;  %v9393_v1 = vld [vmem:[#allocation94_spill] sm:$0xff]  ;;  %s5613_s28 = smov 28  }
 0x428   : > { %4431 = vrot.lane.b32.xlu0 %v2799_v45, %s5596_s8  ;;  %v2823_v53 = vcombine.high %v7568_v13, %v7636_v4  ;;  %v2870_v11 = vcombine.low %v2814_v8, %v2830_v56  ;;  %v2765_v38 = vrot.slane %v2751_v6, %v7123_v7  ;;  %v2839_v23 = vcombine.high %v2067_v51, %v7743_v57  ;;  %v9385_v45 = vld [vmem:[#allocation54_spill] sm:$0xff]  ;;  %v9389_v52 = vld [vmem:[#allocation79_spill] sm:$0xff]  ;;  %v9390_v13 = vld [vmem:[#allocation213_spill] sm:$0xff]  ;;  %s5614_s8 = smov 25  }
 0x429   : > { %v1923_v26 = vsel %vm1868_vm0, %v9385_v45, %v9384_v24  ;;  %v1939_v43 = vsel %vm1868_vm0, %v9387_v19, %v9386_v27  ;;  %v1955_v30 = vsel %vm1868_vm0, %v9389_v52, %v9388_v9  ;;  %v9391_v4 = vld [vmem:[#allocation108_spill] sm:$0xff]  ;;  %v2869_v57 = vrot.slane %v2855_v20, %v6929_v22  ;;  %v9394_v27 = vld [vmem:[#allocation95_spill] sm:$0xff] }
 0x42a   : > { %v1987_v18 = vsel %vm1868_vm0, %v9391_v4, %v9390_v13  ;;  %v2903_v51 = vcombine.high %v2846_v2, %v2862_v37  ;;  %v2910_v6 = vrot.slane %v2902_v3, %v7123_v7  ;;  %v1971_v24 = vsel %vm1868_vm0, %v9393_v1, %v9392_v60  ;;  %v9395_v2 = vld [vmem:[#allocation254_spill] sm:$0xff]  ;;  %v9396_v13 = vld [vmem:[#allocation269_spill] sm:$0xff] }
 0x42b   : > { %4443 = vrot.lane.b32.xlu1 %v2802_v42, %s5597_s20  ;;  %v2804_v42 = vcombine.low %v2765_v38, %v2797_v55  ;;  %v2821_v45 = vrot.slane %v2807_v34, %v6929_v22  ;;  %v7820_v19 = vsel %vm1997_vm1, %v1987_v18, %v9394_v27  ;;  %v2803_v9 = vcombine.high %v2758_v32, %v2790_v31  ;;  %v9397_v4 = vld [vmem:[#allocation297_spill] sm:$0xff]  ;;  %v9398_v32 = vld [vmem:[#allocation306_spill] sm:$0xff]  ;;  %s5615_s20 = smov 34  }
 0x42c   : > { %4439 = vrot.lane.b32.xlu0 %v2801_v61, %s5598_s22  ;;  %v2837_v52 = vrot.slane %v2823_v53, %v6929_v22  ;;  %v2871_v61 = vcombine.high %v2814_v8, %v2830_v56  ;;  %v2878_v20 = vrot.slane %v2870_v11, %v7123_v7  ;;  %v2853_v37 = vrot.slane %v2839_v23, %v6929_v22  ;;  %v9399_v23 = vld [vmem:[#allocation228_spill] sm:$0xff]  ;;  %s5616_s22 = smov 31  }
 0x42d   : > { %v7827_v3 = vsel %vm1997_vm1, %v1907_v41, %v9395_v2  ;;  %v7831_v34 = vsel %vm1997_vm1, %v1923_v26, %v9396_v13  ;;  %v2084_v31 = vsel %vm1997_vm1, %v1955_v30, %v9397_v4  ;;  %v7837_v56 = vsel %vm1997_vm1, %v1971_v24, %v9398_v32  ;;  %v9400_v26 = vld [vmem:[#allocation241_spill] sm:$0xff]  ;;  %v9401_v30 = vld [vmem:[#allocation288_spill] sm:$0xff] }
 0x42e   : > { %v2917_v8 = vrot.slane %v2903_v51, %v7123_v7  ;;  %v2918_v53 = vcombine.low %v2853_v37, %v2869_v57  ;;  %v2990_v11 = vcombine.low %v2084_v31, %v7820_v19  ;;  %v2934_v41 = vcombine.low %v2878_v20, %v2910_v6 }
 0x42f   : > { %4451 = vrot.lane.b32.xlu1 %v2804_v42, %s5599_s11  ;;  %v7843_v18 = vsel %vm1997_vm1, %v1875_v58, %v9399_v23  ;;  %v2020_v42 = vsel %vm1997_vm1, %v1891_v12, %v9400_v26  ;;  %v2068_v60 = vsel %vm1997_vm1, %v1939_v43, %v9401_v30  ;;  %v2805_v1 = vcombine.high %v2765_v38, %v2797_v55  ;;  %v9403_v23 = vld [vmem:[#allocation17_spill] sm:$0xff]  ;;  %v9406_v30 = vld [vmem:[#allocation146_spill] sm:$0xff]  ;;  %s5617_s11 = smov 40  }
 0x430   : > { %4447 = vrot.lane.b32.xlu0 %v2803_v9, %s5600_s9  ;;  %v2885_v24 = vrot.slane %v2871_v61, %v7123_v7  ;;  %v2886_v27 = vcombine.low %v2821_v45, %v2837_v52  ;;  %v2958_v51 = vcombine.low %v2020_v42, %v7831_v34  ;;  %v2974_v9 = vcombine.low %v2068_v60, %v7837_v56  ;;  %s5618_s9 = smov 37  }
 0x431   : > { %v2942_v58 = vcombine.low %v7843_v18, %v7827_v3  ;;  %v2919_v2 = vcombine.high %v2853_v37, %v2869_v57  ;;  %v2926_v12 = vrot.slane %v2918_v53, %v7123_v7  ;;  %v2998_v43 = vrot.slane %v2990_v11, %v6929_v22  ;;  %v9405_v53 = vld [vmem:[#allocation29_spill] sm:$0xff] }
 0x432   : > { %v2936_v55 = vcombine.low %v2885_v24, %v2917_v8  ;;  %v2935_v38 = vcombine.high %v2878_v20, %v2910_v6  ;;  %v2887_v61 = vcombine.high %v2821_v45, %v2837_v52  ;;  %v2894_v13 = vrot.slane %v2886_v27, %v7123_v7  ;;  %v9404_v20 = vld [vmem:[#allocation134_spill] sm:$0xff] }
 0x433   : > { %4459 = vrot.lane.b32.xlu1 %v2934_v41, %s5601_s25  ;;  %v2966_v4 = vrot.slane %v2958_v51, %v6929_v22  ;;  %v2982_v32 = vrot.slane %v2974_v9, %v6929_v22  ;;  %v9402_v41 = vld [vmem:[#allocation122_spill] sm:$0xff]  ;;  %v2950_v57 = vrot.slane %v2942_v58, %v6929_v22  ;;  %v2933_v37 = vrot.slane %v2919_v2, %v7123_v7  ;;  %v9409_v9 = vld [vmem:[#allocation53_spill] sm:$0xff]  ;;  %s5619_s25 = smov 46  }
 0x434   : > { %4455 = vrot.lane.b32.xlu0 %v2805_v1, %s5602_s30  ;;  %v1876_v26 = vsel %vm1868_vm0, %v9403_v23, %v9402_v41  ;;  %v2991_v6 = vcombine.high %v2084_v31, %v7820_v19  ;;  %v2938_v52 = vcombine.low %v2894_v13, %v2926_v12  ;;  %v1892_v11 = vsel %vm1868_vm0, %v9405_v53, %v9404_v20  ;;  %v9407_v1 = vld [vmem:[#allocation41_spill] sm:$0xff]  ;;  %v9408_v51 = vld [vmem:[#allocation158_spill] sm:$0xff]  ;;  %v9412_v53 = vld [vmem:[#allocation183_spill] sm:$0xff]  ;;  %s5620_s30 = smov 43  }
 0x435   : > { %v3038_v45 = vcombine.low %v2982_v32, %v2998_v43  ;;  %v1908_v27 = vsel %vm1868_vm0, %v9407_v1, %v9406_v30  ;;  %v1924_v58 = vsel %vm1868_vm0, %v9409_v9, %v9408_v51  ;;  %v2959_v2 = vcombine.high %v2020_v42, %v7831_v34  ;;  %v9410_v41 = vld [vmem:[#allocation170_spill] sm:$0xff]  ;;  %v9411_v23 = vld [vmem:[#allocation65_spill] sm:$0xff]  ;;  %v9415_v51 = vld [vmem:[#allocation107_spill] sm:$0xff] }
 0x436   : > { %v3006_v19 = vcombine.low %v2950_v57, %v2966_v4  ;;  %v2975_v31 = vcombine.high %v2068_v60, %v7837_v56  ;;  %v1940_v20 = vsel %vm1868_vm0, %v9411_v23, %v9410_v41  ;;  %v9413_v30 = vld [vmem:[#allocation78_spill] sm:$0xff]  ;;  %v2943_v34 = vcombine.high %v7843_v18, %v7827_v3  ;;  %v9418_v41 = vld [vmem:[#allocation253_spill] sm:$0xff] }
 0x437   : > { %4467 = vrot.lane.b32.xlu1 %v2936_v55, %s5603_s19  ;;  %v2937_v55 = vcombine.high %v2885_v24, %v2917_v8  ;;  %v1956_v1 = vsel %vm1868_vm0, %v9413_v30, %v9412_v53  ;;  %v1988_v8 = vsel %vm1868_vm0, %v9415_v51, %v9414_v54  ;;  %v7889_v56 = vrot.slane %v2991_v6, %v6929_v22  ;;  %v9419_v54 = vld [vmem:[#allocation313_spill] sm:$0xff]  ;;  %v9420_v53 = vld [vmem:[#allocation268_spill] sm:$0xff]  ;;  %s5621_s19 = smov 52  }
 0x438   : > { %4463 = vrot.lane.b32.xlu0 %v2935_v38, %s5604_s29  ;;  %v2901_v38 = vrot.slane %v2887_v61, %v7123_v7  ;;  %v3039_v42 = vcombine.high %v2982_v32, %v2998_v43  ;;  %v3046_v60 = vrot.slane %v3038_v45, %v7123_v7  ;;  %v9416_v61 = vld [vmem:[#allocation198_spill] sm:$0xff]  ;;  %v7897_v23 = vsel %vm1997_vm1, %v1908_v27, %v9418_v41  ;;  %v9421_v30 = vld [vmem:[#allocation296_spill] sm:$0xff]  ;;  %s5622_s29 = smov 49  }
 0x439   : > { %v7901_v3 = vsel %vm1997_vm1, %v1988_v8, %v9419_v54  ;;  %v2939_v18 = vcombine.high %v2894_v13, %v2926_v12  ;;  %v7904_v6 = vrot.slane %v2959_v2, %v6929_v22  ;;  %v3007_v43 = vcombine.high %v2950_v57, %v2966_v4  ;;  %v9422_v12 = vld [vmem:[#allocation305_spill] sm:$0xff]  ;;  %v9424_v8 = vld [vmem:[#allocation240_spill] sm:$0xff] }
 0x43a   : > { %v2940_v24 = vcombine.low %v2901_v38, %v2933_v37  ;;  %v3014_v32 = vrot.slane %v3006_v19, %v7123_v7  ;;  %v2989_v45 = vrot.slane %v2975_v31, %v6929_v22  ;;  %v7911_v27 = vsel %vm1997_vm1, %v1924_v58, %v9420_v53  ;;  %v7925_v19 = vpop.permute.xlu1 %1850  ;;  %v9423_v31 = vld [vmem:[#allocation227_spill] sm:$0xff]  ;;  %v9426_v54 = vld [vmem:[#allocation124_spill] sm:$0xff] }
 0x43b   : > { %4475 = vrot.lane.b32.xlu1 %v2938_v52, %s5605_s5  ;;  %v9417_v52 = vld [vmem:[#allocation93_spill] sm:$0xff]  ;;  %v7915_v51 = vsel %vm1997_vm1, %v1956_v1, %v9421_v30  ;;  %v3053_v57 = vrot.slane %v3039_v42, %v7123_v7  ;;  %v7929_v1 = vsel %vm1997_vm1, %v1876_v26, %v9423_v31  ;;  %v9429_v53 = vld [vmem:[#allocation20_spill] sm:$0xff]  ;;  %s5623_s5 = smov 58  }
 0x43c   : > { %4471 = vrot.lane.b32.xlu0 %v2937_v55, %s5606_s26  ;;  %v1972_v9 = vsel %vm1868_vm0, %v9417_v52, %v9416_v61  ;;  %v2957_v55 = vrot.slane %v2943_v34, %v6929_v22  ;;  %v3126_v4 = vcombine.low %v7915_v51, %v7901_v3  ;;  %v3054_v2 = vcombine.low %v2989_v45, %v7889_v56  ;;  %v9431_v30 = vld [vmem:[#allocation21_spill] sm:$0xff]  ;;  %s5624_s26 = smov 55  }
 0x43d   : > { %v7919_v13 = vsel %vm1997_vm1, %v1972_v9, %v9422_v12  ;;  %v3070_v58 = vcombine.low %v3014_v32, %v3046_v60  ;;  %v7933_v34 = vsel %vm1997_vm1, %v1892_v11, %v9424_v8  ;;  %v2941_v52 = vcombine.high %v2901_v38, %v2933_v37  ;;  %v9427_v11 = vld [vmem:[#allocation19_spill] sm:$0xff]  ;;  %v9430_v38 = vld [vmem:[#allocation126_spill] sm:$0xff] }
 0x43e   : > { %v3094_v42 = vcombine.low %v7933_v34, %v7911_v27  ;;  %v3021_v9 = vrot.slane %v3007_v43, %v7123_v7  ;;  %v3022_v41 = vcombine.low %v2957_v55, %v7904_v6  ;;  %v7958_v43 = vsel %vm1868_vm0, %v9431_v30, %v9430_v38  ;;  %v9435_v38 = vld [vmem:[#allocation23_spill] sm:$0xff] }
 0x43f   : > { %4483 = vrot.lane.b32.xlu1 %v2940_v24, %s5607_s27  ;;  %v9425_v24 = vld [vmem:[#allocation287_spill] sm:$0xff]  ;;  %v3078_v12 = vcombine.low %v7929_v1, %v7897_v23  ;;  %v3055_v31 = vcombine.high %v2989_v45, %v7889_v56  ;;  %v3062_v8 = vrot.slane %v3054_v2, %v7123_v7  ;;  %v3071_v16 = vcombine.high %v3014_v32, %v3046_v60  ;;  %v9441_v60 = vld [vmem:[#allocation137_spill] sm:$0xff]  ;;  %v9442_v32 = vld [vmem:[#allocation32_spill] sm:$0xff]  ;;  %s5625_s27 = smov 64  }
 0x440   : > { %4479 = vrot.lane.b32.xlu0 %v2939_v18, %s5608_s4  ;;  %v7937_v61 = vsel %vm1997_vm1, %v1940_v20, %v9425_v24  ;;  %v7948_v18 = vsel %vm1868_vm0, %v9427_v11, %v9426_v54  ;;  %v9428_v20 = vld [vmem:[#allocation125_spill] sm:$0xff]  ;;  %v3072_v24 = vcombine.low %v3021_v9, %v3053_v57  ;;  %v9432_v54 = vld [vmem:[#allocation127_spill] sm:$0xff]  ;;  %v9433_v11 = vld [vmem:[#allocation22_spill] sm:$0xff]  ;;  %v7983_v56 = vrot.slane %v3094_v42, %v6929_v22  ;;  %s5626_s4 = smov 61  }
 0x441   : > { %v3110_v26 = vcombine.low %v7937_v61, %v7919_v13  ;;  %v7953_v37 = vsel %vm1868_vm0, %v9429_v53, %v9428_v20  ;;  %v7970_v20 = vsel %vm1868_vm0, %v9433_v11, %v9432_v54  ;;  %v9434_v53 = vld [vmem:[#allocation128_spill] sm:$0xff]  ;;  %v3023_v45 = vcombine.high %v2957_v55, %v7904_v6  ;;  %v7988_v11 = vpop.permute.xlu1 %1858  ;;  %v9443_v6 = vld [vmem:[#allocation138_spill] sm:$0xff]  ;;  %v9444_v55 = vld [vmem:[#allocation33_spill] sm:$0xff] }
 0x442   : > { %v7975_v30 = vsel %vm1868_vm0, %v9435_v38, %v9434_v53  ;;  %v3030_v2 = vrot.slane %v3022_v41, %v7123_v7  ;;  %v9439_v53 = vld [vmem:[#allocation136_spill] sm:$0xff]  ;;  %v9440_v38 = vld [vmem:[#allocation31_spill] sm:$0xff]  ;;  %v7998_v42 = vsel %vm1868_vm0, %v9442_v32, %v9441_v60  ;;  %v8003_v41 = vsel %vm1868_vm0, %v9444_v55, %v9443_v6  ;;  %v9446_v60 = vld [vmem:[#allocation34_spill] sm:$0xff] }
 0x443   : > { %4491 = vrot.lane.b32.xlu1 %v3070_v58, %s5609_s7  ;;  %v7963_v58 = vrot.slane %v3126_v4, %v6929_v22  ;;  %9436 = vst [vmem:[#allocation117_spill] sm:$0xff] %v7975_v30  ;;  %v3118_v54 = vrot.slane %v3110_v26, %v6929_v22  ;;  %v3086_v26 = vrot.slane %v3078_v12, %v6929_v22  ;;  %v9448_v6 = vld [vmem:[#allocation43_spill] sm:$0xff]  ;;  %s5627_s7 = smov 70  }
 0x444   : > { %4487 = vrot.lane.b32.xlu0 %v2941_v52, %s5610_s6  ;;  %v9438_v52 = vld [vmem:[#allocation24_spill] sm:$0xff]  ;;  %v8013_v32 = vsel %vm1868_vm0, %v9446_v60, %v9445_v17  ;;  %v1909_v55 = vsel %vm1868_vm0, %v9448_v6, %v9447_v15  ;;  %v3073_v12 = vcombine.high %v3021_v9, %v3053_v57  ;;  %v3111_v50 = vcombine.high %v7937_v61, %v7919_v13  ;;  %v9450_v60 = vld [vmem:[#allocation55_spill] sm:$0xff]  ;;  %v9453_v57 = vld [vmem:[#allocation186_spill] sm:$0xff]  ;;  %s5628_s6 = smov 67  }
 0x445   : > { %v7980_v4 = vsel %vm1868_vm0, %v9438_v52, %v9437_v21  ;;  %v1893_v21 = vsel %vm1868_vm0, %v9440_v38, %v9439_v53  ;;  %v3174_v52 = vcombine.low %v3118_v54, %v7963_v58  ;;  %v3069_v53 = vrot.slane %v3055_v31, %v7123_v7  ;;  %v9449_v17 = vld [vmem:[#allocation160_spill] sm:$0xff]  ;;  %v9456_v9 = vld [vmem:[#allocation110_spill] sm:$0xff] }
 0x446   : > { %v3074_v38 = vcombine.low %v3030_v2, %v3062_v8  ;;  %v3037_v31 = vrot.slane %v3023_v45, %v7123_v7  ;;  %v1925_v15 = vsel %vm1868_vm0, %v9450_v60, %v9449_v17  ;;  %v9451_v6 = vld [vmem:[#allocation172_spill] sm:$0xff]  ;;  %v3175_v61 = vcombine.high %v3118_v54, %v7963_v58  ;;  %v8043_v17 = vpop.permute.xlu1 %1866 }
 0x447   : > { %4499 = vrot.lane.b32.xlu1 %v3072_v24, %s5611_s1  ;;  %v3127_v24 = vcombine.high %v7915_v51, %v7901_v3  ;;  %v3095_v3 = vcombine.high %v7933_v34, %v7911_v27  ;;  %v3142_v51 = vcombine.low %v3086_v26, %v7983_v56  ;;  %v9455_v34 = vld [vmem:[#allocation215_spill] sm:$0xff]  ;;  %9457 = vst [vmem:[#allocation14_spill] sm:$0xff] %v8043_v17  ;;  %s5629_s1 = smov 76  }
 0x448   : > { %4495 = vrot.lane.b32.xlu0 %v3071_v16, %s5612_s17  ;;  %v3079_v16 = vcombine.high %v7929_v1, %v7897_v23  ;;  %v1941_v23 = vsel %vm1868_vm0, %v9452_v63, %v9451_v6  ;;  %v9454_v1 = vld [vmem:[#allocation81_spill] sm:$0xff]  ;;  %v1989_v45 = vsel %vm1868_vm0, %v9456_v9, %v9455_v34  ;;  %v8045_v63 = vpop.permute.xlu0 %1862  ;;  %v3076_v60 = vcombine.low %v3037_v31, %v3069_v53  ;;  %s5630_s17 = smov 73  }
 0x449   : > { %v1957_v27 = vsel %vm1868_vm0, %v9454_v1, %v9453_v57  ;;  %v8039_v13 = vrot.slane %v3127_v24, %v6929_v22  ;;  %9458 = vst [vmem:[#allocation235_spill] sm:$0xff] %v8045_v63  ;;  %v9459_v6 = vld [vmem:[#allocation201_spill] sm:$0xff]  ;;  %v9460_v57 = vld [vmem:[#allocation96_spill] sm:$0xff]  ;;  %v3075_v9 = vcombine.high %v3030_v2, %v3062_v8  ;;  %v3109_v58 = vrot.slane %v3095_v3, %v6929_v22  ;;  %v9465_v2 = vld [vmem:[#allocation307_spill] sm:$0xff] }
 0x44a   : > { %v1973_v1 = vsel %vm1868_vm0, %v9460_v57, %v9459_v6  ;;  %v8051_v34 = vrot.slane %v3079_v16, %v6929_v22  ;;  %v3143_v54 = vcombine.high %v3086_v26, %v7983_v56  ;;  %v3125_v25 = vrot.slane %v3111_v50, %v6929_v22  ;;  %v9463_v16 = vld [vmem:[#allocation270_spill] sm:$0xff]  ;;  %v9485_v63 = vld [vmem:[#allocation48_spill] sm:$0xff] }
 0x44b   : > { %4507 = vrot.lane.b32.xlu1 %v3074_v38, %s5613_s28  ;;  %v3182_v38 = vrot.slane %v3174_v52, %v7123_v7  ;;  %v3150_v52 = vrot.slane %v3142_v51, %v7123_v7  ;;  %v8063_v6 = vsel %vm1997_vm1, %v1909_v55, %v9462_v59  ;;  %v8067_v57 = vsel %vm1997_vm1, %v1925_v15, %v9463_v16  ;;  %v9466_v15 = vld [vmem:[#allocation229_spill] sm:$0xff]  ;;  %s5631_s28 = smov 82  }
 0x44c   : > { %4503 = vrot.lane.b32.xlu0 %v3073_v12, %s5614_s8  ;;  %v9461_v12 = vld [vmem:[#allocation109_spill] sm:$0xff]  ;;  %v8075_v56 = vsel %vm1997_vm1, %v1973_v1, %v9465_v2  ;;  %v3189_v50 = vrot.slane %v3175_v61, %v7123_v7  ;;  %v3190_v26 = vcombine.low %v3125_v25, %v8039_v13  ;;  %v3157_v16 = vrot.slane %v3143_v54, %v7123_v7  ;;  %v9476_v54 = vld [vmem:[#allocation44_spill] sm:$0xff]  ;;  %s5632_s8 = smov 79  }
 0x44d   : > { %v8055_v24 = vsel %vm1997_vm1, %v1989_v45, %v9461_v12  ;;  %v9464_v45 = vld [vmem:[#allocation298_spill] sm:$0xff]  ;;  %v3206_v55 = vcombine.low %v3150_v52, %v3182_v38  ;;  %v9468_v12 = vld [vmem:[#allocation289_spill] sm:$0xff]  ;;  %v3207_v17 = vcombine.high %v3150_v52, %v3182_v38 }
 0x44e   : > { %v8071_v8 = vsel %vm1997_vm1, %v1957_v27, %v9464_v45  ;;  %v8086_v27 = vsel %vm1997_vm1, %v7948_v18, %v9466_v15  ;;  %v8094_v61 = vsel %vm1997_vm1, %v1941_v23, %v9468_v12  ;;  %v3158_v45 = vcombine.low %v8051_v34, %v3109_v58  ;;  %v9469_v15 = vld [vmem:[#allocation140_spill] sm:$0xff]  ;;  %v9472_v23 = vld [vmem:[#allocation141_spill] sm:$0xff] }
 0x44f   : > { %4515 = vrot.lane.b32.xlu1 %v3076_v60, %s5615_s20  ;;  %v3262_v59 = vcombine.low %v8071_v8, %v8055_v24  ;;  %v9467_v60 = vld [vmem:[#allocation242_spill] sm:$0xff]  ;;  %v3246_v18 = vcombine.low %v8094_v61, %v8075_v56  ;;  %v9473_v12 = vld [vmem:[#allocation36_spill] sm:$0xff]  ;;  %v3214_v0 = vcombine.low %v8086_v27, %v8063_v6  ;;  %v3208_v35 = vcombine.low %v3157_v16, %v3189_v50  ;;  %s5633_s20 = smov 88  }
 0x450   : > { %4511 = vrot.lane.b32.xlu0 %v3075_v9, %s5616_s22  ;;  %v8081_v3 = vpop.permute.xlu1 %4307  ;;  %v4304_v51 = vpop.permute.xlu0 %4303  ;;  %v8090_v1 = vsel %vm1997_vm1, %v1893_v21, %v9467_v60  ;;  %v3077_v9 = vcombine.high %v3037_v31, %v3069_v53  ;;  %v9470_v21 = vld [vmem:[#allocation35_spill] sm:$0xff]  ;;  %v8110_v53 = vsel %vm1868_vm0, %v9473_v12, %v9472_v23  ;;  %v9475_v31 = vld [vmem:[#allocation149_spill] sm:$0xff]  ;;  %v9477_v23 = vld [vmem:[#allocation150_spill] sm:$0xff]  ;;  %s5634_s22 = smov 85  }
 0x451   : > { %v3230_v2 = vcombine.low %v8090_v1, %v8067_v57  ;;  %v8105_v60 = vsel %vm1868_vm0, %v9470_v21, %v9469_v15  ;;  %9474 = vst [vmem:[#allocation118_spill] sm:$0xff] %v8110_v53  ;;  %v8115_v46 = vsel %vm1868_vm0, %v9476_v54, %v9475_v31  ;;  %v3198_v15 = vrot.slane %v3190_v26, %v7123_v7  ;;  %v9478_v12 = vld [vmem:[#allocation45_spill] sm:$0xff]  ;;  %v9479_v31 = vld [vmem:[#allocation151_spill] sm:$0xff]  ;;  %v9480_v54 = vld [vmem:[#allocation46_spill] sm:$0xff] }
 0x452   : > { %9471 = vst [vmem:[#allocation222_spill] sm:$0xff] %v8105_v60  ;;  %v8122_v21 = vrot.slane %v3262_v59, %v6929_v22  ;;  %v8127_v33 = vsel %vm1868_vm0, %v9478_v12, %v9477_v23  ;;  %v8132_v30 = vsel %vm1868_vm0, %v9480_v54, %v9479_v31  ;;  %v3166_v59 = vrot.slane %v3158_v45, %v7123_v7  ;;  %v9484_v54 = vld [vmem:[#allocation153_spill] sm:$0xff]  ;;  %v9543_v53 = vld [vmem:[#allocation111_spill] sm:$0xff] }
 0x453   : > { %4523 = vrot.lane.b32.xlu1 %v3206_v55, %s5617_s11  ;;  %v3191_v55 = vcombine.high %v3125_v25, %v8039_v13  ;;  %v9481_v25 = vld [vmem:[#allocation152_spill] sm:$0xff]  ;;  %v9482_v13 = vld [vmem:[#allocation47_spill] sm:$0xff]  ;;  %v8142_v60 = vrot.slane %v3230_v2, %v6929_v22  ;;  %v3254_v23 = vrot.slane %v3246_v18, %v6929_v22  ;;  %v8148_v38 = vsel %vm1868_vm0, %v9485_v63, %v9484_v54  ;;  %v9489_v63 = vld [vmem:[#allocation162_spill] sm:$0xff]  ;;  %s5635_s11 = smov 94  }
 0x454   : > { %4519 = vrot.lane.b32.xlu0 %v3077_v9, %s5618_s9  ;;  %v3159_v9 = vcombine.high %v8051_v34, %v3109_v58  ;;  %v8138_v26 = vsel %vm1868_vm0, %v9482_v13, %v9481_v25  ;;  %v4316_v12 = vpop.permute.xlu1 %4315  ;;  %v4312_v31 = vpop.permute.xlu0 %4311  ;;  %9486 = vst [vmem:[#allocation119_spill] sm:$0xff] %v8148_v38  ;;  %v9487_v34 = vld [vmem:[#allocation161_spill] sm:$0xff]  ;;  %v9488_v58 = vld [vmem:[#allocation56_spill] sm:$0xff]  ;;  %v3222_v45 = vrot.slane %v3214_v0, %v6929_v22  ;;  %s5636_s9 = smov 91  }
 0x455   : > { %9483 = vst [vmem:[#allocation13_spill] sm:$0xff] %v8138_v26  ;;  %v8153_v52 = vsel %vm1868_vm0, %v9488_v58, %v9487_v34  ;;  %v3205_v2 = vrot.slane %v3191_v55, %v7123_v7  ;;  %v3310_v18 = vcombine.low %v3254_v23, %v8122_v21  ;;  %v3210_v25 = vcombine.low %v3166_v59, %v3198_v15  ;;  %v9490_v13 = vld [vmem:[#allocation57_spill] sm:$0xff]  ;;  %v9494_v26 = vld [vmem:[#allocation164_spill] sm:$0xff] }
 0x456   : > { %v8163_v54 = vsel %vm1868_vm0, %v9490_v13, %v9489_v63  ;;  %v3173_v34 = vrot.slane %v3159_v9, %v7123_v7  ;;  %v3231_v0 = vcombine.high %v8090_v1, %v8067_v57  ;;  %v3278_v58 = vcombine.low %v3222_v45, %v8142_v60  ;;  %v9492_v63 = vld [vmem:[#allocation163_spill] sm:$0xff]  ;;  %v9493_v13 = vld [vmem:[#allocation58_spill] sm:$0xff]  ;;  %v9541_v38 = vld [vmem:[#allocation101_spill] sm:$0xff] }
 0x457   : > { %4531 = vrot.lane.b32.xlu1 %v3208_v35, %s5619_s25  ;;  %v3263_v35 = vcombine.high %v8071_v8, %v8055_v24  ;;  %v3247_v55 = vcombine.high %v8094_v61, %v8075_v56  ;;  %v9491_v24 = vcombine.low %v7153_v5, %v7146_v36  ;;  %v8177_v9 = vsel %vm1868_vm0, %v9493_v13, %v9492_v63  ;;  %v9495_v57 = vld [vmem:[#allocation59_spill] sm:$0xff]  ;;  %v9501_v63 = vld [vmem:[#allocation68_spill] sm:$0xff]  ;;  %v9505_v13 = vld [vmem:[#allocation278_spill] sm:$0xff]  ;;  %s5637_s25 = smov 100  }
 0x458   : > { %4527 = vrot.lane.b32.xlu0 %v3207_v17, %s5620_s30  ;;  %v3209_v17 = vcombine.high %v3157_v16, %v3189_v50  ;;  %v8182_v50 = vsel %vm1868_vm0, %v9495_v57, %v9494_v26  ;;  %v3215_v56 = vcombine.high %v8086_v27, %v8063_v6  ;;  %v3311_v5 = vcombine.high %v3254_v23, %v8122_v21  ;;  %v9497_v21 = vld [vmem:[#allocation165_spill] sm:$0xff]  ;;  %v9498_v23 = vld [vmem:[#allocation60_spill] sm:$0xff]  ;;  %s5638_s30 = smov 97  }
 0x459   : > { %v4811_v8 = vsel %vm4810_vm2, %v9491_v24, %v4304_v51  ;;  %9496 = vst [vmem:[#allocation12_spill] sm:$0xff] %v8182_v50  ;;  %v8187_v36 = vrot.slane %v3263_v35, %v6929_v22  ;;  %v3318_v51 = vrot.slane %v3310_v18, %v7123_v7  ;;  %v3212_v1 = vcombine.low %v3173_v34, %v3205_v2  ;;  %v9509_v50 = vld [vmem:[#allocation69_spill] sm:$0xff] }
 0x45a   : > { %v3279_v26 = vcombine.high %v3222_v45, %v8142_v60  ;;  %v4813_v6 = vsel %vm4812_vm3, %v4811_v8, %v8081_v3  ;;  %v3211_v27 = vcombine.high %v3166_v59, %v3198_v15  ;;  %v3261_v35 = vrot.slane %v3247_v55, %v6929_v22  ;;  %v9502_v15 = vld [vmem:[#allocation207_spill] sm:$0xff]  ;;  %v9503_v59 = vld [vmem:[#allocation214_spill] sm:$0xff]  ;;  %v9504_v8 = vld [vmem:[#allocation276_spill] sm:$0xff] }
 0x45b   : > { %4539 = vrot.lane.b32.xlu1 %v3210_v25, %s5621_s19  ;;  %v4324_v61 = vpop.permute.xlu1 %4323  ;;  %v8192_v25 = vrot.slane %v3231_v0, %v6929_v22  ;;  %v4815_v24 = vsel %vm4814_vm4, %v4813_v6, %v4312_v31  ;;  %v8201_v18 = vsel %vm1868_vm0, %v9498_v23, %v9497_v21  ;;  %v9500_v0 = vld [vmem:[#allocation173_spill] sm:$0xff]  ;;  %v3229_v3 = vrot.slane %v3215_v56, %v6929_v22  ;;  %v9506_v23 = vld [vmem:[#allocation200_spill] sm:$0xff]  ;;  %s5639_s19 = smov 127  }
 0x45c   : > { %4535 = vrot.lane.b32.xlu0 %v3209_v17, %s5622_s29  ;;  %v4320_v16 = vpop.permute.xlu0 %4319  ;;  %v3286_v17 = vrot.slane %v3278_v58, %v7123_v7  ;;  %9499 = vst [vmem:[#allocation120_spill] sm:$0xff] %v8201_v18  ;;  %v8206_v60 = vsel %vm1868_vm0, %v9501_v63, %v9500_v0  ;;  %v3398_v31 = vcombine.low %v9503_v59, %v9502_v15  ;;  %v9508_v59 = vld [vmem:[#allocation174_spill] sm:$0xff]  ;;  %vm4838_vm2 = vcmask 367616   ;;  %s5640_s29 = smov 103  }
 0x45d   : > { %v3325_v45 = vrot.slane %v3311_v5, %v7123_v7  ;;  %v3326_v58 = vcombine.low %v3261_v35, %v8187_v36  ;;  %v3366_v57 = vcombine.low %v9505_v13, %v9504_v8  ;;  %v4817_v6 = vsel %vm4816_vm5, %v4815_v24, %v4316_v12  ;;  %v9510_v8 = vld [vmem:[#allocation175_spill] sm:$0xff]  ;;  %v9511_v13 = vld [vmem:[#allocation70_spill] sm:$0xff] }
 0x45e   : > { %v3342_v55 = vcombine.low %v3286_v17, %v3318_v51  ;;  %v3213_v21 = vcombine.high %v3173_v34, %v3205_v2  ;;  %v3293_v56 = vrot.slane %v3279_v26, %v7123_v7  ;;  %v4819_v63 = vsel %vm4818_vm6, %v4817_v6, %v4320_v16  ;;  %v9512_v2 = vld [vmem:[#allocation273_spill] sm:$0xff]  ;;  %v9513_v34 = vld [vmem:[#allocation275_spill] sm:$0xff] }
 0x45f   : > { %4547 = vrot.lane.b32.xlu1 %v3212_v1, %s5623_s5  ;;  %v3294_v1 = vcombine.low %v3229_v3, %v8192_v25  ;;  %v8222_v18 = vsel %vm1868_vm0, %v9509_v50, %v9508_v59  ;;  %v8227_v12 = vsel %vm1868_vm0, %v9511_v13, %v9510_v8  ;;  %v3350_v26 = vcombine.low %v9513_v34, %v9512_v2  ;;  %v9522_v34 = vld [vmem:[#allocation189_spill] sm:$0xff]  ;;  %s5641_s5 = smov 5  }
 0x460   : > { %4543 = vrot.lane.b32.xlu0 %v3211_v27, %s5624_s26  ;;  %v9507_v27 = vld [vmem:[#allocation102_spill] sm:$0xff]  ;;  %v4328_v5 = vpop.permute.xlu0 %4327  ;;  %v8232_v16 = vrot.slane %v3398_v31, %v6929_v22  ;;  %v3327_v24 = vcombine.high %v3261_v35, %v8187_v36  ;;  %v3344_v50 = vcombine.low %v3293_v56, %v3325_v45  ;;  %v8237_v6 = vrot.slane %v3366_v57, %v6929_v22  ;;  %v9514_v31 = vld [vmem:[#allocation176_spill] sm:$0xff]  ;;  %v9515_v36 = vld [vmem:[#allocation71_spill] sm:$0xff]  ;;  %s5642_s26 = smov 2  }
 0x461   : > { %v3382_v0 = vcombine.low %v9507_v27, %v9506_v23  ;;  %v4332_v15 = vpop.permute.xlu1 %4331  ;;  %v3295_v23 = vcombine.high %v3229_v3, %v8192_v25  ;;  %v4821_v27 = vsel %vm4820_vm7, %v4819_v63, %v4324_v61  ;;  %v3343_v59 = vcombine.high %v3286_v17, %v3318_v51  ;;  %v9518_v57 = vld [vmem:[#allocation72_spill] sm:$0xff]  ;;  %v9520_v61 = vld [vmem:[#allocation187_spill] sm:$0xff]  ;;  %v9521_v51 = vld [vmem:[#allocation82_spill] sm:$0xff] }
 0x462   : > { %v3302_v8 = vrot.slane %v3294_v1, %v7123_v7  ;;  %v4823_v13 = vsel %vm4822_vm8, %v4821_v27, %v4328_v5  ;;  %v8245_v35 = vsel %vm1868_vm0, %v9515_v36, %v9514_v31  ;;  %v8255_v25 = vsel %vm1868_vm0, %v9521_v51, %v9520_v61  ;;  %v9524_v31 = vld [vmem:[#allocation190_spill] sm:$0xff]  ;;  %v9525_v36 = vld [vmem:[#allocation85_spill] sm:$0xff]  ;;  %v9526_v51 = vld [vmem:[#allocation191_spill] sm:$0xff] }
 0x463   : > { %4555 = vrot.lane.b32.xlu1 %v3342_v55, %s5625_s27  ;;  %v3334_v55 = vrot.slane %v3326_v58, %v7123_v7  ;;  %9516 = vst [vmem:[#allocation15_spill] sm:$0xff] %v8245_v35  ;;  %v9517_v58 = vld [vmem:[#allocation177_spill] sm:$0xff]  ;;  %v3358_v17 = vrot.slane %v3350_v26, %v6929_v22  ;;  %v3341_v1 = vrot.slane %v3327_v24, %v7123_v7  ;;  %v9527_v35 = vld [vmem:[#allocation86_spill] sm:$0xff]  ;;  %vm4840_vm3 = vcmask 392192   ;;  %s5643_s27 = smov 11  }
 0x464   : > { %4551 = vrot.lane.b32.xlu0 %v3213_v21, %s5626_s4  ;;  %v3390_v21 = vrot.slane %v3382_v0, %v6929_v22  ;;  %v8250_v2 = vsel %vm1868_vm0, %v9518_v57, %v9517_v58  ;;  %v8268_v58 = vsel %vm1868_vm0, %v9525_v36, %v9524_v31  ;;  %v3345_v57 = vcombine.high %v3293_v56, %v3325_v45  ;;  %v9533_v45 = vld [vmem:[#allocation97_spill] sm:$0xff]  ;;  %s5644_s4 = smov 8  }
 0x465   : > { %9519 = vst [vmem:[#allocation131_spill] sm:$0xff] %v8250_v2  ;;  %v3346_v5 = vcombine.low %v3302_v8, %v3334_v55  ;;  %v3414_v26 = vcombine.low %v3358_v17, %v8237_v6  ;;  %v3309_v61 = vrot.slane %v3295_v23, %v7123_v7  ;;  %v9530_v2 = vld [vmem:[#allocation87_spill] sm:$0xff]  ;;  %vm4842_vm4 = vcmask 416768  }
 0x466   : > { %v3446_v3 = vcombine.low %v3390_v21, %v8232_v16  ;;  %v9534_v23 = vld [vmem:[#allocation203_spill] sm:$0xff]  ;;  %vm4844_vm5 = vcmask 441344   ;;  %vm4846_vm6 = vcmask 465920   ;;  %vm4848_vm7 = vcmask 490496  }
 0x467   : > { %4563 = vrot.lane.b32.xlu1 %v3344_v50, %s5627_s7  ;;  %v9523_v50 = vld [vmem:[#allocation84_spill] sm:$0xff]  ;;  %vm4850_vm8 = vcmask 515072   ;;  %s5645_s7 = smov 17  }
 0x468   : > { %4559 = vrot.lane.b32.xlu0 %v3343_v59, %s5628_s6  ;;  %v4340_v0 = vpop.permute.xlu1 %4339  ;;  %v8263_v27 = vsel %vm1868_vm0, %v9523_v50, %v9522_v34  ;;  %v4825_v59 = vsel %vm4824_vm9, %v4823_v13, %v4332_v15  ;;  %v8275_v34 = vsel %vm1868_vm0, %v9527_v35, %v9526_v51  ;;  %v9529_v50 = vld [vmem:[#allocation192_spill] sm:$0xff]  ;;  %v9532_v15 = vld [vmem:[#allocation202_spill] sm:$0xff]  ;;  %v3447_v35 = vcombine.high %v3390_v21, %v8232_v16  ;;  %v9537_v51 = vld [vmem:[#allocation99_spill] sm:$0xff]  ;;  %s5646_s6 = smov 14  }
 0x469   : > { %v4336_v63 = vpop.permute.xlu0 %4335  ;;  %9528 = vst [vmem:[#allocation26_spill] sm:$0xff] %v8275_v34  ;;  %v8280_v31 = vsel %vm1868_vm0, %v9530_v2, %v9529_v50  ;;  %v1976_v56 = vsel %vm1868_vm0, %v9533_v45, %v9532_v15  ;;  %v9535_v13 = vld [vmem:[#allocation98_spill] sm:$0xff]  ;;  %v9536_v2 = vld [vmem:[#allocation204_spill] sm:$0xff]  ;;  %v9538_v15 = vld [vmem:[#allocation205_spill] sm:$0xff]  ;;  %v3422_v16 = vrot.slane %v3414_v26, %v7123_v7  ;;  %vm4852_vm9 = vcmask 539648  }
 0x46a   : > { %v4827_v24 = vsel %vm4826_vm10, %v4825_v59, %v4336_v63  ;;  %9531 = vst [vmem:[#allocation217_spill] sm:$0xff] %v8280_v31  ;;  %v8288_v63 = vsel %vm1868_vm0, %v9535_v13, %v9534_v23  ;;  %v3348_v59 = vcombine.low %v3309_v61, %v3341_v1  ;;  %v8295_v50 = vsel %vm1868_vm0, %v9537_v51, %v9536_v2  ;;  %v9539_v45 = vld [vmem:[#allocation100_spill] sm:$0xff] }
 0x46b   : > { %4571 = vrot.lane.b32.xlu1 %v3346_v5, %s5629_s1  ;;  %v3454_v5 = vrot.slane %v3446_v3, %v7123_v7  ;;  %v4829_v34 = vsel %vm4828_vm11, %v4827_v24, %v4340_v0  ;;  %v3347_v23 = vcombine.high %v3302_v8, %v3334_v55  ;;  %v3415_v13 = vcombine.high %v3358_v17, %v8237_v6  ;;  %v9540_v3 = vld [vmem:[#allocation206_spill] sm:$0xff]  ;;  %v9542_v51 = vld [vmem:[#allocation216_spill] sm:$0xff]  ;;  %v9545_v24 = vld [vmem:[#allocation113_spill] sm:$0xff]  ;;  %s5647_s1 = smov 23  }
 0x46c   : > { %4567 = vrot.lane.b32.xlu0 %v3345_v57, %s5630_s17  ;;  %v4348_v36 = vpop.permute.xlu1 %4347  ;;  %v8300_v57 = vsel %vm1868_vm0, %v9539_v45, %v9538_v15  ;;  %v8307_v2 = vsel %vm1868_vm0, %v9541_v38, %v9540_v3  ;;  %v1992_v15 = vsel %vm1868_vm0, %v9543_v53, %v9542_v51  ;;  %v9544_v0 = vld [vmem:[#allocation218_spill] sm:$0xff]  ;;  %v8323_v38 = vrot.slane %v3447_v35, %v7123_v7  ;;  %v9549_v51 = vld [vmem:[#allocation299_spill] sm:$0xff]  ;;  %s5648_s17 = smov 20  }
 0x46d   : > { %v4344_v31 = vpop.permute.xlu0 %4343  ;;  %v8315_v55 = vsel %vm1868_vm0, %v9545_v24, %v9544_v0  ;;  %v9546_v6 = vld [vmem:[#allocation230_spill] sm:$0xff]  ;;  %v3462_v17 = vcombine.low %v7255_v44, %v7259_v47  ;;  %v3478_v26 = vcombine.low %v3422_v16, %v3454_v5  ;;  %v3429_v35 = vrot.slane %v3415_v13, %v7123_v7  ;;  %v9548_v47 = vld [vmem:[#allocation243_spill] sm:$0xff] }
 0x46e   : > { %v4831_v21 = vsel %vm4830_vm12, %v4829_v34, %v4344_v31  ;;  %v8320_v8 = vsel %vm1997_vm1, %v7953_v37, %v9546_v6  ;;  %v9547_v34 = vld [vmem:[#allocation271_spill] sm:$0xff]  ;;  %v3430_v3 = vcombine.low %v9359_v49, %v9360_v48  ;;  %v9551_v49 = vld [vmem:[#allocation256_spill] sm:$0xff]  ;;  %vm4854_vm10 = vcmask 564224  }
 0x46f   : > { %4579 = vrot.lane.b32.xlu1 %v3348_v59, %s5631_s28  ;;  %v8330_v31 = vsel %vm1997_vm1, %v8153_v52, %v9547_v34  ;;  %v8334_v59 = vsel %vm1997_vm1, %v1992_v15, %v7925_v19  ;;  %v4833_v45 = vsel %vm4832_vm13, %v4831_v21, %v4348_v36  ;;  %v8342_v52 = vsel %vm1997_vm1, %v7998_v42, %v9548_v47  ;;  %v9552_v21 = vld [vmem:[#allocation290_spill] sm:$0xff]  ;;  %v9553_v34 = vld [vmem:[#allocation219_spill] sm:$0xff]  ;;  %v9556_v47 = vld [vmem:[#allocation116_spill] sm:$0xff]  ;;  %s5649_s28 = smov 29  }
 0x470   : > { %4575 = vrot.lane.b32.xlu0 %v3347_v23, %s5632_s8  ;;  %v4356_v53 = vpop.permute.xlu1 %4355  ;;  %v3349_v23 = vcombine.high %v3309_v61, %v3341_v1  ;;  %v8347_v19 = vsel %vm1997_vm1, %v8255_v25, %v9549_v51  ;;  %v9550_v1 = vld [vmem:[#allocation308_spill] sm:$0xff]  ;;  %v2041_v48 = vsel %vm1997_vm1, %v8115_v46, %v9551_v49  ;;  %v8357_v36 = vrot.slane %v3462_v17, %v7123_v7  ;;  %s5650_s8 = smov 26  }
 0x471   : > { %v4352_v37 = vpop.permute.xlu0 %4351  ;;  %v8351_v61 = vsel %vm1997_vm1, %v1976_v56, %v9550_v1  ;;  %v3670_v42 = vcombine.low %v8347_v19, %v8334_v59  ;;  %v3480_v25 = vcombine.low %v3429_v35, %v8323_v38  ;;  %v3638_v56 = vcombine.low %v8342_v52, %v8330_v31 }
 0x472   : > { %v4835_v44 = vsel %vm4834_vm14, %v4833_v45, %v4352_v37  ;;  %v8367_v15 = vsel %vm1997_vm1, %v8206_v60, %v9552_v21  ;;  %v3479_v46 = vcombine.high %v3422_v16, %v3454_v5  ;;  %v3438_v6 = vrot.slane %v3430_v3, %v7123_v7  ;;  %v9554_v45 = vld [vmem:[#allocation114_spill] sm:$0xff]  ;;  %v9557_v16 = vld [vmem:[#allocation232_spill] sm:$0xff] }
 0x473   : > { %4587 = vrot.lane.b32.xlu1 %v3478_v26, %s5633_s20  ;;  %v4837_v0 = vsel %vm4836_vm15, %v4835_v44, %v4356_v53  ;;  %v3654_v17 = vcombine.low %v8367_v15, %v8351_v61  ;;  %v1993_v37 = vsel %vm1868_vm0, %v9554_v45, %v9553_v34  ;;  %v3622_v5 = vcombine.low %v8320_v8, %v2041_v48  ;;  %v9559_v34 = vld [vmem:[#allocation260_spill] sm:$0xff]  ;;  %s5651_s20 = smov 35  }
 0x474   : > { %4583 = vrot.lane.b32.xlu0 %v3349_v23, %s5634_s22  ;;  %v4364_v13 = vpop.permute.xlu1 %4363  ;;  %v9555_v23 = vld [vmem:[#allocation221_spill] sm:$0xff]  ;;  %v8384_v53 = vsel %vm1997_vm1, %v7970_v20, %v9557_v16  ;;  %v8387_v3 = vrot.slane %v3670_v42, %v6929_v22  ;;  %v3599_v44 = vcombine.high %v7664_v28, %v7655_v40  ;;  %v3482_v1 = vcombine.low %v3438_v6, %v8357_v36  ;;  %s5652_s22 = smov 32  }
 0x475   : > { %v4360_v24 = vpop.permute.xlu0 %4359  ;;  %v8378_v60 = vsel %vm1868_vm0, %v9556_v47, %v9555_v23  ;;  %v3623_v49 = vcombine.high %v8320_v8, %v2041_v48  ;;  %v3567_v20 = vcombine.high %v7658_v29, %v7648_v39  ;;  %v3662_v42 = vrot.slane %v3654_v17, %v6929_v22  ;;  %v9558_v40 = vld [vmem:[#allocation245_spill] sm:$0xff]  ;;  %v9560_v47 = vld [vmem:[#allocation274_spill] sm:$0xff] }
 0x476   : > { %v4839_v26 = vsel %vm4838_vm2, %v4837_v0, %v4360_v24  ;;  %v3481_v24 = vcombine.high %v3429_v35, %v8323_v38  ;;  %v8403_v28 = vsel %vm1997_vm1, %v8013_v32, %v9558_v40  ;;  %v3630_v8 = vrot.slane %v3622_v5, %v6929_v22 }
 0x477   : > { %4595 = vrot.lane.b32.xlu1 %v3480_v25, %s5635_s11  ;;  %v8394_v25 = vrot.slane %v3638_v56, %v6929_v22  ;;  %v4841_v21 = vsel %vm4840_vm3, %v4839_v26, %v4364_v13  ;;  %v3639_v48 = vcombine.high %v8342_v52, %v8330_v31  ;;  %v3671_v39 = vcombine.high %v8347_v19, %v8334_v59  ;;  %s5653_s11 = smov 41  }
 0x478   : > { %4591 = vrot.lane.b32.xlu0 %v3479_v46, %s5636_s9  ;;  %v4372_v51 = vpop.permute.xlu1 %4371  ;;  %v3718_v29 = vcombine.low %v3662_v42, %v8387_v3  ;;  %v3613_v38 = vrot.slane %v3599_v44, %v7123_v7  ;;  %v3619_v32 = vcombine.high %v7721_v62, %v7736_v10  ;;  %v8415_v13 = vrot.slane %v3623_v49, %v6929_v22  ;;  %s5654_s9 = smov 38  }
 0x479   : > { %v4368_v0 = vpop.permute.xlu0 %4367  ;;  %v3686_v56 = vcombine.low %v3630_v8, %v8394_v25  ;;  %v3483_v17 = vcombine.high %v3438_v6, %v8357_v36  ;;  %v3581_v26 = vrot.slane %v3567_v20, %v7123_v7  ;;  %v3655_v59 = vcombine.high %v8367_v15, %v8351_v61 }
 0x47a   : > { %v4843_v46 = vsel %vm4842_vm4, %v4841_v21, %v4368_v0  ;;  %v8425_v45 = vsel %vm1997_vm1, %v8132_v30, %v9559_v34  ;;  %v8428_v23 = vrot.slane %v3639_v48, %v6929_v22  ;;  %v8433_v36 = vsel %vm1997_vm1, %v8177_v9, %v9560_v47  ;;  %v9563_v48 = vld [vmem:[#allocation292_spill] sm:$0xff] }
 0x47b   : > { %4603 = vrot.lane.b32.xlu1 %v3482_v1, %s5637_s25  ;;  %v4845_v31 = vsel %vm4844_vm5, %v4843_v46, %v4372_v51  ;;  %v8436_v61 = vrot.slane %v3671_v39, %v6929_v22  ;;  %v3719_v15 = vcombine.high %v3662_v42, %v8387_v3  ;;  %v3726_v6 = vrot.slane %v3718_v29, %v7123_v7  ;;  %s5655_s25 = smov 47  }
 0x47c   : > { %4599 = vrot.lane.b32.xlu0 %v3481_v24, %s5638_s30  ;;  %v4380_v35 = vpop.permute.xlu1 %4379  ;;  %v3621_v5 = vcombine.high %v3581_v26, %v3613_v38  ;;  %v3687_v16 = vcombine.high %v3630_v8, %v8394_v25  ;;  %v8443_v44 = vsel %vm1997_vm1, %v1993_v37, %v7990_v14  ;;  %v3620_v1 = vcombine.low %v3581_v26, %v3613_v38  ;;  %v9561_v24 = vld [vmem:[#allocation301_spill] sm:$0xff]  ;;  %v9562_v14 = vld [vmem:[#allocation310_spill] sm:$0xff]  ;;  %s5656_s30 = smov 44  }
 0x47d   : > { %v4376_v52 = vpop.permute.xlu0 %4375  ;;  %v3694_v49 = vrot.slane %v3686_v56, %v7123_v7  ;;  %v3669_v21 = vrot.slane %v3655_v59, %v6929_v22  ;;  %v3774_v3 = vcombine.low %v8403_v28, %v8433_v36  ;;  %v8452_v25 = vsel %vm1997_vm1, %v8268_v58, %v9561_v24  ;;  %v9566_v24 = vld [vmem:[#allocation259_spill] sm:$0xff] }
 0x47e   : > { %v4847_v19 = vsel %vm4846_vm6, %v4845_v31, %v4376_v52  ;;  %v8457_v37 = vsel %vm1997_vm1, %v8295_v50, %v9562_v14  ;;  %v3733_v20 = vrot.slane %v3719_v15, %v7123_v7  ;;  %v3806_v46 = vcombine.low %v8452_v25, %v8443_v44  ;;  %v9564_v31 = vld [vmem:[#allocation231_spill] sm:$0xff] }
 0x47f   : > { %4639 = vrot.lane.b32.xlu1 %v3619_v32, %s5639_s19  ;;  %v4849_v9 = vsel %vm4848_vm7, %v4847_v19, %v4380_v35  ;;  %v3734_v42 = vcombine.low %v3669_v21, %v8436_v61  ;;  %v3751_v8 = vcombine.high %v3694_v49, %v3726_v6  ;;  %v3702_v58 = vcombine.low %v8415_v13, %v8428_v23  ;;  %s5657_s19 = smov 53  }
 0x480   : > { %4607 = vrot.lane.b32.xlu0 %v3483_v17, %s5640_s29  ;;  %v4388_v30 = vpop.permute.xlu1 %4387  ;;  %v8468_v50 = vsel %vm1997_vm1, %v8227_v12, %v9563_v48  ;;  %v3750_v38 = vcombine.low %v3694_v49, %v3726_v6  ;;  %v3701_v35 = vrot.slane %v3687_v16, %v7123_v7  ;;  %vm4856_vm11 = vcmask 588800   ;;  %v9565_v17 = vld [vmem:[#allocation244_spill] sm:$0xff]  ;;  %s5658_s29 = smov 50  }
 0x481   : > { %v4384_v51 = vpop.permute.xlu0 %4383  ;;  %v3790_v32 = vcombine.low %v8468_v50, %v8457_v37  ;;  %v8476_v52 = vsel %vm1997_vm1, %v7958_v43, %v9564_v31  ;;  %v8481_v12 = vsel %vm1997_vm1, %v8003_v41, %v9565_v17  ;;  %v3758_v26 = vcombine.low %v8384_v53, %v8425_v45 }
 0x482   : > { %v4851_v0 = vsel %vm4850_vm8, %v4849_v9, %v4384_v51  ;;  %vm4858_vm12 = vcmask 613376   ;;  %v3735_v59 = vcombine.high %v3669_v21, %v8436_v61  ;;  %v3742_v19 = vrot.slane %v3734_v42, %v7123_v7 }
 0x483   : > { %4647 = vrot.lane.b32.xlu1 %v3621_v5, %s5641_s5  ;;  %v4853_v39 = vsel %vm4852_vm9, %v4851_v0, %v4388_v30  ;;  %v8488_v34 = vrot.slane %v3806_v46, %v6929_v22  ;;  %v3753_v47 = vcombine.high %v3701_v35, %v3733_v20  ;;  %v3703_v15 = vcombine.high %v8415_v13, %v8428_v23  ;;  %v9567_v46 = vld [vmem:[#allocation272_spill] sm:$0xff]  ;;  %s5209_s5 = smul.u32 24, %s5879_s10 }
 0x484   : > { %4643 = vrot.lane.b32.xlu0 %v3620_v1, %s5642_s26  ;;  %v4396_v40 = vpop.permute.xlu1 %4395  ;;  %v3710_v41 = vrot.slane %v3702_v58, %v7123_v7  ;;  %v3752_v5 = vcombine.low %v3701_v35, %v3733_v20  ;;  %v8494_v16 = vrot.slane %v3774_v3, %v6929_v22  ;;  %v3798_v61 = vrot.slane %v3790_v32, %v6929_v22  ;;  %s5659_s26 = smov 59  }
 0x485   : > { %v4392_v29 = vpop.permute.xlu0 %4391  ;;  %vm4860_vm13 = vcmask 637952   ;;  %v3759_v51 = vcombine.high %v8384_v53, %v8425_v45  ;;  %v3766_v1 = vrot.slane %v3758_v26, %v6929_v22  ;;  %v3775_v13 = vcombine.high %v8403_v28, %v8433_v36  ;;  %v9568_v26 = vld [vmem:[#allocation300_spill] sm:$0xff] }
 0x486   : > { %v4855_v56 = vsel %vm4854_vm10, %v4853_v39, %v4392_v29  ;;  %vm4862_vm14 = vcmask 662528   ;;  %v3749_v23 = vrot.slane %v3735_v59, %v7123_v7  ;;  %v3807_v49 = vcombine.high %v8452_v25, %v8443_v44 }
 0x487   : > { %4655 = vrot.lane.b32.xlu1 %v3751_v8, %s5643_s27  ;;  %v4857_v6 = vsel %vm4856_vm11, %v4855_v56, %v4396_v40  ;;  %v3854_v21 = vcombine.low %v3798_v61, %v8488_v34  ;;  %v3755_v3 = vcombine.high %v3710_v41, %v3742_v19  ;;  %v8509_v53 = vsel %vm1997_vm1, %v8127_v33, %v9566_v24  ;;  %s5660_s27 = smov 56  }
 0x488   : > { %4651 = vrot.lane.b32.xlu0 %v3750_v38, %s5644_s4  ;;  %v4404_v43 = vpop.permute.xlu1 %4403  ;;  %v3717_v45 = vrot.slane %v3703_v15, %v7123_v7  ;;  %v3754_v14 = vcombine.low %v3710_v41, %v3742_v19  ;;  %v3822_v20 = vcombine.low %v3766_v1, %v8494_v16  ;;  %v3791_v42 = vcombine.high %v8468_v50, %v8457_v37  ;;  %v9570_v41 = vld [vmem:[#allocation291_spill] sm:$0xff]  ;;  %s5661_s4 = smov 65  }
 0x489   : > { %v4400_v30 = vpop.permute.xlu0 %4399  ;;  %vm4864_vm15 = vcmask 687104   ;;  %v8516_v25 = vrot.slane %v3759_v51, %v6929_v22  ;;  %v8521_v33 = vsel %vm1997_vm1, %v8163_v54, %v9567_v46  ;;  %v8524_v40 = vrot.slane %v3775_v13, %v6929_v22  ;;  %v9571_v51 = vld [vmem:[#allocation234_spill] sm:$0xff] }
 0x48a   : > { %v4859_v9 = vsel %vm4858_vm12, %v4857_v6, %v4400_v30  ;;  %vm4866_vm2 = vcmask 711680   ;;  %v8527_v37 = vrot.slane %v3807_v49, %v6929_v22  ;;  %v3855_v8 = vcombine.high %v3798_v61, %v8488_v34 }
 0x48b   : > { %4663 = vrot.lane.b32.xlu1 %v3753_v47, %s5645_s7  ;;  %v4861_v28 = vsel %vm4860_vm13, %v4859_v9, %v4404_v43  ;;  %v3862_v58 = vrot.slane %v3854_v21, %v7123_v7  ;;  %v3757_v50 = vcombine.high %v3717_v45, %v3749_v23  ;;  %v3823_v39 = vcombine.high %v3766_v1, %v8494_v16  ;;  %s5662_s7 = smov 62  }
 0x48c   : > { %4659 = vrot.lane.b32.xlu0 %v3752_v5, %s5646_s6  ;;  %v4412_v0 = vpop.permute.xlu1 %4411  ;;  %v8535_v54 = vsel %vm1997_vm1, %v8315_v55, %v7988_v11  ;;  %v3756_v35 = vcombine.low %v3717_v45, %v3749_v23  ;;  %v3830_v32 = vrot.slane %v3822_v20, %v7123_v7  ;;  %v3805_v56 = vrot.slane %v3791_v42, %v6929_v22  ;;  %v9569_v11 = vld [vmem:[#allocation309_spill] sm:$0xff]  ;;  %v9572_v20 = vld [vmem:[#allocation247_spill] sm:$0xff]  ;;  %v9573_v42 = vld [vmem:[#allocation118_spill] sm:$0xff]  ;;  %s8690_s6 = scalar_lea.vmem [#allocation8], %s5209_s5  ;;  %s5675_s5 = smov 104  }
 0x48d   : > { %v4408_v36 = vpop.permute.xlu0 %4407  ;;  %vm4868_vm3 = vcmask 736256   ;;  %v3910_v17 = vcombine.low %v8481_v12, %v8521_v33  ;;  %v8544_v59 = vsel %vm1997_vm1, %v8263_v27, %v9568_v26  ;;  %v8549_v55 = vsel %vm1997_vm1, %v8288_v63, %v9569_v11  ;;  %v9576_v26 = vld [vmem:[#allocation279_spill] sm:$0xff] }
 0x48e   : > { %v4863_v44 = vsel %vm4862_vm14, %v4861_v28, %v4408_v36  ;;  %vm4870_vm4 = vcmask 760832   ;;  %v3942_v19 = vcombine.low %v8544_v59, %v8535_v54  ;;  %v3869_v34 = vrot.slane %v3855_v8, %v7123_v7 }
 0x48f   : > { %4671 = vrot.lane.b32.xlu1 %v3755_v3, %s5647_s1  ;;  %v4865_v29 = vsel %vm4864_vm15, %v4863_v44, %v4412_v0  ;;  %v3870_v43 = vcombine.low %v3805_v56, %v8527_v37  ;;  %v3887_v15 = vcombine.high %v3830_v32, %v3862_v58  ;;  %v3838_v27 = vcombine.low %v8516_v25, %v8524_v40  ;;  %s5663_s1 = smov 71  }
 0x490   : > { %4667 = vrot.lane.b32.xlu0 %v3754_v14, %s5648_s17  ;;  %v8560_v63 = vsel %vm1997_vm1, %v8222_v18, %v9570_v41  ;;  %v3886_v5 = vcombine.low %v3830_v32, %v3862_v58  ;;  %v3837_v16 = vrot.slane %v3823_v39, %v7123_v7  ;;  %vm4872_vm5 = vcmask 785408   ;;  %v9574_v32 = vld [vmem:[#allocation262_spill] sm:$0xff]  ;;  %s5664_s17 = smov 68  }
 0x491   : > { %v4420_v48 = vpop.permute.xlu1 %4419  ;;  %v3926_v61 = vcombine.low %v8560_v63, %v8549_v55  ;;  %v8568_v1 = vsel %vm1997_vm1, %v7980_v4, %v9571_v51  ;;  %v3894_v18 = vcombine.low %v8476_v52, %v8509_v53  ;;  %v3895_v13 = vcombine.high %v8476_v52, %v8509_v53  ;;  %v9579_v51 = vld [vmem:[#allocation303_spill] sm:$0xff] }
 0x492   : > { %v4416_v38 = vpop.permute.xlu0 %4415  ;;  %vm4874_vm6 = vcmask 809984   ;;  %v8575_v23 = vrot.slane %v3942_v19, %v6929_v22  ;;  %v3871_v49 = vcombine.high %v3805_v56, %v8527_v37  ;;  %v3878_v21 = vrot.slane %v3870_v43, %v7123_v7  ;;  %v9575_v56 = vld [vmem:[#allocation119_spill] sm:$0xff] }
 0x493   : > { %v4867_v31 = vsel %vm4866_vm2, %v4865_v29, %v4416_v38  ;;  %4679 = vrot.lane.b32.xlu1 %v3757_v50, %s5649_s28  ;;  %v3889_v3 = vcombine.high %v3837_v16, %v3869_v34  ;;  %v8580_v4 = vrot.slane %v3910_v17, %v6929_v22  ;;  %v3839_v24 = vcombine.high %v8516_v25, %v8524_v40  ;;  %s5665_s28 = smov 77  }
 0x494   : > { %4675 = vrot.lane.b32.xlu0 %v3756_v35, %s5650_s8  ;;  %v4869_v6 = vsel %vm4868_vm3, %v4867_v31, %v4420_v48  ;;  %v3888_v53 = vcombine.low %v3837_v16, %v3869_v34  ;;  %v3846_v28 = vrot.slane %v3838_v27, %v7123_v7  ;;  %v3934_v36 = vrot.slane %v3926_v61, %v6929_v22  ;;  %v9578_v27 = vld [vmem:[#allocation235_spill] sm:$0xff]  ;;  %s5666_s8 = smov 74  }
 0x495   : > { %v4428_v47 = vpop.permute.xlu1 %4427  ;;  %vm4876_vm7 = vcmask 834560   ;;  %v8589_v44 = vsel %vm1997_vm1, %v9573_v42, %v9572_v20  ;;  %v3902_v46 = vrot.slane %v3894_v18, %v6929_v22  ;;  %v3911_v25 = vcombine.high %v8481_v12, %v8521_v33  ;;  %v9580_v18 = vld [vmem:[#allocation217_spill] sm:$0xff] }
 0x496   : > { %v4424_v30 = vpop.permute.xlu0 %4423  ;;  %vm4878_vm8 = vcmask 859136   ;;  %v3943_v40 = vcombine.high %v8544_v59, %v8535_v54  ;;  %v3990_v37 = vcombine.low %v3934_v36, %v8575_v23  ;;  %v3885_v8 = vrot.slane %v3871_v49, %v7123_v7  ;;  %v9577_v59 = vld [vmem:[#allocation120_spill] sm:$0xff] }
 0x497   : > { %v4871_v9 = vsel %vm4870_vm4, %v4869_v6, %v4424_v30  ;;  %4687 = vrot.lane.b32.xlu1 %v3887_v15, %s5651_s20  ;;  %v3891_v48 = vcombine.high %v3846_v28, %v3878_v21  ;;  %v8599_v50 = vrot.slane %v3895_v13, %v6929_v22  ;;  %v3958_v39 = vcombine.low %v3902_v46, %v8580_v4  ;;  %v9581_v13 = vld [vmem:[#allocation312_spill] sm:$0xff]  ;;  %s5667_s20 = smov 83  }
 0x498   : > { %4683 = vrot.lane.b32.xlu0 %v3886_v5, %s5652_s22  ;;  %v4873_v45 = vsel %vm4872_vm5, %v4871_v9, %v4428_v47  ;;  %v3890_v12 = vcombine.low %v3846_v28, %v3878_v21  ;;  %v3853_v33 = vrot.slane %v3839_v24, %v7123_v7  ;;  %v3927_v35 = vcombine.high %v8560_v63, %v8549_v55  ;;  %s5668_s22 = smov 80  }
 0x499   : > { %v4436_v0 = vpop.permute.xlu1 %4435  ;;  %vm4880_vm9 = vcmask 883712   ;;  %v8608_v31 = vsel %vm1997_vm1, %v9575_v56, %v9574_v32  ;;  %v8611_v17 = vrot.slane %v3911_v25, %v6929_v22  ;;  %v8616_v11 = vsel %vm1997_vm1, %v9577_v59, %v9576_v26  ;;  %v9585_v25 = vld [vmem:[#allocation115_spill] sm:$0xff] }
 0x49a   : > { %v4432_v52 = vpop.permute.xlu0 %4431  ;;  %vm4882_vm10 = vcmask 908288   ;;  %v8619_v55 = vrot.slane %v3943_v40, %v6929_v22  ;;  %v3991_v19 = vcombine.high %v3934_v36, %v8575_v23  ;;  %v3998_v34 = vrot.slane %v3990_v37, %v7123_v7 }
 0x49b   : > { %v4875_v14 = vsel %vm4874_vm6, %v4873_v45, %v4432_v52  ;;  %4695 = vrot.lane.b32.xlu1 %v3889_v3, %s5653_s11  ;;  %v3893_v47 = vcombine.high %v3853_v33, %v3885_v8  ;;  %v3959_v15 = vcombine.high %v3902_v46, %v8580_v4  ;;  %v8627_v41 = vsel %vm1997_vm1, %v8378_v60, %v9578_v27  ;;  %v9582_v45 = vld [vmem:[#allocation294_spill] sm:$0xff]  ;;  %v9583_v52 = vld [vmem:[#allocation131_spill] sm:$0xff]  ;;  %v9584_v46 = vld [vmem:[#allocation220_spill] sm:$0xff]  ;;  %s5669_s11 = smov 89  }
 0x49c   : > { %4691 = vrot.lane.b32.xlu0 %v3888_v53, %s5654_s9  ;;  %v4877_v29 = vsel %vm4876_vm7, %v4875_v14, %v4436_v0  ;;  %v3892_v30 = vcombine.low %v3853_v33, %v3885_v8  ;;  %v3966_v5 = vrot.slane %v3958_v39, %v7123_v7  ;;  %v3941_v16 = vrot.slane %v3927_v35, %v6929_v22  ;;  %v9588_v27 = vld [vmem:[#allocation261_spill] sm:$0xff]  ;;  %s5670_s9 = smov 86  }
 0x49d   : > { %v4444_v58 = vpop.permute.xlu1 %4443  ;;  %vm4884_vm11 = vcmask 932864   ;;  %v3974_v9 = vcombine.low %v8599_v50, %v8611_v17  ;;  %v8636_v60 = vsel %vm1997_vm1, %v9580_v18, %v9579_v51  ;;  %v8641_v23 = vsel %vm1997_vm1, %v8307_v2, %v9581_v13 }
 0x49e   : > { %v4440_v38 = vpop.permute.xlu0 %4439  ;;  %vm4886_vm12 = vcmask 957440   ;;  %v4005_v49 = vrot.slane %v3991_v19, %v7123_v7  ;;  %v4006_v21 = vcombine.low %v3941_v16, %v8619_v55  ;;  %v4078_v0 = vcombine.low %v8636_v60, %v8627_v41  ;;  %v9587_v19 = vld [vmem:[#allocation222_spill] sm:$0xff] }
 0x49f   : > { %v4879_v54 = vsel %vm4878_vm8, %v4877_v29, %v4440_v38  ;;  %4703 = vrot.lane.b32.xlu1 %v3891_v48, %s5655_s25  ;;  %v4023_v4 = vcombine.high %v3966_v5, %v3998_v34  ;;  %v3973_v24 = vrot.slane %v3959_v15, %v7123_v7  ;;  %v8651_v53 = vsel %vm1997_vm1, %v9583_v52, %v9582_v45  ;;  %s5671_s25 = smov 95  }
 0x4a0   : > { %4699 = vrot.lane.b32.xlu0 %v3890_v12, %s5656_s30  ;;  %v4881_v63 = vsel %vm4880_vm9, %v4879_v54, %v4444_v58  ;;  %v4022_v36 = vcombine.low %v3966_v5, %v3998_v34  ;;  %v4046_v14 = vcombine.low %v8589_v44, %v8616_v11  ;;  %v4062_v20 = vcombine.low %v8651_v53, %v8641_v23  ;;  %s5672_s30 = smov 92  }
 0x4a1   : > { %v4452_v43 = vpop.permute.xlu1 %4451  ;;  %vm4888_vm13 = vcmask 982016   ;;  %v1996_v40 = vsel %vm1868_vm0, %v9585_v25, %v9584_v46  ;;  %v4030_v37 = vcombine.low %v8568_v1, %v8608_v31  ;;  %v4007_v8 = vcombine.high %v3941_v16, %v8619_v55  ;;  %v9586_v55 = vld [vmem:[#allocation246_spill] sm:$0xff]  ;;  %v9595_v25 = vld [vmem:[#allocation311_spill] sm:$0xff] }
 0x4a2   : > { %v4448_v6 = vpop.permute.xlu0 %4447  ;;  %vm4890_vm14 = vcmask 1006592   ;;  %v4014_v58 = vrot.slane %v4006_v21, %v7123_v7  ;;  %v8666_v48 = vrot.slane %v4078_v0, %v6929_v22  ;;  %vm4892_vm15 = vcmask 1031168  }
 0x4a3   : > { %v4883_v61 = vsel %vm4882_vm10, %v4881_v63, %v4448_v6  ;;  %4711 = vrot.lane.b32.xlu1 %v3893_v47, %s5657_s19  ;;  %v4025_v29 = vcombine.high %v3973_v24, %v4005_v49  ;;  %v4031_v38 = vcombine.high %v8568_v1, %v8608_v31  ;;  %v3975_v12 = vcombine.high %v8599_v50, %v8611_v17  ;;  %v9589_v63 = vld [vmem:[#allocation13_spill] sm:$0xff]  ;;  %s5673_s19 = smov 101  }
 0x4a4   : > { %4707 = vrot.lane.b32.xlu0 %v3892_v30, %s5658_s29  ;;  %v4885_v2 = vsel %vm4884_vm11, %v4883_v61, %v4452_v43  ;;  %v4024_v54 = vcombine.low %v3973_v24, %v4005_v49  ;;  %v3982_v32 = vrot.slane %v3974_v9, %v7123_v7  ;;  %v8674_v56 = vrot.slane %v4046_v14, %v6929_v22  ;;  %v9594_v14 = vld [vmem:[#allocation26_spill] sm:$0xff]  ;;  %s5674_s29 = smov 98  }
 0x4a5   : > { %v4460_v3 = vpop.permute.xlu1 %4459  ;;  %v4070_v26 = vrot.slane %v4062_v20, %v6929_v22  ;;  %v8680_v1 = vsel %vm1997_vm1, %v9587_v19, %v9586_v55  ;;  %v4038_v50 = vrot.slane %v4030_v37, %v6929_v22  ;;  %v4079_v31 = vcombine.high %v8636_v60, %v8627_v41  ;;  %v9590_v60 = vld [vmem:[#allocation14_spill] sm:$0xff] }
 0x4a6   : > { %v4456_v28 = vpop.permute.xlu0 %4455  ;;  %v4021_v34 = vrot.slane %v4007_v8, %v7123_v7  ;;  %v4027_v15 = vcombine.high %v3982_v32, %v4014_v58  ;;  %vm4895_vm2 = vcmask 31744   ;;  %v8696_v41 = vsel %vm1997_vm1, %v9589_v63, %v9588_v27 }
 0x4a7   : > { %v4887_v42 = vsel %vm4886_vm12, %v4885_v2, %v4456_v28  ;;  %4719 = vrot.lane.b32.xlu1 %v4023_v4, %s5659_s26  ;;  %v4126_v43 = vcombine.low %v4070_v26, %v8666_v48  ;;  %v8699_v6 = vrot.slane %v4031_v38, %v6929_v22  ;;  %v4047_v30 = vcombine.high %v8589_v44, %v8616_v11  ;;  %v9592_v4 = vld [vmem:[#allocation12_spill] sm:$0xff]  ;;  %v9596_v38 = vld [vmem:[#allocation233_spill] sm:$0xff]  ;;  %s5676_s26 = smov 106  }
 0x4a8   : > { %4715 = vrot.lane.b32.xlu0 %v4022_v36, %s5660_s27  ;;  %v4889_v33 = vsel %vm4888_vm13, %v4887_v42, %v4460_v3  ;;  %v4026_v16 = vcombine.low %v3982_v32, %v4014_v58  ;;  %v3989_v61 = vrot.slane %v3975_v12, %v7123_v7  ;;  %v4094_v9 = vcombine.low %v4038_v50, %v8674_v56  ;;  %v9591_v3 = vld [vmem:[#allocation277_spill] sm:$0xff]  ;;  %v9593_v36 = vld [vmem:[#allocation302_spill] sm:$0xff]  ;;  %s5677_s27 = smov 107  }
 0x4a9   : > { %v4468_v39 = vpop.permute.xlu1 %4467  ;;  %v4063_v51 = vcombine.high %v8651_v53, %v8641_v23  ;;  %v8710_v13 = vsel %vm1997_vm1, %v1996_v40, %v9590_v60  ;;  %v8713_v49 = vrot.slane %v4079_v31, %v6929_v22  ;;  %vm4897_vm3 = vcmask 56320   ;;  %v9597_v12 = vld [vmem:[#allocation117_spill] sm:$0xff] }
 0x4aa   : > { %v4464_v35 = vpop.permute.xlu0 %4463  ;;  %v4127_v11 = vcombine.high %v4070_v26, %v8666_v48  ;;  %v4134_v23 = vrot.slane %v4126_v43, %v7123_v7  ;;  %v4029_v0 = vcombine.high %v3989_v61, %v4021_v34  ;;  %v8721_v24 = vsel %vm1997_vm1, %v9592_v4, %v9591_v3 }
 0x4ab   : > { %v4891_v59 = vsel %vm4890_vm14, %v4889_v33, %v4464_v35  ;;  %4727 = vrot.lane.b32.xlu1 %v4025_v29, %s5661_s4  ;;  %v8724_v45 = vrot.slane %v4047_v30, %v6929_v22  ;;  %v4095_v52 = vcombine.high %v4038_v50, %v8674_v56  ;;  %v4028_v2 = vcombine.low %v3989_v61, %v4021_v34  ;;  %v9598_v35 = vld [vmem:[#allocation293_spill] sm:$0xff]  ;;  %s5678_s4 = smov 109  }
 0x4ac   : > { %v4893_v17 = vsel %vm4892_vm15, %v4891_v59, %v4468_v39  ;;  %4723 = vrot.lane.b32.xlu0 %v4024_v54, %s5662_s7  ;;  %v4102_v28 = vrot.slane %v4094_v9, %v7123_v7  ;;  %v8731_v20 = vsel %vm1997_vm1, %v9594_v14, %v9593_v36  ;;  %v4077_v42 = vrot.slane %v4063_v51, %v6929_v22  ;;  %v9599_v54 = vld [vmem:[#allocation15_spill] sm:$0xff]  ;;  %s5679_s7 = smov 110  }
 0x4ad   : > { %5062 = vst [vmem:[%s8690_s6] sm:$0xff] %v4893_v17  ;;  %v4476_v47 = vpop.permute.xlu1 %4475  ;;  %v8737_v40 = vsel %vm1997_vm1, %v8300_v57, %v9595_v25  ;;  %v4214_v37 = vcombine.low %v8731_v20, %v8710_v13  ;;  %vm4901_vm4 = vcmask 105472   ;;  %v4141_v58 = vrot.slane %v4127_v11, %v7123_v7 }
 0x4ae   : > { %v4472_v5 = vpop.permute.xlu0 %4471  ;;  %v4142_v48 = vcombine.low %v4077_v42, %v8713_v49  ;;  %v4159_v29 = vcombine.high %v4102_v28, %v4134_v23  ;;  %vm4903_vm5 = vcmask 130048   ;;  %v8747_v57 = vsel %vm1997_vm1, %v9597_v12, %v9596_v38 }
 0x4af   : > { %v4894_v18 = vsel %vm1868_vm0, %v4468_v39, %v4472_v5  ;;  %4735 = vrot.lane.b32.xlu1 %v4027_v15, %s5663_s1  ;;  %vm4899_vm0 = vcmask 80896   ;;  %v4182_v33 = vcombine.low %v8680_v1, %v8721_v24  ;;  %v8754_v32 = vsel %vm1997_vm1, %v9599_v54, %v9598_v35  ;;  %s5680_s1 = smov 112  }
 0x4b0   : > { %4731 = vrot.lane.b32.xlu0 %v4026_v16, %s5664_s17  ;;  %v4896_v44 = vsel %vm4895_vm2, %v4894_v18, %v4476_v47  ;;  %v4158_v26 = vcombine.low %v4102_v28, %v4134_v23  ;;  %v4109_v59 = vrot.slane %v4095_v52, %v7123_v7  ;;  %v4110_v55 = vcombine.low %v8699_v6, %v8724_v45  ;;  %s5681_s17 = smov 113  }
 0x4b1   : > { %v4484_v21 = vpop.permute.xlu1 %4483  ;;  %v4198_v19 = vcombine.low %v8754_v32, %v8737_v40  ;;  %v4166_v31 = vcombine.low %v8747_v57, %v8696_v41  ;;  %v8764_v17 = vrot.slane %v4214_v37, %v6929_v22  ;;  %vm4905_vm6 = vcmask 154624  }
 0x4b2   : > { %v4480_v53 = vpop.permute.xlu0 %4479  ;;  %v4143_v43 = vcombine.high %v4077_v42, %v8713_v49  ;;  %v4150_v47 = vrot.slane %v4142_v48, %v7123_v7  ;;  %v4161_v27 = vcombine.high %v4109_v59, %v4141_v58  ;;  %vm4907_vm7 = vcmask 179200  }
 0x4b3   : > { %v4898_v46 = vsel %vm4897_vm3, %v4896_v44, %v4480_v53  ;;  %4743 = vrot.lane.b32.xlu1 %v4029_v0, %s5665_s28  ;;  %v8770_v63 = vrot.slane %v4182_v33, %v6929_v22  ;;  %v4160_v5 = vcombine.low %v4109_v59, %v4141_v58  ;;  %v4111_v16 = vcombine.high %v8699_v6, %v8724_v45  ;;  %v9601_v33 = vld [vmem:[#allocation185_spill] sm:$0xff]  ;;  %s5682_s28 = smov 115  }
 0x4b4   : > { %4739 = vrot.lane.b32.xlu0 %v4028_v2, %s5666_s8  ;;  %v4900_v8 = vsel %vm4899_vm0, %v4898_v46, %v4484_v21  ;;  %v4118_v61 = vrot.slane %v4110_v55, %v7123_v7  ;;  %v4206_v9 = vrot.slane %v4198_v19, %v6929_v22  ;;  %v4174_v18 = vrot.slane %v4166_v31, %v6929_v22  ;;  %s5683_s8 = smov 116  }
 0x4b5   : > { %v4492_v39 = vpop.permute.xlu1 %4491  ;;  %vm4909_vm8 = vcmask 203776   ;;  %v4157_v44 = vrot.slane %v4143_v43, %v7123_v7  ;;  %vm4911_vm9 = vcmask 228352   ;;  %v4125_v3 = vrot.slane %v4111_v16, %v7123_v7 }
 0x4b6   : > { %v4488_v56 = vpop.permute.xlu0 %4487  ;;  %v4262_v49 = vcombine.low %v4206_v9, %v8764_v17  ;;  %v4163_v23 = vcombine.high %v4118_v61, %v4150_v47  ;;  %v4162_v21 = vcombine.low %v4118_v61, %v4150_v47  ;;  %v4230_v0 = vcombine.low %v4174_v18, %v8770_v63 }
 0x4b7   : > { %v4902_v50 = vsel %vm4901_vm4, %v4900_v8, %v4488_v56  ;;  %4751 = vrot.lane.b32.xlu1 %v4159_v29, %s5667_s20  ;;  %vm4913_vm10 = vcmask 252928   ;;  %v4165_v2 = vcombine.high %v4125_v3, %v4157_v44  ;;  %vm4915_vm11 = vcmask 277504   ;;  %s5684_s20 = smov 118  }
 0x4b8   : > { %4747 = vrot.lane.b32.xlu0 %v4158_v26, %s5668_s22  ;;  %v4904_v34 = vsel %vm4903_vm5, %v4902_v50, %v4492_v39  ;;  %v4270_v52 = vrot.slane %v4262_v49, %v7123_v7  ;;  %v4164_v36 = vcombine.low %v4125_v3, %v4157_v44  ;;  %v4238_v14 = vrot.slane %v4230_v0, %v7123_v7  ;;  %v9608_v3 = vld [vmem:[#allocation263_spill] sm:$0xff]  ;;  %s5685_s22 = smov 119  }
 0x4b9   : > { %v4500_v15 = vpop.permute.xlu1 %4499  ;;  %vm4917_vm12 = vcmask 302080   ;;  %v4215_v25 = vcombine.high %v8731_v20, %v8710_v13  ;;  %v4263_v37 = vcombine.high %v4206_v9, %v8764_v17  ;;  %vm4919_vm13 = vcmask 326656   ;;  %v9600_v20 = vld [vmem:[#allocation80_spill] sm:$0xff] }
 0x4ba   : > { %v4496_v30 = vpop.permute.xlu0 %4495  ;;  %v4294_v58 = vcombine.low %v4238_v14, %v4270_v52  ;;  %v4183_v39 = vcombine.high %v8680_v1, %v8721_v24  ;;  %v4231_v29 = vcombine.high %v4174_v18, %v8770_v63  ;;  %v4199_v38 = vcombine.high %v8754_v32, %v8737_v40  ;;  %v9605_v63 = vld [vmem:[#allocation88_spill] sm:$0xff] }
 0x4bb   : > { %v4906_v51 = vsel %vm4905_vm6, %v4904_v34, %v4496_v30  ;;  %4759 = vrot.lane.b32.xlu1 %v4161_v27, %s5669_s11  ;;  %v4167_v13 = vcombine.high %v8747_v57, %v8696_v41  ;;  %v9602_v35 = vcombine.low %v9600_v20, %v9601_v33  ;;  %vm4921_vm14 = vcmask 351232   ;;  %v9604_v27 = vld [vmem:[#allocation193_spill] sm:$0xff]  ;;  %s5686_s11 = smov 121  }
 0x4bc   : > { %4755 = vrot.lane.b32.xlu0 %v4160_v5, %s5670_s9  ;;  %v4908_v60 = vsel %vm4907_vm7, %v4906_v51, %v4500_v15  ;;  %v4229_v1 = vrot.slane %v4215_v25, %v6929_v22  ;;  %v4277_v24 = vrot.slane %v4263_v37, %v7123_v7  ;;  %v4295_v26 = vcombine.high %v4238_v14, %v4270_v52  ;;  %s5687_s9 = smov 122  }
 0x4bd   : > { %v4508_v11 = vpop.permute.xlu1 %4507  ;;  %vm4923_vm15 = vcmask 375808   ;;  %v4197_v32 = vrot.slane %v4183_v39, %v6929_v22  ;;  %v4245_v59 = vrot.slane %v4231_v29, %v7123_v7  ;;  %v4213_v41 = vrot.slane %v4199_v38, %v6929_v22 }
 0x4be   : > { %v4504_v6 = vpop.permute.xlu0 %4503  ;;  %v9603_v55 = vcombine.high %v9600_v20, %v9601_v33  ;;  %vm4925_vm2 = vcmask 400384   ;;  %v4181_v50 = vrot.slane %v4167_v13, %v6929_v22  ;;  %vm4927_vm3 = vcmask 424960  }
 0x4bf   : > { %v4910_v4 = vsel %vm4909_vm8, %v4908_v60, %v4504_v6  ;;  %4767 = vrot.lane.b32.xlu1 %v4163_v23, %s5671_s25  ;;  %v4278_v31 = vcombine.low %v4213_v41, %v4229_v1  ;;  %v4296_v34 = vcombine.low %v4245_v59, %v4277_v24  ;;  %v9606_v30 = vcombine.low %v9604_v27, %v9605_v63  ;;  %s5688_s25 = smov 124  }
 0x4c0   : > { %4763 = vrot.lane.b32.xlu0 %v4162_v21, %s5672_s30  ;;  %v4912_v45 = vsel %vm4911_vm9, %v4910_v4, %v4508_v11  ;;  %v4246_v47 = vcombine.low %v4181_v50, %v4197_v32  ;;  %vm4929_vm0 = vcmask 449536   ;;  %v4297_v22 = vcombine.high %v4245_v59, %v4277_v24  ;;  %v9609_v4 = vld [vmem:[#allocation248_spill] sm:$0xff]  ;;  %s5689_s30 = smov 125  }
 0x4c1   : > { %v4516_v53 = vpop.permute.xlu1 %4515  ;;  %v4286_v16 = vrot.slane %v4278_v31, %v7123_v7  ;;  %vm4931_vm4 = vcmask 474112   ;;  %v9607_v60 = vcombine.high %v9604_v27, %v9605_v63  ;;  %vm4933_vm5 = vcmask 498688  }
 0x4c2   : > { %v4512_v28 = vpop.permute.xlu0 %4511  ;;  %v4254_v51 = vrot.slane %v4246_v47, %v7123_v7  ;;  %v4279_v44 = vcombine.high %v4213_v41, %v4229_v1  ;;  %vm4935_vm6 = vcmask 523264   ;;  %v4247_v21 = vcombine.high %v4181_v50, %v4197_v32 }
 0x4c3   : > { %v4914_v42 = vsel %vm4913_vm10, %v4912_v45, %v4512_v28  ;;  %4775 = vrot.lane.b32.xlu1 %v4165_v2, %s5673_s19  ;;  %v9610_v45 = vcombine.low %v9608_v3, %v9609_v4  ;;  %vm4937_vm7 = vcmask 547840   ;;  %vm4939_vm8 = vcmask 572416   ;;  %s5210_s19 = smul.u32 384, %s5732_s16 }
 0x4c4   : > { %4771 = vrot.lane.b32.xlu0 %v4164_v36, %s5674_s29  ;;  %v4916_v46 = vsel %vm4915_vm11, %v4914_v42, %v4516_v53  ;;  %v4298_v23 = vcombine.low %v4254_v51, %v4286_v16  ;;  %v4293_v53 = vrot.slane %v4279_v44, %v7123_v7  ;;  %v4299_v28 = vcombine.high %v4254_v51, %v4286_v16  ;;  %s5080_s29 = sshll.u32 %s8690_s6, 4  ;;  %s8840_s29 = int_to_ptr.vmem [resolvable:$true] %s5080_s29 }
 0x4c5   : > { %v4524_v8 = vpop.permute.xlu1 %4523  ;;  %v4261_v14 = vrot.slane %v4247_v21, %v7123_v7  ;;  %vm4941_vm9 = vcmask 596992   ;;  %vm4943_vm10 = vcmask 621568   ;;  %v9612_v7 = vcombine.low %v7721_v62, %v7736_v10  ;;  %s8838_s16 = scalar_lea.hbm %s8886_s3, %s5210_s19 }
 0x4c6   : > { %v4520_v48 = vpop.permute.xlu0 %4519  ;;  %vm4945_vm11 = vcmask 646144  }
 0x4c7   : > { %v4918_v12 = vsel %vm4917_vm12, %v4916_v46, %v4520_v48  ;;  %4779 = vrot.lane.b32.xlu1 %v4294_v58, %s5675_s5  ;;  %v9611_v46 = vcombine.high %v9608_v3, %v9609_v4  ;;  %vm4947_vm12 = vcmask 670720  }
 0x4c8   : > { %4611 = vrot.lane.b32.xlu0 %v9602_v35, %s5676_s26  ;;  %v4920_v54 = vsel %vm4919_vm13, %v4918_v12, %v4524_v8  ;;  %v4300_v8 = vcombine.low %v4261_v14, %v4293_v53  ;;  %v4301_v12 = vcombine.high %v4261_v14, %v4293_v53  ;;  %vm4949_vm13 = vcmask 695296  }
 0x4c9   : > { %v4532_v56 = vpop.permute.xlu1 %4531 }
 0x4ca   : > { %v4528_v40 = vpop.permute.xlu0 %4527 }
 0x4cb   : > { %v4922_v57 = vsel %vm4921_vm14, %v4920_v54, %v4528_v40  ;;  %4783 = vrot.lane.b32.xlu1 %v4295_v26, %s5677_s27  ;;  %vm4951_vm14 = vcmask 719872   ;;  %s5066_s27 = scalar_lea.sflag [#allocation4], %s5879_s10 }
 0x4cc   : > { %4615 = vrot.lane.b32.xlu0 %v9603_v55, %s5678_s4  ;;  %v4924_v19 = vsel %vm4923_vm15, %v4922_v57, %v4532_v56  ;;  %vm4953_vm15 = vcmask 744448   ;;  %s5486_s4 = scalar_lea.vmem %s8840_s29, 384 }
 0x4cd   : > { %v4540_v17 = vpop.permute.xlu1 %4539  ;;  %p5487_p10 = scmp.ne.s32.totalorder %s8840_s29, %s5486_s4 }
 0x4ce   : > { %v4536_v43 = vpop.permute.xlu0 %4535 }
 0x4cf   : > { %v4926_v15 = vsel %vm4925_vm2, %v4924_v19, %v4536_v43  ;;  %4787 = vrot.lane.b32.xlu1 %v4296_v34, %s5679_s7  ;;  %vm4955_vm2 = vcmask 769024   ;;  %p5488_p7 = pnand %p5487_p10, %p9613_p5  ;;  %s5690_s7 = smov [#allocation8]  }
 0x4d0   : > { %4619 = vrot.lane.b32.xlu0 %v9606_v30, %s5680_s1  ;;  %v4928_v5 = vsel %vm4927_vm3, %v4926_v15, %v4540_v17  ;;  %vm4957_vm3 = vcmask 793600   ;;  %s5490_s1 = sshll.u32 %s5690_s7, 4  ;;  %s5491_s1 = int_to_ptr.vmem [resolvable:$false] %s5490_s1 }
 0x4d1   : > { %v4548_v61 = vpop.permute.xlu1 %4547  ;;  %p5489_p9 = pneg %p5488_p7  ;;  %p5493_p6 = scmp.lt.s32.totalorder %s8840_s29, %s5491_s1 }
 0x4d2   : > { %v4544_v9 = vpop.permute.xlu0 %4543 }
 0x4d3   : > { %v4930_v18 = vsel %vm4929_vm0, %v4928_v5, %v4544_v9  ;;  %4791 = vrot.lane.b32.xlu1 %v4297_v22, %s5681_s17  ;;  %vm4959_vm0 = vcmask 818176   ;;  %s5492_s17 = scalar_lea.vmem %s5491_s1, 768 }
 0x4d4   : > { %4623 = vrot.lane.b32.xlu0 %v9607_v60, %s5682_s28  ;;  %v4932_v49 = vsel %vm4931_vm4, %v4930_v18, %v4548_v61  ;;  %vm4961_vm4 = vcmask 842752   ;;  %p5494_p12 = scmp.lt.s32.totalorder %s5492_s17, %s5486_s4 }
 0x4d5   : > { %v4556_v11 = vpop.permute.xlu1 %4555 }
 0x4d6   : > { %v4552_v6 = vpop.permute.xlu0 %4551  ;;  %p5495_p0 = por %p5494_p12, %p5493_p6 }
 0x4d7   : > { %v4934_v0 = vsel %vm4933_vm5, %v4932_v49, %v4552_v6  ;;  %4795 = vrot.lane.b32.xlu1 %v4298_v23, %s5683_s8  ;;  %vm4980_vm5 = vcmask 39936  }
 0x4d8   : > { %4627 = vrot.lane.b32.xlu0 %v9610_v45, %s5684_s20  ;;  %v4936_v52 = vsel %vm4935_vm6, %v4934_v0, %v4556_v11  ;;  %vm4982_vm6 = vcmask 64512   ;;  %p5496_p8 = pnand %p5495_p0, %p5489_p9 }
 0x4d9   : > { %v4564_v2 = vpop.permute.xlu1 %4563 }
 0x4da   : > { %v4560_v36 = vpop.permute.xlu0 %4559 }
 0x4db   : > { %v4938_v42 = vsel %vm4937_vm7, %v4936_v52, %v4560_v36  ;;  %4799 = vrot.lane.b32.xlu1 %v4299_v28, %s5685_s22  ;;  %vm4984_vm7 = vcmask 89088  }
 0x4dc   : > { %4631 = vrot.lane.b32.xlu0 %v9611_v46, %s5686_s11  ;;  %v4940_v25 = vsel %vm4939_vm8, %v4938_v42, %v4564_v2  ;;  %vm4986_vm8 = vcmask 113664  }
 0x4dd   : > { %v4572_v37 = vpop.permute.xlu1 %4571 }
 0x4de   : > { %v4568_v58 = vpop.permute.xlu0 %4567 }
 0x4df   : > { %v4942_v48 = vsel %vm4941_vm9, %v4940_v25, %v4568_v58  ;;  %4803 = vrot.lane.b32.xlu1 %v4300_v8, %s5687_s9  ;;  %vm4988_vm9 = vcmask 138240  }
 0x4e0   : > { %4635 = vrot.lane.b32.xlu0 %v9612_v7, %s5688_s25  ;;  %v4944_v39 = vsel %vm4943_vm10, %v4942_v48, %v4572_v37  ;;  %vm4990_vm10 = vcmask 162816  }
 0x4e1   : > { %v4580_v29 = vpop.permute.xlu1 %4579 }
 0x4e2   : > { %v4576_v38 = vpop.permute.xlu0 %4575 }
 0x4e3   : > { %v4946_v13 = vsel %vm4945_vm11, %v4944_v39, %v4576_v38  ;;  %vm4992_vm11 = vcmask 187392  }
 0x4e4   : > { %4807 = vrot.lane.b32.xlu0 %v4301_v12, %s5689_s30  ;;  %v4948_v20 = vsel %vm4947_vm12, %v4946_v13, %v4580_v29  ;;  %vm4996_vm12 = vcmask 236544  }
 0x4e5   : > { %v4588_v33 = vpop.permute.xlu1 %4587 }
 0x4e6   : > { %v4584_v35 = vpop.permute.xlu0 %4583 }
 0x4e7   : > { %v4950_v54 = vsel %vm4949_vm13, %v4948_v20, %v4584_v35  ;;  %vm4998_vm13 = vcmask 261120  }
 0x4e8   : > { %v4952_v1 = vsel %vm4951_vm14, %v4950_v54, %v4588_v33  ;;  %vm5000_vm14 = vcmask 285696  }
 0x4e9   : > { %v4596_v24 = vpop.permute.xlu1 %4595 }
 0x4ea   : > { %v4592_v62 = vpop.permute.xlu0 %4591 }
 0x4eb   : > { %v4954_v10 = vsel %vm4953_vm15, %v4952_v1, %v4592_v62  ;;  %vm5002_vm15 = vcmask 310272  }
 0x4ec   : > { %v4956_v56 = vsel %vm4955_vm2, %v4954_v10, %v4596_v24  ;;  %vm5004_vm2 = vcmask 334848  }
 0x4ed   : > { %v4604_v26 = vpop.permute.xlu1 %4603 }
 0x4ee   : > { %v4600_v40 = vpop.permute.xlu0 %4599 }
 0x4ef   : > { %v4958_v32 = vsel %vm4957_vm3, %v4956_v56, %v4600_v40  ;;  %vm5006_vm3 = vcmask 359424  }
 0x4f0   : > { %v4960_v59 = vsel %vm4959_vm0, %v4958_v32, %v4604_v26  ;;  %vm5008_vm0 = vcmask 384000  }
 0x4f1   : > { %v8824_v41 = vpop.permute.xlu1 %4639 }
 0x4f2   : > { %v4608_v57 = vpop.permute.xlu0 %4607 }
 0x4f3   : > { %v8826_v55 = vsel %vm4961_vm4, %v4960_v59, %v4608_v57  ;;  %vm5010_vm4 = vcmask 408576  }
 0x4f5   : > { %v4648_v19 = vpop.permute.xlu1 %4647 }
 0x4f6   : > { %v4644_v50 = vpop.permute.xlu0 %4643 }
 0x4f7   : > { %v4979_v16 = vsel %vm1997_vm1, %v8824_v41, %v4644_v50  ;;  %vm4994_vm1 = vcmask 211968  }
 0x4f8   : > { %v4981_v9 = vsel %vm4980_vm5, %v4979_v16, %v4648_v19  ;;  %vm5012_vm5 = vcmask 433152  }
 0x4f9   : > { %v4656_v31 = vpop.permute.xlu1 %4655 }
 0x4fa   : > { %v4652_v17 = vpop.permute.xlu0 %4651 }
 0x4fb   : > { %v4983_v51 = vsel %vm4982_vm6, %v4981_v9, %v4652_v17  ;;  %vm5014_vm6 = vcmask 457728  }
 0x4fc   : > { %v4985_v49 = vsel %vm4984_vm7, %v4983_v51, %v4656_v31  ;;  %vm5016_vm7 = vcmask 482304  }
 0x4fd   : > { %v4664_v34 = vpop.permute.xlu1 %4663 }
 0x4fe   : > { %v4660_v43 = vpop.permute.xlu0 %4659 }
 0x4ff   : > { %v4987_v44 = vsel %vm4986_vm8, %v4985_v49, %v4660_v43  ;;  %vm5018_vm8 = vcmask 506880  }
 0x500   : > { %v4989_v6 = vsel %vm4988_vm9, %v4987_v44, %v4664_v34  ;;  %vm5020_vm9 = vcmask 531456  }
 0x501   : > { %v4672_v47 = vpop.permute.xlu1 %4671 }
 0x502   : > { %v4668_v15 = vpop.permute.xlu0 %4667 }
 0x503   : > { %v4991_v21 = vsel %vm4990_vm10, %v4989_v6, %v4668_v15  ;;  %vm5022_vm10 = vcmask 556032  }
 0x504   : > { %v4993_v4 = vsel %vm4992_vm11, %v4991_v21, %v4672_v47  ;;  %vm5024_vm11 = vcmask 580608  }
 0x505   : > { %v4680_v27 = vpop.permute.xlu1 %4679 }
 0x506   : > { %v4676_v63 = vpop.permute.xlu0 %4675 }
 0x507   : > { %v4995_v45 = vsel %vm4994_vm1, %v4993_v4, %v4676_v63  ;;  %vm5026_vm1 = vcmask 605184  }
 0x508   : > { %v4997_v2 = vsel %vm4996_vm12, %v4995_v45, %v4680_v27  ;;  %vm5028_vm12 = vcmask 629760  }
 0x509   : > { %v4688_v30 = vpop.permute.xlu1 %4687 }
 0x50a   : > { %v4684_v5 = vpop.permute.xlu0 %4683 }
 0x50b   : > { %v4999_v28 = vsel %vm4998_vm13, %v4997_v2, %v4684_v5  ;;  %vm5030_vm13 = vcmask 654336  }
 0x50c   : > { %v5001_v42 = vsel %vm5000_vm14, %v4999_v28, %v4688_v30  ;;  %vm5032_vm14 = vcmask 678912  }
 0x50d   : > { %v4696_v61 = vpop.permute.xlu1 %4695 }
 0x50e   : > { %v4692_v22 = vpop.permute.xlu0 %4691 }
 0x50f   : > { %v5003_v46 = vsel %vm5002_vm15, %v5001_v42, %v4692_v22  ;;  %vm5034_vm15 = vcmask 703488  }
 0x510   : > { %v5005_v8 = vsel %vm5004_vm2, %v5003_v46, %v4696_v61  ;;  %vm5036_vm2 = vcmask 728064  }
 0x511   : > { %v4704_v18 = vpop.permute.xlu1 %4703 }
 0x512   : > { %v4700_v60 = vpop.permute.xlu0 %4699 }
 0x513   : > { %v5007_v58 = vsel %vm5006_vm3, %v5005_v8, %v4700_v60  ;;  %vm5038_vm3 = vcmask 752640  }
 0x514   : > { %v5009_v39 = vsel %vm5008_vm0, %v5007_v58, %v4704_v18  ;;  %vm5040_vm0 = vcmask 777216  }
 0x515   : > { %v4712_v11 = vpop.permute.xlu1 %4711 }
 0x516   : > { %v4708_v23 = vpop.permute.xlu0 %4707 }
 0x517   : > { %v5011_v29 = vsel %vm5010_vm4, %v5009_v39, %v4708_v23  ;;  %vm5042_vm4 = vcmask 801792  }
 0x518   : > { %v5013_v13 = vsel %vm5012_vm5, %v5011_v29, %v4712_v11  ;;  %vm4963_vm5 = vcmask 867328  }
 0x519   : > { %v4720_v0 = vpop.permute.xlu1 %4719 }
 0x51a   : > { %v4716_v3 = vpop.permute.xlu0 %4715 }
 0x51b   : > { %v5015_v20 = vsel %vm5014_vm6, %v5013_v13, %v4716_v3  ;;  %vm4965_vm6 = vcmask 891904  }
 0x51c   : > { %v5017_v54 = vsel %vm5016_vm7, %v5015_v20, %v4720_v0  ;;  %vm5044_vm7 = vcmask 826368  }
 0x51d   : > { %v4728_v52 = vpop.permute.xlu1 %4727 }
 0x51e   : > { %v4724_v53 = vpop.permute.xlu0 %4723 }
 0x51f   : > { %v5019_v1 = vsel %vm5018_vm8, %v5017_v54, %v4724_v53  ;;  %vm4967_vm8 = vcmask 916480  }
 0x520   : > { %v5021_v10 = vsel %vm5020_vm9, %v5019_v1, %v4728_v52  ;;  %vm5046_vm9 = vcmask 850944  }
 0x521   : > { %v4736_v36 = vpop.permute.xlu1 %4735 }
 0x522   : > { %v4732_v14 = vpop.permute.xlu0 %4731 }
 0x523   : > { %v5023_v56 = vsel %vm5022_vm10, %v5021_v10, %v4732_v14  ;;  %vm4969_vm10 = vcmask 941056  }
 0x524   : > { %v5025_v32 = vsel %vm5024_vm11, %v5023_v56, %v4736_v36  ;;  %vm5048_vm11 = vcmask 875520  }
 0x525   : > { %v4744_v25 = vpop.permute.xlu1 %4743 }
 0x526   : > { %v4740_v37 = vpop.permute.xlu0 %4739 }
 0x527   : > { %v5027_v59 = vsel %vm5026_vm1, %v5025_v32, %v4740_v37  ;;  %vm4971_vm1 = vcmask 965632  }
 0x528   : > { %v5029_v50 = vsel %vm5028_vm12, %v5027_v59, %v4744_v25  ;;  %vm5050_vm12 = vcmask 900096  }
 0x529   : > { %v4752_v48 = vpop.permute.xlu1 %4751 }
 0x52a   : > { %v4748_v7 = vpop.permute.xlu0 %4747 }
 0x52b   : > { %v5031_v31 = vsel %vm5030_vm13, %v5029_v50, %v4748_v7  ;;  %vm4973_vm13 = vcmask 990208  }
 0x52c   : > { %v5033_v43 = vsel %vm5032_vm14, %v5031_v31, %v4752_v48  ;;  %vm5052_vm14 = vcmask 924672  }
 0x52d   : > { %v4760_v38 = vpop.permute.xlu1 %4759 }
 0x52e   : > { %v4756_v12 = vpop.permute.xlu0 %4755 }
 0x52f   : > { %v5035_v47 = vsel %vm5034_vm15, %v5033_v43, %v4756_v12  ;;  %vm4975_vm15 = vcmask 1014784  }
 0x530   : > { %v5037_v63 = vsel %vm5036_vm2, %v5035_v47, %v4760_v38  ;;  %vm5054_vm2 = vcmask 949248  }
 0x531   : > { %v4768_v33 = vpop.permute.xlu1 %4767 }
 0x532   : > { %v4764_v35 = vpop.permute.xlu0 %4763 }
 0x533   : > { %v5039_v30 = vsel %vm5038_vm3, %v5037_v63, %v4764_v35  ;;  %vm4977_vm3 = vcmask 1039360  }
 0x534   : > { %v5041_v61 = vsel %vm5040_vm0, %v5039_v30, %v4768_v33  ;;  %vm5056_vm0 = vcmask 973824  }
 0x535   : > { %v4776_v24 = vpop.permute.xlu1 %4775 }
 0x536   : > { %v4772_v62 = vpop.permute.xlu0 %4771 }
 0x537   : > { %v5043_v22 = vsel %vm5042_vm4, %v5041_v61, %v4772_v62  ;;  %vm5058_vm4 = vcmask 998400  }
 0x538   : > { %v5045_v49 = vsel %vm5044_vm7, %v5043_v22, %v4776_v24 }
 0x539   : > { %v4780_v26 = vpop.permute.xlu1 %4779 }
 0x53a   : > { %v4612_v40 = vpop.permute.xlu0 %4611  ;;  %v5047_v11 = vsel %vm5046_vm9, %v5045_v49, %v4780_v26 }
 0x53b   : > { %v4964_v9 = vsel %vm4963_vm5, %v8826_v55, %v4612_v40  ;;  %vm5060_vm5 = vcmask 1022976  }
 0x53d   : > { %v4784_v57 = vpop.permute.xlu1 %4783 }
 0x53e   : > { %v4616_v19 = vpop.permute.xlu0 %4615  ;;  %v5049_v6 = vsel %vm5048_vm11, %v5047_v11, %v4784_v57 }
 0x53f   : > { %v4966_v18 = vsel %vm4965_vm6, %v4964_v9, %v4616_v19 }
 0x541   : > { %v4788_v17 = vpop.permute.xlu1 %4787 }
 0x542   : > { %v4620_v34 = vpop.permute.xlu0 %4619  ;;  %v5051_v55 = vsel %vm5050_vm12, %v5049_v6, %v4788_v17 }
 0x543   : > { %v4968_v44 = vsel %vm4967_vm8, %v4966_v18, %v4620_v34 }
 0x545   : > { %v4792_v15 = vpop.permute.xlu1 %4791 }
 0x546   : > { %v4624_v27 = vpop.permute.xlu0 %4623  ;;  %v5053_v4 = vsel %vm5052_vm14, %v5051_v55, %v4792_v15 }
 0x547   : > { %v4970_v23 = vsel %vm4969_vm10, %v4968_v44, %v4624_v27 }
 0x549   : > { %v4796_v5 = vpop.permute.xlu1 %4795 }
 0x54a   : > { %v4628_v16 = vpop.permute.xlu0 %4627  ;;  %v5055_v53 = vsel %vm5054_vm2, %v5053_v4, %v4796_v5 }
 0x54b   : > { %v4972_v21 = vsel %vm4971_vm1, %v4970_v23, %v4628_v16 }
 0x54d   : > { %v4800_v51 = vpop.permute.xlu1 %4799 }
 0x54e   : > { %v4632_v60 = vpop.permute.xlu0 %4631  ;;  %v5057_v28 = vsel %vm5056_vm0, %v5055_v53, %v4800_v51 }
 0x54f   : > { %v4974_v0 = vsel %vm4973_vm13, %v4972_v21, %v4632_v60 }
 0x551   : > { %v4804_v45 = vpop.permute.xlu1 %4803 }
 0x552   : > { %v4636_v3 = vpop.permute.xlu0 %4635  ;;  %v5059_v36 = vsel %vm5058_vm4, %v5057_v28, %v4804_v45 }
 0x553   : > { %v4976_v52 = vsel %vm4975_vm15, %v4974_v0, %v4636_v3 }
 0x554   : > { %v4978_v2 = vsel %vm4977_vm3, %v4976_v52, %v8824_v41 }
 0x555   : > { %5063 = vst [vmem:[%s8690_s6 + $0x8] sm:$0xff] %v4978_v2 }
 0x556   : > { %v4808_v14 = vpop.permute.xlu0 %4807 }
 0x557   : > { %v5061_v42 = vsel %vm5060_vm5, %v5059_v36, %v4808_v14 }
 0x558   : > { %5064 = vst [vmem:[%s8690_s6 + $0x10] sm:$0xff] %v5061_v42 }
 0x559   : > { %5499 = shalt.err (!%p5496_p8)
}
 0x55a   : > { %s5500_s10 = scalar_lea.hbm %s8838_s16, 384  ;;  %s5504_s8 = scalar_lea.hbm %s8886_s3, 768 }
 0x55b   : > { %p5501_p13 = scmp.ne.s32.totalorder %s8838_s16, %s5500_s10  ;;  %p5505_p3 = scmp.lt.u32.totalorder %s8838_s16, %s8886_s3 }
 0x55c   : > { %p5506_p4 = scmp.lt.u32.totalorder %s5504_s8, %s5500_s10  ;;  %p5508_p10 = scmp.lt.u32.totalorder %s5500_s10, %s8838_s16 }
 0x55d   : > { %p5502_p11 = pnand %p5501_p13, %p9613_p5 }
 0x55e   : > { %p5507_p2 = por %p5506_p4, %p5505_p3 }
 0x55f   : > { %p5503_p1 = pneg %p5502_p11 }
 0x560   : > { %p5509_p7 = por %p5508_p10, %p5507_p2 }
 0x562   : > { %p5510_p9 = pnand %p5509_p7, %p5503_p1 }
 0x564   : > { %5513 = shalt.err (!%p5510_p9)
}
 0x565   : > { %5217 = dma.vmem_to_hbm [thread:$0]  (%p9613_p5), %s8840_s29, 384, %s8838_s16, %s5066_s27  }
 0x566 PF: > { %s5092_s11 = sand.u32 1, %s5544_s12   ;;  %p9614_p6 = scmp.ne.s32.totalorder %s8929_s24, 0 }
 0x567   : > { %p9615_p12 = scmp.ge.s32.totalorder %s5556_s15, 2  ;;  %s5093_s9 = scalar_lea.sflag [#allocation4], %s5092_s11 }
 0x569   : > { %p5230_p0 = pnand %p9615_p12, %p9614_p6 }
 0x56b   : > { %5539 = dma.done.wait (!%p5230_p0), %s5093_s9, 384  }
 0x56c   : > { %5541 = vsyncadd (!%p5230_p0), %s5093_s9, 4294966912  ;;  %p19_p8 = scmp.ge.s32.totalorder %s5736_s18, 4   ;;  %s9616_s12 = smov %s5548_s13 }
 0x56d   : > { %s9617_s13 = smov %s5552_s14  ;;  %s9618_s14 = smov %s5748_s21 }
 0x56e   : > { %s9619_s15 = smov %s5736_s18  ;;  %21 = sbr.rel (!%p19_p8) target bundleno = 9 (0x9), region = 101 }
 0x575   :  { %5098 = vsyncpa [#allocation3], 1 }
 0x576   :  { %5100 = vsyncpa [#allocation3 + $0x1], 1 }
 0x577   :  { %5101 = vsyncpa [#allocation6], 1 }
 0x578   :  { %5103 = vsyncpa [#allocation6 + $0x1], 1 }
 0x579   :  { %5104 = vsyncpa [#allocation4], 1 }
 0x57a   :  { %5106 = vsyncpa [#allocation4 + $0x1], 1 }

</bundles_post_ra>
